<compile_context>
chip_gen: v5e
topology: v5e:2x2
jax: 0.10.0
libtpu: 0.0.40
codegen_flags: <defaults>
</compile_context>

<pallas_src>
import functools
import math
import re

import jax
import jax.numpy as jnp
from jax.experimental import pallas as pl
from jax.experimental.pallas import tpu as pltpu

D_MODEL = 180
N_HEAD = 4
HEAD_DIM = D_MODEL // N_HEAD          # 45
HEAD_PAD = 128                        # zero-padded per-head width (lane aligned)
D_FF = 4 * D_MODEL                    # 720
LN_EPS = 1e-5
SELU_ALPHA = 1.6732632423543772
SELU_SCALE = 1.0507009873554805


# ---------------------------------------------------------------------------
# Causal mask — reproduces the torch code EXACTLY (including its quirk):
#   triu(ones)==1 → transpose → float → masked_fill(triu(ones)==0, -inf)
# Result: M[i, j] = -inf if j < i, 1.0 if j == i, 0.0 if j > i.
# (Used by the pure-JAX reference; the kernel builds it in-VMEM via iota.)
# ---------------------------------------------------------------------------
def generate_causal_mask(sz):
    i = jnp.arange(sz)[:, None]
    j = jnp.arange(sz)[None, :]
    base = (j <= i).astype(jnp.float32)
    return jnp.where(j < i, -jnp.inf, base)


# ---------------------------------------------------------------------------
# Pallas kernel: one batch-block per grid step, everything resident in VMEM.
# ---------------------------------------------------------------------------
def _layernorm(x, g, b):
    mu = jnp.mean(x, axis=-1, keepdims=True)
    var = jnp.mean(jnp.square(x - mu), axis=-1, keepdims=True)
    return (x - mu) * jax.lax.rsqrt(var + LN_EPS) * g + b


def _ltr_kernel(x_ref, pos_ref,
                wqkv_ref, bqkv_ref, wo_ref, bo_ref,
                ln1_g_ref, ln1_b_ref, ln2_g_ref, ln2_b_ref,
                w1_ref, b1_ref, w2_ref, b2_ref,
                wfc_ref, bfc_ref,
                o_ref, *, bb, seq, exp_dtype):
    S, D = seq, D_MODEL
    HP = N_HEAD * HEAD_PAD                                  # 512
    M = bb * S

    # positional encoding; residual path stays f32
    f3 = x_ref[...] + pos_ref[...][None, :, :]              # (bb, S, D) f32
    f = f3.reshape(M, D)                                    # (M, D)  (flat rows for MXU)
    fb = f.astype(jnp.bfloat16)

    # Causal mask built in-kernel (iota + select, no HBM traffic).
    # Faithful to torch quirk: -inf strictly below diag, 1.0 on diag, 0.0 above.
    ri = jax.lax.broadcasted_iota(jnp.int32, (S, S), 0)
    ci = jax.lax.broadcasted_iota(jnp.int32, (S, S), 1)
    mask = jnp.where(ci < ri, jnp.float32(-jnp.inf),
                     jnp.where(ci == ri, jnp.float32(1.0), jnp.float32(0.0)))
    mask3 = mask[None, :, :]                                 # (1, S, S)

    # ----- fused (head-padded) QKV projection: bf16 MXU, f32 accumulate -----
    # 1/sqrt(head_dim) and Q bias already folded into the packed Q weights.
    qkv = jnp.dot(fb, wqkv_ref[...], preferred_element_type=jnp.float32)
    qkv = (qkv + bqkv_ref[...]).astype(jnp.bfloat16)
    qkv3 = qkv.reshape(bb, S, 3 * HP)                        # (bb, S, 1536)

    # ----- multi-head masked self-attention, batched over bb --------------
    # heads statically unrolled (4); per-head output projection accumulated
    # directly into an (M, 180) f32 running value (no head/row concats).
    attn = jnp.zeros((M, D), jnp.float32)
    for h in range(N_HEAD):
        c0 = h * HEAD_PAD                                    # 128-aligned lane slice
        qh = qkv3[:, :, c0:c0 + HEAD_PAD]                    # (bb, S, 128) bf16
        kh = qkv3[:, :, HP + c0:HP + c0 + HEAD_PAD]
        vh = qkv3[:, :, 2 * HP + c0:2 * HP + c0 + HEAD_PAD]

        s = jax.lax.dot_general(qh, kh, (((2,), (2,)), ((0,), (0,))),
                                preferred_element_type=jnp.float32)   # (bb, S, S)
        s = s + mask3
        m = jnp.max(s, axis=-1, keepdims=True)
        # exp in bf16 on v6e/v7x (bf16 EUP), f32 on v5e; max/sum/recip in f32.
        e = jnp.exp((s - m).astype(exp_dtype))
        e32 = e.astype(jnp.float32)
        l = jnp.sum(e32, axis=-1, keepdims=True)
        p = (e32 * pl.reciprocal(l, approx=True)).astype(jnp.bfloat16)

        ctx = jax.lax.dot_general(p, vh, (((2,), (1,)), ((0,), (0,))),
                                  preferred_element_type=jnp.float32)  # (bb, S, 128)
        ctx2 = ctx.reshape(M, HEAD_PAD).astype(jnp.bfloat16)
        attn = attn + jnp.dot(ctx2, wo_ref[h],
                              preferred_element_type=jnp.float32)      # (M, D)
    attn = attn + bo_ref[...]

    # ----- post-norm residual block 1 -----
    src = _layernorm(f + attn, ln1_g_ref[...], ln1_b_ref[...])

    # ----- feed-forward (relu); dropout = identity (eval) -----
    hdn = jnp.maximum(
        jnp.dot(src.astype(jnp.bfloat16), w1_ref[...],
                preferred_element_type=jnp.float32) + b1_ref[...], 0.0)
    ffn = jnp.dot(hdn.astype(jnp.bfloat16), w2_ref[...],
                  preferred_element_type=jnp.float32) + b2_ref[...]
    c = _layernorm(src + ffn, ln2_g_ref[...], ln2_b_ref[...])

    # ----- FC + SELU + residual -----
    fc = jnp.dot(c.astype(jnp.bfloat16), wfc_ref[...],
                 preferred_element_type=jnp.float32) + bfc_ref[...]
    selu = SELU_SCALE * jnp.where(fc > 0, fc, SELU_ALPHA * (jnp.exp(fc) - 1.0))
    out = selu + c

    o_ref[...] = out.reshape(bb, S, D)


# ---------------------------------------------------------------------------
# Parameter init (torch layout: Linear weights are (out, in)), deterministic.
# ---------------------------------------------------------------------------
def init_params(key, max_seq_len=1000):
    ks = jax.random.split(key, 12)

    def nrm(k, shape, scale=0.02):
        return (scale * jax.random.normal(k, shape)).astype(jnp.float32)

    return dict(
        pos=jax.random.normal(ks[0], (max_seq_len, D_MODEL)).astype(jnp.float32),
        in_proj_w=nrm(ks[1], (3 * D_MODEL, D_MODEL)),
        in_proj_b=nrm(ks[2], (3 * D_MODEL,)),
        out_proj_w=nrm(ks[3], (D_MODEL, D_MODEL)),
        out_proj_b=nrm(ks[4], (D_MODEL,)),
        ln1_g=jnp.ones((D_MODEL,), jnp.float32),
        ln1_b=jnp.zeros((D_MODEL,), jnp.float32),
        ln2_g=jnp.ones((D_MODEL,), jnp.float32),
        ln2_b=jnp.zeros((D_MODEL,), jnp.float32),
        linear1_w=nrm(ks[5], (D_FF, D_MODEL)),
        linear1_b=nrm(ks[6], (D_FF,)),
        linear2_w=nrm(ks[7], (D_MODEL, D_FF)),
        linear2_b=nrm(ks[8], (D_MODEL,)),
        fc_w=nrm(ks[9], (D_MODEL, D_MODEL)),
        fc_b=nrm(ks[10], (D_MODEL,)),
    )


def _pack_params(p):
    """torch-layout -> kernel layout: transposed, head-padded 45->128, fused
    QKV, per-head output projection (NH, 128, 180), bf16 weights, 1/sqrt(hd)
    folded into Q."""
    D, NH, HD, HP = D_MODEL, N_HEAD, HEAD_DIM, HEAD_PAD
    bf16, f32 = jnp.bfloat16, jnp.float32
    inv_sqrt = jnp.float32(1.0 / math.sqrt(HD))

    wt = p['in_proj_w'].T.astype(f32)          # (D, 3D): x @ W^T convention
    bt = p['in_proj_b'].astype(f32)
    wq, wk, wv = wt[:, :D] * inv_sqrt, wt[:, D:2 * D], wt[:, 2 * D:]
    bq, bk, bv = bt[:D] * inv_sqrt, bt[D:2 * D], bt[2 * D:]

    def pad_w(w):                              # (D, D) -> (D, NH*HP), zero pad
        w3 = w.reshape(D, NH, HD)
        return jnp.pad(w3, ((0, 0), (0, 0), (0, HP - HD))).reshape(D, NH * HP)

    def pad_b(b):                              # (D,) -> (1, NH*HP)
        b2 = jnp.pad(b.reshape(NH, HD), ((0, 0), (0, HP - HD)))
        return b2.reshape(1, NH * HP)

    wqkv = jnp.concatenate([pad_w(wq), pad_w(wk), pad_w(wv)], axis=1)   # (D, 3*NH*HP)
    bqkv = jnp.concatenate([pad_b(bq), pad_b(bk), pad_b(bv)], axis=1)   # (1, 3*NH*HP)

    wo3 = p['out_proj_w'].T.reshape(NH, HD, D)                          # rows per head
    wo = jnp.pad(wo3, ((0, 0), (0, HP - HD), (0, 0)))                   # (NH, HP, D)

    return [
        wqkv.astype(bf16), bqkv.astype(f32),
        wo.astype(bf16), p['out_proj_b'].reshape(1, D).astype(f32),
        p['ln1_g'].reshape(1, D).astype(f32), p['ln1_b'].reshape(1, D).astype(f32),
        p['ln2_g'].reshape(1, D).astype(f32), p['ln2_b'].reshape(1, D).astype(f32),
        p['linear1_w'].T.astype(bf16), p['linear1_b'].reshape(1, D_FF).astype(f32),
        p['linear2_w'].T.astype(bf16), p['linear2_b'].reshape(1, D).astype(f32),
        p['fc_w'].T.astype(bf16), p['fc_b'].reshape(1, D).astype(f32),
    ]


def _rep_spec(shape):
    nd = len(shape)
    return pl.BlockSpec(shape, lambda b, _nd=nd: (0,) * _nd)


def _tpu_generation():
    """Best-effort TPU generation (5, 6, 7, ...). Defaults to 6."""
    try:
        kind = jax.devices()[0].device_kind.lower()
    except Exception:
        return 6
    m = re.search(r"v(\d+)", kind)
    return int(m.group(1)) if m else 6


def _choose_batch_block(B, S, gen):
    """Batch rows per grid step.  Priority order (per perf review):
       1) MXU row utilization: M = BB*S >= 256 (128 on v5e), under a per-gen
          row cap (v7x 64 MiB VMEM => 1024 rows when S >= 512).
       2) v7x only: keep >= 2 grid steps so both TensorCores get work.
       3) Prefer >= 2 grid steps per core for DMA/compute overlap, but never
          at the cost of dropping M below the target.
       4) Among remaining candidates, cap M around 1024 rows (VMEM)."""
    cores = 2 if gen >= 7 else 1
    cap_rows = 1024 if (gen >= 7 and S >= 512) else 2048
    m_target = 128 if gen == 5 else 256
    m_pref_cap = 1024

    divs = [d for d in range(1, B + 1) if B % d == 0]
    fitting = [d for d in divs if d * S <= cap_rows] or [1]
    meets = [d for d in fitting if d * S >= m_target]
    if not meets:
        return max(fitting)                       # maximize M even below target
    if cores >= 2:
        two_tc = [d for d in meets if B // d >= cores]
        if two_tc:
            meets = two_tc
    overlap = [d for d in meets if B // d >= 2 * cores]
    pool = overlap if overlap else meets
    under = [d for d in pool if d * S <= m_pref_cap]
    return max(under) if under else min(pool)


def _vmem_limit_bytes(bb, S, gen):
    """Coarse per-step working-set estimate, capped per generation
    (v7x: 0.72 * 64 MiB; v5e/v6e: 0.85 * 128 MiB)."""
    M = bb * S
    qkv_n = 3 * N_HEAD * HEAD_PAD                       # 1536
    acts = M * (qkv_n * 6                               # qkv f32 + bf16
                + D_FF * 6                              # ffn hidden f32 + bf16
                + D_MODEL * 4 * 10                      # f/attn/src/ffn/c/fc temps
                + HEAD_PAD * 8)                         # per-head ctx temps
    scores = bb * S * S * 4 * 3 + S * S * 4             # s / e / p + mask
    io = 2 * 2 * M * D_MODEL * 4 + S * D_MODEL * 4      # double-buffered x/out + pos
    weights = 2 * 2 * (D_MODEL * qkv_n + N_HEAD * HEAD_PAD * D_MODEL
                       + 2 * D_MODEL * D_FF + D_MODEL * D_MODEL)
    est = int(1.4 * (acts + scores + io + weights)) + (8 << 20)
    try:
        capacity = int(pltpu.get_tpu_info().vmem_capacity_bytes)
    except Exception:
        capacity = (64 << 20) if gen >= 7 else (128 << 20)
    cap = int(capacity * (0.72 if gen >= 7 else 0.85))
    return max(32 << 20, min(cap, est))


# ---------------------------------------------------------------------------
# Wrapper
# ---------------------------------------------------------------------------
def long_time_regression(x, params):
    # rank promotion, exactly as in the torch forward
    if x.ndim == 1:
        x = x[None, None, :]
    elif x.ndim == 2:
        x = x[None, :]
    x = x.astype(jnp.float32)
    B, S, D = x.shape
    assert D == D_MODEL
    assert S <= params['pos'].shape[0], "seq_len exceeds positional-encoder max_seq_len"

    gen = _tpu_generation()
    exp_dtype = jnp.bfloat16 if gen >= 6 else jnp.float32   # v5e EUP has no bf16

    pos = params['pos'][:S].astype(jnp.float32)             # (S, D)
    weights = _pack_params(params)
    BB = _choose_batch_block(B, S, gen)

    in_specs = [pl.BlockSpec((BB, S, D), lambda i: (i, 0, 0)),   # x
                _rep_spec((S, D))]                               # positional enc
    in_specs += [_rep_spec(tuple(w.shape)) for w in weights]

    kernel = functools.partial(_ltr_kernel, bb=BB, seq=S, exp_dtype=exp_dtype)
    out = pl.pallas_call(
        kernel,
        out_shape=jax.ShapeDtypeStruct((B, S, D), jnp.float32),
        grid_spec=pltpu.PrefetchScalarGridSpec(
            num_scalar_prefetch=0,
            grid=(B // BB,),
            in_specs=in_specs,
            out_specs=pl.BlockSpec((BB, S, D), lambda i: (i, 0, 0)),
        ),
        compiler_params=pltpu.CompilerParams(
            dimension_semantics=("parallel",),
            vmem_limit_bytes=_vmem_limit_bytes(BB, S, gen)),
    )(x, pos, *weights)

    # torch's .squeeze(0): only squeezes if the batch dim is 1
    return out[0] if out.shape[0] == 1 else out


# ---------------------------------------------------------------------------
# Pure-JAX reference (torch-layout math, full f32) for verification
# ---------------------------------------------------------------------------
def reference_forward(x, p):
    if x.ndim == 1:
        x = x[None, None, :]
    elif x.ndim == 2:
        x = x[None, :]
    B, S, D = x.shape
    f = x + p['pos'][None, :S]
    mask = generate_causal_mask(S)

    qkv = jnp.einsum('bsd,ed->bse', f, p['in_proj_w']) + p['in_proj_b']
    q, k, v = jnp.split(qkv, 3, axis=-1)

    def split_heads(t):
        return t.reshape(B, S, N_HEAD, HEAD_DIM).transpose(0, 2, 1, 3)

    qh, kh, vh = map(split_heads, (q, k, v))
    s = jnp.einsum('bhqd,bhkd->bhqk', qh, kh) / math.sqrt(HEAD_DIM) + mask
    prob = jax.nn.softmax(s, axis=-1)
    ctx = jnp.einsum('bhqk,bhkd->bhqd', prob, vh).transpose(0, 2, 1, 3).reshape(B, S, D)
    attn = ctx @ p['out_proj_w'].T + p['out_proj_b']

    def ln(t, g, b):
        mu = t.mean(-1, keepdims=True)
        var = ((t - mu) ** 2).mean(-1, keepdims=True)
        return (t - mu) * jax.lax.rsqrt(var + LN_EPS) * g + b

    src = ln(f + attn, p['ln1_g'], p['ln1_b'])
    ffn = jnp.maximum(src @ p['linear1_w'].T + p['linear1_b'], 0.0) \
        @ p['linear2_w'].T + p['linear2_b']
    c = ln(src + ffn, p['ln2_g'], p['ln2_b'])
    fc = c @ p['fc_w'].T + p['fc_b']
    selu = SELU_SCALE * jnp.where(fc > 0, fc, SELU_ALPHA * (jnp.exp(fc) - 1.0))
    o = selu + c
    return o[0] if o.shape[0] == 1 else o


# ---------------------------------------------------------------------------
if __name__ == "__main__":
    key = jax.random.PRNGKey(0)
    pkey, xkey = jax.random.split(key)

    params = init_params(pkey, max_seq_len=1000)
    x = jax.random.normal(xkey, (2, 8, D_MODEL), dtype=jnp.float32)  # (B, S, D)

    out = long_time_regression(x, params)
    out = jax.block_until_ready(out)

    ref = reference_forward(x, params)
    assert out.shape == (2, 8, D_MODEL), out.shape
    max_err = float(jnp.max(jnp.abs(out - ref)))
    # bf16 matmul operands (f32 accumulation) + bf16 softmax exp + approx
    # reciprocal vs full-f32 reference: errors are O(1e-3); anything
    # structurally wrong would be O(1).
    assert jnp.allclose(out, ref, atol=2e-2, rtol=2e-2), max_err

    print("KERNEL_OK")
</pallas_src>

<mosaic_0001>
module attributes {stable_mosaic.version = 11 : i64} {
  func.func @_ltr_kernel(%arg0: i32, %arg1: memref<2x8x180xf32, #tpu.memory_space<vmem>>, %arg2: memref<8x180xf32, #tpu.memory_space<vmem>>, %arg3: memref<180x1536xbf16, #tpu.memory_space<vmem>>, %arg4: memref<1x1536xf32, #tpu.memory_space<vmem>>, %arg5: memref<4x128x180xbf16, #tpu.memory_space<vmem>>, %arg6: memref<1x180xf32, #tpu.memory_space<vmem>>, %arg7: memref<1x180xf32, #tpu.memory_space<vmem>>, %arg8: memref<1x180xf32, #tpu.memory_space<vmem>>, %arg9: memref<1x180xf32, #tpu.memory_space<vmem>>, %arg10: memref<1x180xf32, #tpu.memory_space<vmem>>, %arg11: memref<180x720xbf16, #tpu.memory_space<vmem>>, %arg12: memref<1x720xf32, #tpu.memory_space<vmem>>, %arg13: memref<720x180xbf16, #tpu.memory_space<vmem>>, %arg14: memref<1x180xf32, #tpu.memory_space<vmem>>, %arg15: memref<180x180xbf16, #tpu.memory_space<vmem>>, %arg16: memref<1x180xf32, #tpu.memory_space<vmem>>, %arg17: memref<2x8x180xf32, #tpu.memory_space<vmem>>) attributes {dimension_semantics = [#tpu.dimension_semantics<parallel>], iteration_bounds = array<i64: 1>, scalar_prefetch = 0 : i64, scratch_operands = 0 : i64, tpu.core_type = #tpu.core_type<tc>, window_params = [{transform_indices = @transform_0, window_bounds = array<i64: 2, 8, 180>}, {pipeline_mode = #tpu.pipeline_mode<synchronous>, transform_indices = @transform_1, window_bounds = array<i64: 8, 180>}, {pipeline_mode = #tpu.pipeline_mode<synchronous>, transform_indices = @transform_2, window_bounds = array<i64: 180, 1536>}, {pipeline_mode = #tpu.pipeline_mode<synchronous>, transform_indices = @transform_3, window_bounds = array<i64: 1, 1536>}, {pipeline_mode = #tpu.pipeline_mode<synchronous>, transform_indices = @transform_4, window_bounds = array<i64: 4, 128, 180>}, {pipeline_mode = #tpu.pipeline_mode<synchronous>, transform_indices = @transform_5, window_bounds = array<i64: 1, 180>}, {pipeline_mode = #tpu.pipeline_mode<synchronous>, transform_indices = @transform_6, window_bounds = array<i64: 1, 180>}, {pipeline_mode = #tpu.pipeline_mode<synchronous>, transform_indices = @transform_7, window_bounds = array<i64: 1, 180>}, {pipeline_mode = #tpu.pipeline_mode<synchronous>, transform_indices = @transform_8, window_bounds = array<i64: 1, 180>}, {pipeline_mode = #tpu.pipeline_mode<synchronous>, transform_indices = @transform_9, window_bounds = array<i64: 1, 180>}, {pipeline_mode = #tpu.pipeline_mode<synchronous>, transform_indices = @transform_10, window_bounds = array<i64: 180, 720>}, {pipeline_mode = #tpu.pipeline_mode<synchronous>, transform_indices = @transform_11, window_bounds = array<i64: 1, 720>}, {pipeline_mode = #tpu.pipeline_mode<synchronous>, transform_indices = @transform_12, window_bounds = array<i64: 720, 180>}, {pipeline_mode = #tpu.pipeline_mode<synchronous>, transform_indices = @transform_13, window_bounds = array<i64: 1, 180>}, {pipeline_mode = #tpu.pipeline_mode<synchronous>, transform_indices = @transform_14, window_bounds = array<i64: 180, 180>}, {pipeline_mode = #tpu.pipeline_mode<synchronous>, transform_indices = @transform_15, window_bounds = array<i64: 1, 180>}, {transform_indices = @transform_16, window_bounds = array<i64: 2, 8, 180>}]} {
    %c0 = arith.constant 0 : index
    %c0_0 = arith.constant 0 : index
    %c0_1 = arith.constant 0 : index
    %0 = vector.load %arg1[%c0, %c0_0, %c0_1] : memref<2x8x180xf32, #tpu.memory_space<vmem>>, vector<2x8x180xf32>
    %c0_2 = arith.constant 0 : index
    %c0_3 = arith.constant 0 : index
    %1 = vector.load %arg2[%c0_2, %c0_3] : memref<8x180xf32, #tpu.memory_space<vmem>>, vector<8x180xf32>
    %2 = vector.shape_cast %1 : vector<8x180xf32> to vector<1x8x180xf32>
    %3 = vector.broadcast %2 : vector<1x8x180xf32> to vector<2x8x180xf32>
    %4 = arith.addf %0, %3 : vector<2x8x180xf32>
    %5 = vector.shape_cast %4 : vector<2x8x180xf32> to vector<16x180xf32>
    %6 = arith.truncf %5 : vector<16x180xf32> to vector<16x180xbf16>
    %7 = tpu.iota {dimensions = array<i32: 0>} : vector<8x8xi32>
    %8 = tpu.iota {dimensions = array<i32: 1>} : vector<8x8xi32>
    %9 = arith.cmpi slt, %8, %7 : vector<8x8xi32>
    %10 = arith.cmpi eq, %8, %7 : vector<8x8xi32>
    %cst = arith.constant 1.000000e+00 : f32
    %cst_4 = arith.constant 0.000000e+00 : f32
    %11 = vector.broadcast %cst : f32 to vector<8x8xf32>
    %12 = vector.broadcast %cst_4 : f32 to vector<8x8xf32>
    %13 = arith.select %10, %11, %12 : vector<8x8xi1>, vector<8x8xf32>
    %cst_5 = arith.constant 0xFF800000 : f32
    %14 = vector.broadcast %cst_5 : f32 to vector<8x8xf32>
    %15 = arith.select %9, %14, %13 : vector<8x8xi1>, vector<8x8xf32>
    %16 = vector.shape_cast %15 : vector<8x8xf32> to vector<1x8x8xf32>
    %c0_6 = arith.constant 0 : index
    %c0_7 = arith.constant 0 : index
    %17 = vector.load %arg3[%c0_6, %c0_7] : memref<180x1536xbf16, #tpu.memory_space<vmem>>, vector<180x1536xbf16>
    %cst_8 = arith.constant dense<0.000000e+00> : vector<16x1536xf32>
    %18 = tpu.matmul %6, %17, %cst_8 {dimension_numbers = #tpu.dot_dimension_numbers<[1], [0], [0], [1], [0, 0, 1, 1], [], []>} : vector<16x180xbf16>, vector<180x1536xbf16>, vector<16x1536xf32> -> vector<16x1536xf32>
    %c0_9 = arith.constant 0 : index
    %c0_10 = arith.constant 0 : index
    %19 = vector.load %arg4[%c0_9, %c0_10] : memref<1x1536xf32, #tpu.memory_space<vmem>>, vector<1x1536xf32>
    %20 = vector.broadcast %19 : vector<1x1536xf32> to vector<16x1536xf32>
    %21 = arith.addf %18, %20 : vector<16x1536xf32>
    %22 = arith.truncf %21 : vector<16x1536xf32> to vector<16x1536xbf16>
    %23 = vector.shape_cast %22 : vector<16x1536xbf16> to vector<2x8x1536xbf16>
    %cst_11 = arith.constant 0.000000e+00 : f32
    %24 = vector.broadcast %cst_11 : f32 to vector<16x180xf32>
    %25 = vector.extract_strided_slice %23 {offsets = [0, 0, 0], sizes = [2, 8, 128], strides = [1, 1, 1]} : vector<2x8x1536xbf16> to vector<2x8x128xbf16>
    %26 = vector.extract_strided_slice %23 {offsets = [0, 0, 512], sizes = [2, 8, 128], strides = [1, 1, 1]} : vector<2x8x1536xbf16> to vector<2x8x128xbf16>
    %27 = vector.extract_strided_slice %23 {offsets = [0, 0, 1024], sizes = [2, 8, 128], strides = [1, 1, 1]} : vector<2x8x1536xbf16> to vector<2x8x128xbf16>
    %cst_12 = arith.constant dense<0.000000e+00> : vector<2x8x8xf32>
    %28 = tpu.matmul %25, %26, %cst_12 {dimension_numbers = #tpu.dot_dimension_numbers<[2], [2], [1], [1], [0, 0, 0, 1, 1, 1], [0], [0]>} : vector<2x8x128xbf16>, vector<2x8x128xbf16>, vector<2x8x8xf32> -> vector<2x8x8xf32>
    %29 = vector.broadcast %16 : vector<1x8x8xf32> to vector<2x8x8xf32>
    %30 = arith.addf %28, %29 : vector<2x8x8xf32>
    %cst_13 = arith.constant dense<0xFF800000> : vector<2x8xf32>
    %31 = vector.multi_reduction <maximumf>, %30, %cst_13 [2] : vector<2x8x8xf32> to vector<2x8xf32>
    %32 = vector.shape_cast %31 : vector<2x8xf32> to vector<2x8x1xf32>
    %33 = vector.broadcast %32 : vector<2x8x1xf32> to vector<2x8x8xf32>
    %34 = arith.subf %30, %33 : vector<2x8x8xf32>
    %35 = arith.truncf %34 : vector<2x8x8xf32> to vector<2x8x8xbf16>
    %36 = math.exp %35 : vector<2x8x8xbf16>
    %37 = arith.extf %36 : vector<2x8x8xbf16> to vector<2x8x8xf32>
    %cst_14 = arith.constant dense<0.000000e+00> : vector<2x8xf32>
    %38 = vector.multi_reduction <add>, %37, %cst_14 [2] : vector<2x8x8xf32> to vector<2x8xf32>
    %39 = vector.shape_cast %38 : vector<2x8xf32> to vector<2x8x1xf32>
    %40 = tpu.reciprocal %39 {approx = true} : vector<2x8x1xf32> -> vector<2x8x1xf32>
    %41 = vector.broadcast %40 : vector<2x8x1xf32> to vector<2x8x8xf32>
    %42 = arith.mulf %37, %41 : vector<2x8x8xf32>
    %43 = arith.truncf %42 : vector<2x8x8xf32> to vector<2x8x8xbf16>
    %cst_15 = arith.constant dense<0.000000e+00> : vector<2x8x128xf32>
    %44 = tpu.matmul %43, %27, %cst_15 {dimension_numbers = #tpu.dot_dimension_numbers<[2], [1], [1], [2], [0, 0, 0, 1, 1, 2], [0], [0]>} : vector<2x8x8xbf16>, vector<2x8x128xbf16>, vector<2x8x128xf32> -> vector<2x8x128xf32>
    %45 = vector.shape_cast %44 : vector<2x8x128xf32> to vector<16x128xf32>
    %46 = arith.truncf %45 : vector<16x128xf32> to vector<16x128xbf16>
    %c0_16 = arith.constant 0 : index
    %c0_17 = arith.constant 0 : index
    %c0_18 = arith.constant 0 : index
    %47 = vector.load %arg5[%c0_16, %c0_17, %c0_18] : memref<4x128x180xbf16, #tpu.memory_space<vmem>>, vector<1x128x180xbf16>
    %48 = vector.shape_cast %47 : vector<1x128x180xbf16> to vector<128x180xbf16>
    %cst_19 = arith.constant dense<0.000000e+00> : vector<16x180xf32>
    %49 = tpu.matmul %46, %48, %cst_19 {dimension_numbers = #tpu.dot_dimension_numbers<[1], [0], [0], [1], [0, 0, 1, 1], [], []>} : vector<16x128xbf16>, vector<128x180xbf16>, vector<16x180xf32> -> vector<16x180xf32>
    %50 = arith.addf %24, %49 : vector<16x180xf32>
    %51 = vector.extract_strided_slice %23 {offsets = [0, 0, 128], sizes = [2, 8, 128], strides = [1, 1, 1]} : vector<2x8x1536xbf16> to vector<2x8x128xbf16>
    %52 = vector.extract_strided_slice %23 {offsets = [0, 0, 640], sizes = [2, 8, 128], strides = [1, 1, 1]} : vector<2x8x1536xbf16> to vector<2x8x128xbf16>
    %53 = vector.extract_strided_slice %23 {offsets = [0, 0, 1152], sizes = [2, 8, 128], strides = [1, 1, 1]} : vector<2x8x1536xbf16> to vector<2x8x128xbf16>
    %cst_20 = arith.constant dense<0.000000e+00> : vector<2x8x8xf32>
    %54 = tpu.matmul %51, %52, %cst_20 {dimension_numbers = #tpu.dot_dimension_numbers<[2], [2], [1], [1], [0, 0, 0, 1, 1, 1], [0], [0]>} : vector<2x8x128xbf16>, vector<2x8x128xbf16>, vector<2x8x8xf32> -> vector<2x8x8xf32>
    %55 = vector.broadcast %16 : vector<1x8x8xf32> to vector<2x8x8xf32>
    %56 = arith.addf %54, %55 : vector<2x8x8xf32>
    %cst_21 = arith.constant dense<0xFF800000> : vector<2x8xf32>
    %57 = vector.multi_reduction <maximumf>, %56, %cst_21 [2] : vector<2x8x8xf32> to vector<2x8xf32>
    %58 = vector.shape_cast %57 : vector<2x8xf32> to vector<2x8x1xf32>
    %59 = vector.broadcast %58 : vector<2x8x1xf32> to vector<2x8x8xf32>
    %60 = arith.subf %56, %59 : vector<2x8x8xf32>
    %61 = arith.truncf %60 : vector<2x8x8xf32> to vector<2x8x8xbf16>
    %62 = math.exp %61 : vector<2x8x8xbf16>
    %63 = arith.extf %62 : vector<2x8x8xbf16> to vector<2x8x8xf32>
    %cst_22 = arith.constant dense<0.000000e+00> : vector<2x8xf32>
    %64 = vector.multi_reduction <add>, %63, %cst_22 [2] : vector<2x8x8xf32> to vector<2x8xf32>
    %65 = vector.shape_cast %64 : vector<2x8xf32> to vector<2x8x1xf32>
    %66 = tpu.reciprocal %65 {approx = true} : vector<2x8x1xf32> -> vector<2x8x1xf32>
    %67 = vector.broadcast %66 : vector<2x8x1xf32> to vector<2x8x8xf32>
    %68 = arith.mulf %63, %67 : vector<2x8x8xf32>
    %69 = arith.truncf %68 : vector<2x8x8xf32> to vector<2x8x8xbf16>
    %cst_23 = arith.constant dense<0.000000e+00> : vector<2x8x128xf32>
    %70 = tpu.matmul %69, %53, %cst_23 {dimension_numbers = #tpu.dot_dimension_numbers<[2], [1], [1], [2], [0, 0, 0, 1, 1, 2], [0], [0]>} : vector<2x8x8xbf16>, vector<2x8x128xbf16>, vector<2x8x128xf32> -> vector<2x8x128xf32>
    %71 = vector.shape_cast %70 : vector<2x8x128xf32> to vector<16x128xf32>
    %72 = arith.truncf %71 : vector<16x128xf32> to vector<16x128xbf16>
    %c1 = arith.constant 1 : index
    %c0_24 = arith.constant 0 : index
    %c0_25 = arith.constant 0 : index
    %73 = vector.load %arg5[%c1, %c0_24, %c0_25] : memref<4x128x180xbf16, #tpu.memory_space<vmem>>, vector<1x128x180xbf16>
    %74 = vector.shape_cast %73 : vector<1x128x180xbf16> to vector<128x180xbf16>
    %cst_26 = arith.constant dense<0.000000e+00> : vector<16x180xf32>
    %75 = tpu.matmul %72, %74, %cst_26 {dimension_numbers = #tpu.dot_dimension_numbers<[1], [0], [0], [1], [0, 0, 1, 1], [], []>} : vector<16x128xbf16>, vector<128x180xbf16>, vector<16x180xf32> -> vector<16x180xf32>
    %76 = arith.addf %50, %75 : vector<16x180xf32>
    %77 = vector.extract_strided_slice %23 {offsets = [0, 0, 256], sizes = [2, 8, 128], strides = [1, 1, 1]} : vector<2x8x1536xbf16> to vector<2x8x128xbf16>
    %78 = vector.extract_strided_slice %23 {offsets = [0, 0, 768], sizes = [2, 8, 128], strides = [1, 1, 1]} : vector<2x8x1536xbf16> to vector<2x8x128xbf16>
    %79 = vector.extract_strided_slice %23 {offsets = [0, 0, 1280], sizes = [2, 8, 128], strides = [1, 1, 1]} : vector<2x8x1536xbf16> to vector<2x8x128xbf16>
    %cst_27 = arith.constant dense<0.000000e+00> : vector<2x8x8xf32>
    %80 = tpu.matmul %77, %78, %cst_27 {dimension_numbers = #tpu.dot_dimension_numbers<[2], [2], [1], [1], [0, 0, 0, 1, 1, 1], [0], [0]>} : vector<2x8x128xbf16>, vector<2x8x128xbf16>, vector<2x8x8xf32> -> vector<2x8x8xf32>
    %81 = vector.broadcast %16 : vector<1x8x8xf32> to vector<2x8x8xf32>
    %82 = arith.addf %80, %81 : vector<2x8x8xf32>
    %cst_28 = arith.constant dense<0xFF800000> : vector<2x8xf32>
    %83 = vector.multi_reduction <maximumf>, %82, %cst_28 [2] : vector<2x8x8xf32> to vector<2x8xf32>
    %84 = vector.shape_cast %83 : vector<2x8xf32> to vector<2x8x1xf32>
    %85 = vector.broadcast %84 : vector<2x8x1xf32> to vector<2x8x8xf32>
    %86 = arith.subf %82, %85 : vector<2x8x8xf32>
    %87 = arith.truncf %86 : vector<2x8x8xf32> to vector<2x8x8xbf16>
    %88 = math.exp %87 : vector<2x8x8xbf16>
    %89 = arith.extf %88 : vector<2x8x8xbf16> to vector<2x8x8xf32>
    %cst_29 = arith.constant dense<0.000000e+00> : vector<2x8xf32>
    %90 = vector.multi_reduction <add>, %89, %cst_29 [2] : vector<2x8x8xf32> to vector<2x8xf32>
    %91 = vector.shape_cast %90 : vector<2x8xf32> to vector<2x8x1xf32>
    %92 = tpu.reciprocal %91 {approx = true} : vector<2x8x1xf32> -> vector<2x8x1xf32>
    %93 = vector.broadcast %92 : vector<2x8x1xf32> to vector<2x8x8xf32>
    %94 = arith.mulf %89, %93 : vector<2x8x8xf32>
    %95 = arith.truncf %94 : vector<2x8x8xf32> to vector<2x8x8xbf16>
    %cst_30 = arith.constant dense<0.000000e+00> : vector<2x8x128xf32>
    %96 = tpu.matmul %95, %79, %cst_30 {dimension_numbers = #tpu.dot_dimension_numbers<[2], [1], [1], [2], [0, 0, 0, 1, 1, 2], [0], [0]>} : vector<2x8x8xbf16>, vector<2x8x128xbf16>, vector<2x8x128xf32> -> vector<2x8x128xf32>
    %97 = vector.shape_cast %96 : vector<2x8x128xf32> to vector<16x128xf32>
    %98 = arith.truncf %97 : vector<16x128xf32> to vector<16x128xbf16>
    %c2 = arith.constant 2 : index
    %c0_31 = arith.constant 0 : index
    %c0_32 = arith.constant 0 : index
    %99 = vector.load %arg5[%c2, %c0_31, %c0_32] : memref<4x128x180xbf16, #tpu.memory_space<vmem>>, vector<1x128x180xbf16>
    %100 = vector.shape_cast %99 : vector<1x128x180xbf16> to vector<128x180xbf16>
    %cst_33 = arith.constant dense<0.000000e+00> : vector<16x180xf32>
    %101 = tpu.matmul %98, %100, %cst_33 {dimension_numbers = #tpu.dot_dimension_numbers<[1], [0], [0], [1], [0, 0, 1, 1], [], []>} : vector<16x128xbf16>, vector<128x180xbf16>, vector<16x180xf32> -> vector<16x180xf32>
    %102 = arith.addf %76, %101 : vector<16x180xf32>
    %103 = vector.extract_strided_slice %23 {offsets = [0, 0, 384], sizes = [2, 8, 128], strides = [1, 1, 1]} : vector<2x8x1536xbf16> to vector<2x8x128xbf16>
    %104 = vector.extract_strided_slice %23 {offsets = [0, 0, 896], sizes = [2, 8, 128], strides = [1, 1, 1]} : vector<2x8x1536xbf16> to vector<2x8x128xbf16>
    %105 = vector.extract_strided_slice %23 {offsets = [0, 0, 1408], sizes = [2, 8, 128], strides = [1, 1, 1]} : vector<2x8x1536xbf16> to vector<2x8x128xbf16>
    %cst_34 = arith.constant dense<0.000000e+00> : vector<2x8x8xf32>
    %106 = tpu.matmul %103, %104, %cst_34 {dimension_numbers = #tpu.dot_dimension_numbers<[2], [2], [1], [1], [0, 0, 0, 1, 1, 1], [0], [0]>} : vector<2x8x128xbf16>, vector<2x8x128xbf16>, vector<2x8x8xf32> -> vector<2x8x8xf32>
    %107 = vector.broadcast %16 : vector<1x8x8xf32> to vector<2x8x8xf32>
    %108 = arith.addf %106, %107 : vector<2x8x8xf32>
    %cst_35 = arith.constant dense<0xFF800000> : vector<2x8xf32>
    %109 = vector.multi_reduction <maximumf>, %108, %cst_35 [2] : vector<2x8x8xf32> to vector<2x8xf32>
    %110 = vector.shape_cast %109 : vector<2x8xf32> to vector<2x8x1xf32>
    %111 = vector.broadcast %110 : vector<2x8x1xf32> to vector<2x8x8xf32>
    %112 = arith.subf %108, %111 : vector<2x8x8xf32>
    %113 = arith.truncf %112 : vector<2x8x8xf32> to vector<2x8x8xbf16>
    %114 = math.exp %113 : vector<2x8x8xbf16>
    %115 = arith.extf %114 : vector<2x8x8xbf16> to vector<2x8x8xf32>
    %cst_36 = arith.constant dense<0.000000e+00> : vector<2x8xf32>
    %116 = vector.multi_reduction <add>, %115, %cst_36 [2] : vector<2x8x8xf32> to vector<2x8xf32>
    %117 = vector.shape_cast %116 : vector<2x8xf32> to vector<2x8x1xf32>
    %118 = tpu.reciprocal %117 {approx = true} : vector<2x8x1xf32> -> vector<2x8x1xf32>
    %119 = vector.broadcast %118 : vector<2x8x1xf32> to vector<2x8x8xf32>
    %120 = arith.mulf %115, %119 : vector<2x8x8xf32>
    %121 = arith.truncf %120 : vector<2x8x8xf32> to vector<2x8x8xbf16>
    %cst_37 = arith.constant dense<0.000000e+00> : vector<2x8x128xf32>
    %122 = tpu.matmul %121, %105, %cst_37 {dimension_numbers = #tpu.dot_dimension_numbers<[2], [1], [1], [2], [0, 0, 0, 1, 1, 2], [0], [0]>} : vector<2x8x8xbf16>, vector<2x8x128xbf16>, vector<2x8x128xf32> -> vector<2x8x128xf32>
    %123 = vector.shape_cast %122 : vector<2x8x128xf32> to vector<16x128xf32>
    %124 = arith.truncf %123 : vector<16x128xf32> to vector<16x128xbf16>
    %c3 = arith.constant 3 : index
    %c0_38 = arith.constant 0 : index
    %c0_39 = arith.constant 0 : index
    %125 = vector.load %arg5[%c3, %c0_38, %c0_39] : memref<4x128x180xbf16, #tpu.memory_space<vmem>>, vector<1x128x180xbf16>
    %126 = vector.shape_cast %125 : vector<1x128x180xbf16> to vector<128x180xbf16>
    %cst_40 = arith.constant dense<0.000000e+00> : vector<16x180xf32>
    %127 = tpu.matmul %124, %126, %cst_40 {dimension_numbers = #tpu.dot_dimension_numbers<[1], [0], [0], [1], [0, 0, 1, 1], [], []>} : vector<16x128xbf16>, vector<128x180xbf16>, vector<16x180xf32> -> vector<16x180xf32>
    %128 = arith.addf %102, %127 : vector<16x180xf32>
    %c0_41 = arith.constant 0 : index
    %c0_42 = arith.constant 0 : index
    %129 = vector.load %arg6[%c0_41, %c0_42] : memref<1x180xf32, #tpu.memory_space<vmem>>, vector<1x180xf32>
    %130 = vector.broadcast %129 : vector<1x180xf32> to vector<16x180xf32>
    %131 = arith.addf %128, %130 : vector<16x180xf32>
    %132 = arith.addf %5, %131 : vector<16x180xf32>
    %c0_43 = arith.constant 0 : index
    %c0_44 = arith.constant 0 : index
    %133 = vector.load %arg7[%c0_43, %c0_44] : memref<1x180xf32, #tpu.memory_space<vmem>>, vector<1x180xf32>
    %c0_45 = arith.constant 0 : index
    %c0_46 = arith.constant 0 : index
    %134 = vector.load %arg8[%c0_45, %c0_46] : memref<1x180xf32, #tpu.memory_space<vmem>>, vector<1x180xf32>
    %cst_47 = arith.constant dense<0.000000e+00> : vector<16xf32>
    %135 = vector.multi_reduction <add>, %132, %cst_47 [1] : vector<16x180xf32> to vector<16xf32>
    %136 = vector.shape_cast %135 : vector<16xf32> to vector<16x1xf32>
    %cst_48 = arith.constant 1.800000e+02 : f32
    %137 = vector.broadcast %cst_48 : f32 to vector<16x1xf32>
    %138 = arith.divf %136, %137 : vector<16x1xf32>
    %139 = vector.broadcast %138 : vector<16x1xf32> to vector<16x180xf32>
    %140 = arith.subf %132, %139 : vector<16x180xf32>
    %141 = arith.mulf %140, %140 : vector<16x180xf32>
    %cst_49 = arith.constant dense<0.000000e+00> : vector<16xf32>
    %142 = vector.multi_reduction <add>, %141, %cst_49 [1] : vector<16x180xf32> to vector<16xf32>
    %143 = vector.shape_cast %142 : vector<16xf32> to vector<16x1xf32>
    %cst_50 = arith.constant 1.800000e+02 : f32
    %144 = vector.broadcast %cst_50 : f32 to vector<16x1xf32>
    %145 = arith.divf %143, %144 : vector<16x1xf32>
    %146 = vector.broadcast %138 : vector<16x1xf32> to vector<16x180xf32>
    %147 = arith.subf %132, %146 : vector<16x180xf32>
    %cst_51 = arith.constant 9.99999974E-6 : f32
    %148 = vector.broadcast %cst_51 : f32 to vector<16x1xf32>
    %149 = arith.addf %145, %148 : vector<16x1xf32>
    %150 = math.rsqrt %149 : vector<16x1xf32>
    %151 = vector.broadcast %150 : vector<16x1xf32> to vector<16x180xf32>
    %152 = arith.mulf %147, %151 : vector<16x180xf32>
    %153 = vector.broadcast %133 : vector<1x180xf32> to vector<16x180xf32>
    %154 = arith.mulf %152, %153 : vector<16x180xf32>
    %155 = vector.broadcast %134 : vector<1x180xf32> to vector<16x180xf32>
    %156 = arith.addf %154, %155 : vector<16x180xf32>
    %157 = arith.truncf %156 : vector<16x180xf32> to vector<16x180xbf16>
    %c0_52 = arith.constant 0 : index
    %c0_53 = arith.constant 0 : index
    %158 = vector.load %arg11[%c0_52, %c0_53] : memref<180x720xbf16, #tpu.memory_space<vmem>>, vector<180x720xbf16>
    %cst_54 = arith.constant dense<0.000000e+00> : vector<16x720xf32>
    %159 = tpu.matmul %157, %158, %cst_54 {dimension_numbers = #tpu.dot_dimension_numbers<[1], [0], [0], [1], [0, 0, 1, 1], [], []>} : vector<16x180xbf16>, vector<180x720xbf16>, vector<16x720xf32> -> vector<16x720xf32>
    %c0_55 = arith.constant 0 : index
    %c0_56 = arith.constant 0 : index
    %160 = vector.load %arg12[%c0_55, %c0_56] : memref<1x720xf32, #tpu.memory_space<vmem>>, vector<1x720xf32>
    %161 = vector.broadcast %160 : vector<1x720xf32> to vector<16x720xf32>
    %162 = arith.addf %159, %161 : vector<16x720xf32>
    %cst_57 = arith.constant 0.000000e+00 : f32
    %163 = vector.broadcast %cst_57 : f32 to vector<16x720xf32>
    %164 = arith.maximumf %162, %163 : vector<16x720xf32>
    %165 = arith.truncf %164 : vector<16x720xf32> to vector<16x720xbf16>
    %c0_58 = arith.constant 0 : index
    %c0_59 = arith.constant 0 : index
    %166 = vector.load %arg13[%c0_58, %c0_59] : memref<720x180xbf16, #tpu.memory_space<vmem>>, vector<720x180xbf16>
    %cst_60 = arith.constant dense<0.000000e+00> : vector<16x180xf32>
    %167 = tpu.matmul %165, %166, %cst_60 {dimension_numbers = #tpu.dot_dimension_numbers<[1], [0], [0], [1], [0, 0, 1, 1], [], []>} : vector<16x720xbf16>, vector<720x180xbf16>, vector<16x180xf32> -> vector<16x180xf32>
    %c0_61 = arith.constant 0 : index
    %c0_62 = arith.constant 0 : index
    %168 = vector.load %arg14[%c0_61, %c0_62] : memref<1x180xf32, #tpu.memory_space<vmem>>, vector<1x180xf32>
    %169 = vector.broadcast %168 : vector<1x180xf32> to vector<16x180xf32>
    %170 = arith.addf %167, %169 : vector<16x180xf32>
    %171 = arith.addf %156, %170 : vector<16x180xf32>
    %c0_63 = arith.constant 0 : index
    %c0_64 = arith.constant 0 : index
    %172 = vector.load %arg9[%c0_63, %c0_64] : memref<1x180xf32, #tpu.memory_space<vmem>>, vector<1x180xf32>
    %c0_65 = arith.constant 0 : index
    %c0_66 = arith.constant 0 : index
    %173 = vector.load %arg10[%c0_65, %c0_66] : memref<1x180xf32, #tpu.memory_space<vmem>>, vector<1x180xf32>
    %cst_67 = arith.constant dense<0.000000e+00> : vector<16xf32>
    %174 = vector.multi_reduction <add>, %171, %cst_67 [1] : vector<16x180xf32> to vector<16xf32>
    %175 = vector.shape_cast %174 : vector<16xf32> to vector<16x1xf32>
    %cst_68 = arith.constant 1.800000e+02 : f32
    %176 = vector.broadcast %cst_68 : f32 to vector<16x1xf32>
    %177 = arith.divf %175, %176 : vector<16x1xf32>
    %178 = vector.broadcast %177 : vector<16x1xf32> to vector<16x180xf32>
    %179 = arith.subf %171, %178 : vector<16x180xf32>
    %180 = arith.mulf %179, %179 : vector<16x180xf32>
    %cst_69 = arith.constant dense<0.000000e+00> : vector<16xf32>
    %181 = vector.multi_reduction <add>, %180, %cst_69 [1] : vector<16x180xf32> to vector<16xf32>
    %182 = vector.shape_cast %181 : vector<16xf32> to vector<16x1xf32>
    %cst_70 = arith.constant 1.800000e+02 : f32
    %183 = vector.broadcast %cst_70 : f32 to vector<16x1xf32>
    %184 = arith.divf %182, %183 : vector<16x1xf32>
    %185 = vector.broadcast %177 : vector<16x1xf32> to vector<16x180xf32>
    %186 = arith.subf %171, %185 : vector<16x180xf32>
    %cst_71 = arith.constant 9.99999974E-6 : f32
    %187 = vector.broadcast %cst_71 : f32 to vector<16x1xf32>
    %188 = arith.addf %184, %187 : vector<16x1xf32>
    %189 = math.rsqrt %188 : vector<16x1xf32>
    %190 = vector.broadcast %189 : vector<16x1xf32> to vector<16x180xf32>
    %191 = arith.mulf %186, %190 : vector<16x180xf32>
    %192 = vector.broadcast %172 : vector<1x180xf32> to vector<16x180xf32>
    %193 = arith.mulf %191, %192 : vector<16x180xf32>
    %194 = vector.broadcast %173 : vector<1x180xf32> to vector<16x180xf32>
    %195 = arith.addf %193, %194 : vector<16x180xf32>
    %196 = arith.truncf %195 : vector<16x180xf32> to vector<16x180xbf16>
    %c0_72 = arith.constant 0 : index
    %c0_73 = arith.constant 0 : index
    %197 = vector.load %arg15[%c0_72, %c0_73] : memref<180x180xbf16, #tpu.memory_space<vmem>>, vector<180x180xbf16>
    %cst_74 = arith.constant dense<0.000000e+00> : vector<16x180xf32>
    %198 = tpu.matmul %196, %197, %cst_74 {dimension_numbers = #tpu.dot_dimension_numbers<[1], [0], [0], [1], [0, 0, 1, 1], [], []>} : vector<16x180xbf16>, vector<180x180xbf16>, vector<16x180xf32> -> vector<16x180xf32>
    %c0_75 = arith.constant 0 : index
    %c0_76 = arith.constant 0 : index
    %199 = vector.load %arg16[%c0_75, %c0_76] : memref<1x180xf32, #tpu.memory_space<vmem>>, vector<1x180xf32>
    %200 = vector.broadcast %199 : vector<1x180xf32> to vector<16x180xf32>
    %201 = arith.addf %198, %200 : vector<16x180xf32>
    %cst_77 = arith.constant 0.000000e+00 : f32
    %202 = vector.broadcast %cst_77 : f32 to vector<16x180xf32>
    %203 = arith.cmpf ogt, %201, %202 : vector<16x180xf32>
    %204 = math.exp %201 : vector<16x180xf32>
    %cst_78 = arith.constant 1.000000e+00 : f32
    %205 = vector.broadcast %cst_78 : f32 to vector<16x180xf32>
    %206 = arith.subf %204, %205 : vector<16x180xf32>
    %cst_79 = arith.constant 1.67326319 : f32
    %207 = vector.broadcast %cst_79 : f32 to vector<16x180xf32>
    %208 = arith.mulf %207, %206 : vector<16x180xf32>
    %209 = arith.select %203, %201, %208 : vector<16x180xi1>, vector<16x180xf32>
    %cst_80 = arith.constant 1.05070102 : f32
    %210 = vector.broadcast %cst_80 : f32 to vector<16x180xf32>
    %211 = arith.mulf %210, %209 : vector<16x180xf32>
    %212 = arith.addf %211, %195 : vector<16x180xf32>
    %213 = vector.shape_cast %212 : vector<16x180xf32> to vector<2x8x180xf32>
    %c0_81 = arith.constant 0 : index
    %c0_82 = arith.constant 0 : index
    %c0_83 = arith.constant 0 : index
    %214 = vector.load %arg17[%c0_81, %c0_82, %c0_83] : memref<2x8x180xf32, #tpu.memory_space<vmem>>, vector<2x8x180xf32>
    tpu.vector_store %arg17[%c0_81, %c0_82, %c0_83], %213 {strides = array<i32>} : memref<2x8x180xf32, #tpu.memory_space<vmem>>, vector<2x8x180xf32>,
    return
  }
  func.func @transform_0(%arg0: i32) -> (i32, i32, i32) {
    %c0_i32 = arith.constant 0 : i32
    %c0_i32_0 = arith.constant 0 : i32
    %c0_i32_1 = arith.constant 0 : i32
    return %arg0, %c0_i32, %c0_i32_0 : i32, i32, i32
  }
  func.func @transform_1(%arg0: i32) -> (i32, i32) {
    %c0_i32 = arith.constant 0 : i32
    %c0_i32_0 = arith.constant 0 : i32
    %c0_i32_1 = arith.constant 0 : i32
    return %c0_i32, %c0_i32_0 : i32, i32
  }
  func.func @transform_2(%arg0: i32) -> (i32, i32) {
    %c0_i32 = arith.constant 0 : i32
    %c0_i32_0 = arith.constant 0 : i32
    %c0_i32_1 = arith.constant 0 : i32
    return %c0_i32, %c0_i32_0 : i32, i32
  }
  func.func @transform_3(%arg0: i32) -> (i32, i32) {
    %c0_i32 = arith.constant 0 : i32
    %c0_i32_0 = arith.constant 0 : i32
    %c0_i32_1 = arith.constant 0 : i32
    return %c0_i32, %c0_i32_0 : i32, i32
  }
  func.func @transform_4(%arg0: i32) -> (i32, i32, i32) {
    %c0_i32 = arith.constant 0 : i32
    %c0_i32_0 = arith.constant 0 : i32
    %c0_i32_1 = arith.constant 0 : i32
    %c0_i32_2 = arith.constant 0 : i32
    return %c0_i32, %c0_i32_0, %c0_i32_1 : i32, i32, i32
  }
  func.func @transform_5(%arg0: i32) -> (i32, i32) {
    %c0_i32 = arith.constant 0 : i32
    %c0_i32_0 = arith.constant 0 : i32
    %c0_i32_1 = arith.constant 0 : i32
    return %c0_i32, %c0_i32_0 : i32, i32
  }
  func.func @transform_6(%arg0: i32) -> (i32, i32) {
    %c0_i32 = arith.constant 0 : i32
    %c0_i32_0 = arith.constant 0 : i32
    %c0_i32_1 = arith.constant 0 : i32
    return %c0_i32, %c0_i32_0 : i32, i32
  }
  func.func @transform_7(%arg0: i32) -> (i32, i32) {
    %c0_i32 = arith.constant 0 : i32
    %c0_i32_0 = arith.constant 0 : i32
    %c0_i32_1 = arith.constant 0 : i32
    return %c0_i32, %c0_i32_0 : i32, i32
  }
  func.func @transform_8(%arg0: i32) -> (i32, i32) {
    %c0_i32 = arith.constant 0 : i32
    %c0_i32_0 = arith.constant 0 : i32
    %c0_i32_1 = arith.constant 0 : i32
    return %c0_i32, %c0_i32_0 : i32, i32
  }
  func.func @transform_9(%arg0: i32) -> (i32, i32) {
    %c0_i32 = arith.constant 0 : i32
    %c0_i32_0 = arith.constant 0 : i32
    %c0_i32_1 = arith.constant 0 : i32
    return %c0_i32, %c0_i32_0 : i32, i32
  }
  func.func @transform_10(%arg0: i32) -> (i32, i32) {
    %c0_i32 = arith.constant 0 : i32
    %c0_i32_0 = arith.constant 0 : i32
    %c0_i32_1 = arith.constant 0 : i32
    return %c0_i32, %c0_i32_0 : i32, i32
  }
  func.func @transform_11(%arg0: i32) -> (i32, i32) {
    %c0_i32 = arith.constant 0 : i32
    %c0_i32_0 = arith.constant 0 : i32
    %c0_i32_1 = arith.constant 0 : i32
    return %c0_i32, %c0_i32_0 : i32, i32
  }
  func.func @transform_12(%arg0: i32) -> (i32, i32) {
    %c0_i32 = arith.constant 0 : i32
    %c0_i32_0 = arith.constant 0 : i32
    %c0_i32_1 = arith.constant 0 : i32
    return %c0_i32, %c0_i32_0 : i32, i32
  }
  func.func @transform_13(%arg0: i32) -> (i32, i32) {
    %c0_i32 = arith.constant 0 : i32
    %c0_i32_0 = arith.constant 0 : i32
    %c0_i32_1 = arith.constant 0 : i32
    return %c0_i32, %c0_i32_0 : i32, i32
  }
  func.func @transform_14(%arg0: i32) -> (i32, i32) {
    %c0_i32 = arith.constant 0 : i32
    %c0_i32_0 = arith.constant 0 : i32
    %c0_i32_1 = arith.constant 0 : i32
    return %c0_i32, %c0_i32_0 : i32, i32
  }
  func.func @transform_15(%arg0: i32) -> (i32, i32) {
    %c0_i32 = arith.constant 0 : i32
    %c0_i32_0 = arith.constant 0 : i32
    %c0_i32_1 = arith.constant 0 : i32
    return %c0_i32, %c0_i32_0 : i32, i32
  }
  func.func @transform_16(%arg0: i32) -> (i32, i32, i32) {
    %c0_i32 = arith.constant 0 : i32
    %c0_i32_0 = arith.constant 0 : i32
    %c0_i32_1 = arith.constant 0 : i32
    return %arg0, %c0_i32, %c0_i32_0 : i32, i32, i32
  }
}

</mosaic_0001>

<bundles_post_ra>
// kernel: tpu_custom_call.1
= control target key start
LH: loop header
LB: loop body
LE: loop exit
PB: predicated region body
PF: predicated region fallthrough
CT: control target
= control target key end

     0   :  { %s8511_s0 = inlined_call_operand.vmem [shape: f32[2,8,180], index: 0, kind: input, shape index: {}]   ;;  %s8512_s1 = inlined_call_operand.vmem [shape: f32[8,180], index: 1, kind: input, shape index: {}]   ;;  %s8513_s2 = inlined_call_operand.vmem [shape: bf16[180,1536], index: 2, kind: input, shape index: {}]   ;;  %s8514_s3 = inlined_call_operand.vmem [shape: f32[1,1536], index: 3, kind: input, shape index: {}]   ;;  %s8515_s4 = inlined_call_operand.vmem [shape: bf16[4,128,180], index: 4, kind: input, shape index: {}]   ;;  %s8516_s5 = inlined_call_operand.vmem [shape: f32[1,180], index: 5, kind: input, shape index: {}]   ;;  %s8517_s6 = inlined_call_operand.vmem [shape: f32[1,180], index: 6, kind: input, shape index: {}]   ;;  %s8518_s7 = inlined_call_operand.vmem [shape: f32[1,180], index: 7, kind: input, shape index: {}]   ;;  %s8519_s8 = inlined_call_operand.vmem [shape: f32[1,180], index: 8, kind: input, shape index: {}]   ;;  %s8520_s9 = inlined_call_operand.vmem [shape: f32[1,180], index: 9, kind: input, shape index: {}]   ;;  %s8521_s10 = inlined_call_operand.hbm [shape: bf16[180,720], index: 10, kind: input, shape index: {}]   ;;  %s8522_s11 = inlined_call_operand.vmem [shape: f32[1,720], index: 11, kind: input, shape index: {}]   ;;  %s8523_s12 = inlined_call_operand.vmem [shape: bf16[720,180], index: 12, kind: input, shape index: {}]   ;;  %s8524_s13 = inlined_call_operand.vmem [shape: f32[1,180], index: 13, kind: input, shape index: {}]   ;;  %s8525_s14 = inlined_call_operand.vmem [shape: bf16[180,180], index: 14, kind: input, shape index: {}]   ;;  %s8526_s15 = inlined_call_operand.vmem [shape: f32[1,180], index: 15, kind: input, shape index: {}]   ;;  %s8527_s16 = inlined_call_operand.hbm [shape: f32[2,8,180], index: 16, kind: output, shape index: {}]  }
   0x1   :  { %8529 = sst [smem:[#allocation8_spill]] %s8511_s0 }
   0x2   :  { %21 = vsyncpa [#allocation3], 0 }
   0x3   :  { %22 = vsyncpa [#allocation4], 0  ;;  %s47_s23 = sshll.u32 %s8521_s10, 4  ;;  %s6121_s24 = smov [#allocation2]   ;;  %s48_s23 = int_to_ptr.hbm [resolvable:$true] %s47_s23 }
   0x4   :  { %s49_s25 = sshll.u32 %s6121_s24, 4  ;;  %s6122_s26 = smov 384   ;;  %s50_s25 = int_to_ptr.vmem [resolvable:$true] %s49_s25 }
   0x5   :  { %s6123_s27 = smov 24  }
   0x6   :  { %55 = dma.hbm_to_vmem [thread:$0]  %s48_s23, 8832, %s50_s25, [#allocation3], %s6122_s26, %s6122_s26, %s6123_s27  }
   0x7   :  { %6117 = dma.done.wait [#allocation3], 8832  }
   0x8   :  { %6118 = vsyncadd [#allocation3], 4294958464  ;;  %v4397_v0 = vld [vmem:[%s8513_s2 + $0x2a0] sm:$0xf]  ;;  %v5727_v1 = vld [vmem:[%s8513_s2 + $0x2cc] sm:$0xf0] }
   0x9   :  { %v5721_v2 = vld [vmem:[%s8513_s2 + $0x2a4] sm:$0xf]  ;;  %v4398_v3 = vor.u32 %v5727_v1, %v4397_v0  ;;  %v4399_v4 = vld [vmem:[%s8513_s2 + $0x2d0] sm:$0xf0]  ;;  %v4349_v6 = vld [vmem:[%s8513_s2 + $0x240] sm:$0xf] }
   0xa   :  { %v223_v5 = vld [vmem:[%s8513_s2 + $0x420] sm:$0x33]  ;;  %v4402_v7 = vor.u32 %v5721_v2, %v4399_v4  ;;  %v5715_v9 = vld [vmem:[%s8513_s2 + $0x26c] sm:$0xf0]  ;;  %v4351_v11 = vld [vmem:[%s8513_s2 + $0x270] sm:$0xf0] }
   0xb   :  { %v659_v8 = vunpack.c.l.b16 %v223_v5  ;;  %v5709_v10 = vld [vmem:[%s8513_s2 + $0x244] sm:$0xf]  ;;  %v660_v12 = vunpack.c.h.b16 %v223_v5  ;;  %988 = vmatpush.bf16.msra.mxu0 %v4398_v3  ;;  %vm951_vm0 = vcmask 1041408   ;;  %v4350_v13 = vor.u32 %v5715_v9, %v4349_v6  ;;  %v4541_v14 = vld [vmem:[%s8513_s2 + $0x3c0] sm:$0xf]  ;;  %s8530_s22 = sld [smem:[#allocation8_spill]] }
   0xc   :  { %v5763_v15 = vld [vmem:[%s8513_s2 + $0x3ec] sm:$0xf0]  ;;  %1016 = vmatpush.bf16.msra.mxu2 %v4402_v7  ;;  %v4354_v17 = vor.u32 %v5709_v10, %v4351_v11  ;;  %v4301_v19 = vld [vmem:[%s8513_s2 + $0x1e0] sm:$0xf]  ;;  %v5697_v21 = vld [vmem:[%s8513_s2 + $0x1e4] sm:$0xf] }
   0xd   :  { %v803_v16 = vpack.c.b16 %v659_v8, %v659_v8  ;;  %v804_v18 = vpack.c.b16 %v660_v12, %v660_v12  ;;  %v5703_v20 = vld [vmem:[%s8513_s2 + $0x20c] sm:$0xf0]  ;;  %v4303_v22 = vld [vmem:[%s8513_s2 + $0x210] sm:$0xf0]  ;;  %v5757_v23 = vld [vmem:[%s8513_s2 + $0x3c4] sm:$0xf]  ;;  %v4542_v27 = vor.u32 %v5763_v15, %v4541_v14 }
   0xe   :  { %v4543_v24 = vld [vmem:[%s8513_s2 + $0x3f0] sm:$0xf0]  ;;  %v4302_v28 = vor.u32 %v5703_v20, %v4301_v19  ;;  %v4493_v29 = vld [vmem:[%s8513_s2 + $0x360] sm:$0xf]  ;;  %v5751_v30 = vld [vmem:[%s8513_s2 + $0x38c] sm:$0xf0]  ;;  %v4306_v31 = vor.u32 %v5697_v21, %v4303_v22 }
   0xf   :  { %v953_v25 = vsel %vm951_vm0, %v803_v16, 0  ;;  %v956_v26 = vsel %vm951_vm0, %v804_v18, 0  ;;  %989 = vmatpush.bf16.msra.mxu0 %v4350_v13  ;;  %v4546_v32 = vor.u32 %v5757_v23, %v4543_v24  ;;  %v4253_v33 = vld [vmem:[%s8513_s2 + $0x180] sm:$0xf]  ;;  %v5691_v34 = vld [vmem:[%s8513_s2 + $0x1ac] sm:$0xf0]  ;;  %v4494_v40 = vor.u32 %v5751_v30, %v4493_v29 }
  0x10   :  { %1006 = vmatpush.bf16.msra.mxu1 %v953_v25  ;;  %1017 = vmatpush.bf16.msra.mxu2 %v4354_v17  ;;  %v5685_v35 = vld [vmem:[%s8513_s2 + $0x184] sm:$0xf]  ;;  %v4255_v36 = vld [vmem:[%s8513_s2 + $0x1b0] sm:$0xf0]  ;;  %v4445_v39 = vld [vmem:[%s8513_s2 + $0x300] sm:$0xf]  ;;  %v4254_v41 = vor.u32 %v5691_v34, %v4253_v33 }
  0x11   :  { %1034 = vmatpush.bf16.msra.mxu3 %v956_v26  ;;  %v5745_v37 = vld [vmem:[%s8513_s2 + $0x364] sm:$0xf]  ;;  %v4495_v38 = vld [vmem:[%s8513_s2 + $0x390] sm:$0xf0]  ;;  %v5739_v42 = vld [vmem:[%s8513_s2 + $0x32c] sm:$0xf0]  ;;  %v4258_v45 = vor.u32 %v5685_v35, %v4255_v36 }
  0x12   :  { %v4205_v43 = vld [vmem:[%s8513_s2 + $0x120] sm:$0xf]  ;;  %v5679_v44 = vld [vmem:[%s8513_s2 + $0x14c] sm:$0xf0]  ;;  %v4498_v46 = vor.u32 %v5745_v37, %v4495_v38  ;;  %v5673_v47 = vld [vmem:[%s8513_s2 + $0x124] sm:$0xf]  ;;  %v4446_v54 = vor.u32 %v5739_v42, %v4445_v39 }
  0x13   :  { %990 = vmatpush.bf16.msra.mxu0 %v4302_v28  ;;  %v4207_v48 = vld [vmem:[%s8513_s2 + $0x150] sm:$0xf0]  ;;  %v6315_v49 = vld [vmem:[%s8513_s2 + $0x428] sm:$0x33]  ;;  %v5728_v51 = vld [vmem:[%s8513_s2 + $0x2d4] sm:$0xf0]  ;;  %v4206_v58 = vor.u32 %v5679_v44, %v4205_v43 }
  0x14   :  { %1007 = vmatpush.bf16.msra.mxu1 %v4542_v27  ;;  %1018 = vmatpush.bf16.msra.mxu2 %v4306_v31  ;;  %v4405_v50 = vld [vmem:[%s8513_s2 + $0x2a8] sm:$0xf]  ;;  %v5733_v52 = vld [vmem:[%s8513_s2 + $0x304] sm:$0xf]  ;;  %v661_v53 = vunpack.c.l.b16 %v6315_v49  ;;  %v4447_v55 = vld [vmem:[%s8513_s2 + $0x330] sm:$0xf0]  ;;  %v4210_v59 = vor.u32 %v5673_v47, %v4207_v48 }
  0x15   :  { %1035 = vmatpush.bf16.msra.mxu3 %v4546_v32  ;;  %v72_v56 = vld [vmem:[%s8530_s22 + $0x8] sm:$0xff]  ;;  %v74_v57 = vld [vmem:[%s8530_s22 + $0x18] sm:$0xff]  ;;  %v4406_v62 = vor.u32 %v5728_v51, %v4405_v50  ;;  %v4157_v63 = vld [vmem:[%s8513_s2 + $0xc0] sm:$0xf]  ;;  %v4450_v4 = vor.u32 %v5733_v52, %v4447_v55  ;;  %vm947_vm1 = vcmask 424960   ;;  %vm1398_vm2 = vcmask 1043456  }
  0x16   :  { %v805_v60 = vpack.c.b16 %v661_v53, %v661_v53  ;;  %v76_v61 = vld [vmem:[%s8512_s1 + $0x8] sm:$0xff]  ;;  %v5667_v0 = vld [vmem:[%s8513_s2 + $0xec] sm:$0xf0]  ;;  %v5661_v1 = vld [vmem:[%s8513_s2 + $0xc4] sm:$0xf]  ;;  %vm1362_vm5 = vcmask 64512  }
  0x17   :  { %991 = vmatpush.bf16.msra.mxu0 %v4254_v41  ;;  %v6348_v2 = vadd.f32 %v76_v61, %v72_v56  ;;  %v6350_v3 = vadd.f32 %v76_v61, %v74_v57  ;;  %v4159_v5 = vld [vmem:[%s8513_s2 + $0xf0] sm:$0xf0]  ;;  %v4357_v6 = vld [vmem:[%s8513_s2 + $0x248] sm:$0xf]  ;;  %v5716_v7 = vld [vmem:[%s8513_s2 + $0x274] sm:$0xf0]  ;;  %v4158_v10 = vor.u32 %v5667_v0, %v4157_v63 }
  0x18   :  { %1008 = vmatpush.bf16.msra.mxu1 %v4494_v40  ;;  %1019 = vmatpush.bf16.msra.mxu2 %v4258_v45  ;;  %v959_v9 = vsel %vm951_vm0, %v805_v60, 0  ;;  %v4549_v11 = vld [vmem:[%s8513_s2 + $0x3c8] sm:$0xf]  ;;  %v5764_v12 = vld [vmem:[%s8513_s2 + $0x3f4] sm:$0xf0]  ;;  %v4162_v13 = vor.u32 %v5661_v1, %v4159_v5  ;;  %v4358_v14 = vor.u32 %v5716_v7, %v4357_v6  ;;  %v71_v24 = vld [vmem:[%s8530_s22] sm:$0xff] }
  0x19   :  { %1036 = vmatpush.bf16.msra.mxu3 %v4498_v46  ;;  %v6363_v8 = vpack.c.bf16 %v6350_v3, %v6348_v2  ;;  %v4109_v15 = vld [vmem:[%s8513_s2 + $0x60] sm:$0xf]  ;;  %v5655_v16 = vld [vmem:[%s8513_s2 + $0x8c] sm:$0xf0]  ;;  %v5649_v17 = vld [vmem:[%s8513_s2 + $0x64] sm:$0xf]  ;;  %v4550_v21 = vor.u32 %v5764_v12, %v4549_v11 }
  0x1a   :  { %v4111_v18 = vld [vmem:[%s8513_s2 + $0x90] sm:$0xf0]  ;;  %v4309_v19 = vld [vmem:[%s8513_s2 + $0x1e8] sm:$0xf]  ;;  %v5704_v20 = vld [vmem:[%s8513_s2 + $0x214] sm:$0xf0]  ;;  %v4110_v25 = vor.u32 %v5655_v16, %v4109_v15  ;;  %v662_v16 = vunpack.c.h.b16 %v6315_v49 }
  0x1b   :  { %992 = vmatpush.bf16.msra.mxu0 %v4206_v58  ;;  %v4501_v22 = vld [vmem:[%s8513_s2 + $0x368] sm:$0xf]  ;;  %v5752_v23 = vld [vmem:[%s8513_s2 + $0x394] sm:$0xf0]  ;;  %v4061_v26 = vld [vmem:[%s8513_s2] sm:$0xf]  ;;  %v4114_v29 = vor.u32 %v5649_v17, %v4111_v18  ;;  %v4310_v30 = vor.u32 %v5704_v20, %v4309_v19 }
  0x1c   :  { %1009 = vmatpush.bf16.msra.mxu1 %v4446_v54  ;;  %1020 = vmatpush.bf16.msra.mxu2 %v4210_v59  ;;  %v73_v27 = vld [vmem:[%s8530_s22 + $0x10] sm:$0xff]  ;;  %v75_v28 = vld [vmem:[%s8512_s1] sm:$0xff]  ;;  %v4261_v34 = vld [vmem:[%s8513_s2 + $0x188] sm:$0xf]  ;;  %v4502_v37 = vor.u32 %v5752_v23, %v4501_v22  ;;  %vm3543_vm13 = vcmask 654336   ;;  %s4046_s0 = sshll.u32 %s8527_s16, 4  ;;  %s4047_s0 = int_to_ptr.hbm [resolvable:$true] %s4046_s0 }
  0x1d   :  { %1037 = vmatpush.bf16.msra.mxu3 %v4450_v4  ;;  %v5643_v31 = vld [vmem:[%s8513_s2 + $0x2c] sm:$0xf0]  ;;  %v5637_v32 = vld [vmem:[%s8513_s2 + $0x4] sm:$0xf]  ;;  %v4063_v33 = vld [vmem:[%s8513_s2 + $0x30] sm:$0xf0]  ;;  %v6433_v39 = vadd.f32 %v75_v28, %v71_v24  ;;  %v6435_v40 = vadd.f32 %v75_v28, %v73_v27 }
  0x1e   :  { %v5692_v35 = vld [vmem:[%s8513_s2 + $0x1b4] sm:$0xf0]  ;;  %v5722_v36 = vld [vmem:[%s8513_s2 + $0x2ac] sm:$0xf]  ;;  %v4407_v38 = vld [vmem:[%s8513_s2 + $0x2d8] sm:$0xf0]  ;;  %v4062_v43 = vor.u32 %v5643_v31, %v4061_v26  ;;  %v4066_v46 = vor.u32 %v5637_v32, %v4063_v33  ;;  %v806_v32 = vpack.c.b16 %v662_v16, %v662_v16 }
  0x1f   :  { %4587 = vmatmul.msk.bf16.vlgmr.msra.gmra.mxu1 %vm947_vm1, %v6363_v8  ;;  %993 = vmatpush.bf16.msra.mxu0 %v4158_v10  ;;  %v5723_v41 = vld [vmem:[%s8513_s2 + $0x2b4] sm:$0xf]  ;;  %v4415_v42 = vld [vmem:[%s8513_s2 + $0x2e0] sm:$0xf0]  ;;  %v4453_v44 = vld [vmem:[%s8513_s2 + $0x308] sm:$0xf]  ;;  %v4262_v47 = vor.u32 %v5692_v35, %v4261_v34  ;;  %v4410_v51 = vor.u32 %v5722_v36, %v4407_v38  ;;  %v6466_v56 = vpack.c.bf16 %v6435_v40, %v6433_v39 }
  0x20   :  { %1044 = vmatpush.bf16.msrb.mxu1 %v4406_v62  ;;  %1021 = vmatpush.bf16.msra.mxu2 %v4162_v13  ;;  %v5740_v45 = vld [vmem:[%s8513_s2 + $0x334] sm:$0xf0]  ;;  %v4413_v48 = vld [vmem:[%s8513_s2 + $0x2b0] sm:$0xf]  ;;  %v5729_v50 = vld [vmem:[%s8513_s2 + $0x2dc] sm:$0xf0]  ;;  %v4418_v54 = vor.u32 %v5723_v41, %v4415_v42 }
  0x21   :  { %1062 = vmatpush.bf16.msrb.mxu3 %v959_v9  ;;  %v4213_v52 = vld [vmem:[%s8513_s2 + $0x128] sm:$0xf]  ;;  %v5680_v53 = vld [vmem:[%s8513_s2 + $0x154] sm:$0xf0]  ;;  %v5710_v55 = vld [vmem:[%s8513_s2 + $0x24c] sm:$0xf]  ;;  %v4454_v57 = vor.u32 %v5740_v45, %v4453_v44  ;;  %v4414_v61 = vor.u32 %v5729_v50, %v4413_v48 }
  0x22   :  { %4588 = vmatmul.msk.bf16.vlgmr.msra.gmra.mxu3 %vm947_vm1, %v6363_v8  ;;  %v4359_v58 = vld [vmem:[%s8513_s2 + $0x278] sm:$0xf0]  ;;  %v5711_v59 = vld [vmem:[%s8513_s2 + $0x254] sm:$0xf]  ;;  %v4367_v60 = vld [vmem:[%s8513_s2 + $0x280] sm:$0xf0]  ;;  %v4214_v62 = vor.u32 %v5680_v53, %v4213_v52 }
  0x23   :  { %994 = vmatpush.bf16.msra.mxu0 %v4110_v25  ;;  %v4365_v63 = vld [vmem:[%s8513_s2 + $0x250] sm:$0xf]  ;;  %v5717_v0 = vld [vmem:[%s8513_s2 + $0x27c] sm:$0xf0]  ;;  %v4362_v1 = vor.u32 %v5710_v55, %v4359_v58  ;;  %v4165_v4 = vld [vmem:[%s8513_s2 + $0xc8] sm:$0xf]  ;;  %v4370_v6 = vor.u32 %v5711_v59, %v4367_v60 }
  0x24   :  { %1045 = vmatpush.bf16.msrb.mxu1 %v4358_v14  ;;  %1022 = vmatpush.bf16.msra.mxu2 %v4114_v29  ;;  %v5668_v5 = vld [vmem:[%s8513_s2 + $0xf4] sm:$0xf0]  ;;  %v5698_v7 = vld [vmem:[%s8513_s2 + $0x1ec] sm:$0xf]  ;;  %v4311_v9 = vld [vmem:[%s8513_s2 + $0x218] sm:$0xf0]  ;;  %v4366_v12 = vor.u32 %v5717_v0, %v4365_v63 }
  0x25   :  { %1063 = vmatpush.bf16.msrb.mxu3 %v4550_v21  ;;  %v5699_v10 = vld [vmem:[%s8513_s2 + $0x1f4] sm:$0xf]  ;;  %v4319_v11 = vld [vmem:[%s8513_s2 + $0x220] sm:$0xf0]  ;;  %v4166_v13 = vor.u32 %v5668_v5, %v4165_v4  ;;  %v4317_v14 = vld [vmem:[%s8513_s2 + $0x1f0] sm:$0xf]  ;;  %v4314_v17 = vor.u32 %v5698_v7, %v4311_v9 }
  0x26   :  { %v5705_v15 = vld [vmem:[%s8513_s2 + $0x21c] sm:$0xf0]  ;;  %v4117_v18 = vld [vmem:[%s8513_s2 + $0x68] sm:$0xf]  ;;  %v5656_v19 = vld [vmem:[%s8513_s2 + $0x94] sm:$0xf0]  ;;  %v4322_v20 = vor.u32 %v5699_v10, %v4319_v11 }
  0x27   :  { %995 = vmatpush.bf16.msra.mxu0 %v4062_v43  ;;  %v5686_v21 = vld [vmem:[%s8513_s2 + $0x18c] sm:$0xf]  ;;  %v4263_v49 = vld [vmem:[%s8513_s2 + $0x1b8] sm:$0xf0]  ;;  %v5687_v22 = vld [vmem:[%s8513_s2 + $0x194] sm:$0xf]  ;;  %v4318_v24 = vor.u32 %v5705_v15, %v4317_v14  ;;  %v4118_v25 = vor.u32 %v5656_v19, %v4117_v18 }
  0x28   :  { %1046 = vmatpush.bf16.msrb.mxu1 %v4310_v30  ;;  %1023 = vmatpush.bf16.msra.mxu2 %v4066_v46  ;;  %v4271_v23 = vld [vmem:[%s8513_s2 + $0x1c0] sm:$0xf0]  ;;  %v4269_v26 = vld [vmem:[%s8513_s2 + $0x190] sm:$0xf]  ;;  %v5693_v27 = vld [vmem:[%s8513_s2 + $0x1bc] sm:$0xf0]  ;;  %v4266_v28 = vor.u32 %v5686_v21, %v4263_v49 }
  0x29   :  { %1064 = vmatpush.bf16.msrb.mxu3 %v4502_v37  ;;  %v4069_v29 = vld [vmem:[%s8513_s2 + $0x8] sm:$0xf]  ;;  %v5644_v30 = vld [vmem:[%s8513_s2 + $0x34] sm:$0xf0]  ;;  %v4274_v31 = vor.u32 %v5687_v22, %v4271_v23  ;;  %v5674_v33 = vld [vmem:[%s8513_s2 + $0x12c] sm:$0xf]  ;;  %v4270_v35 = vor.u32 %v5693_v27, %v4269_v26 }
  0x2a   :  { %996 = vmatmul.bf16.vlgmr.msra.gmra.mxu0 %v6466_v56  ;;  %v4215_v34 = vld [vmem:[%s8513_s2 + $0x158] sm:$0xf0]  ;;  %v5675_v36 = vld [vmem:[%s8513_s2 + $0x134] sm:$0xf]  ;;  %v4223_v37 = vld [vmem:[%s8513_s2 + $0x160] sm:$0xf0]  ;;  %v4070_v38 = vor.u32 %v5644_v30, %v4069_v29 }
  0x2b   :  { %1072 = vmatpush.bf16.msrb.mxu0 %v4410_v51  ;;  %1024 = vmatmul.bf16.vlgmr.msra.gmra.mxu2 %v6466_v56  ;;  %v4221_v41 = vld [vmem:[%s8513_s2 + $0x130] sm:$0xf]  ;;  %v5681_v42 = vld [vmem:[%s8513_s2 + $0x15c] sm:$0xf0]  ;;  %v4218_v43 = vor.u32 %v5674_v33, %v4215_v34  ;;  %v962_v44 = vsel %vm951_vm0, %v806_v32, 0  ;;  %v4226_v46 = vor.u32 %v5675_v36, %v4223_v37  ;;  %s6127_s17 = smov 256  }
  0x2c   :  { %1047 = vmatpush.bf16.msrb.mxu1 %v4262_v47  ;;  %1128 = vmatpush.bf16.msrb.mxu2 %v4418_v54  ;;  %v5662_v45 = vld [vmem:[%s8513_s2 + $0xcc] sm:$0xf]  ;;  %v4167_v47 = vld [vmem:[%s8513_s2 + $0xf8] sm:$0xf0]  ;;  %v4222_v51 = vor.u32 %v5681_v42, %v4221_v41  ;;  %v5663_v52 = vld [vmem:[%s8513_s2 + $0xd4] sm:$0xf] }
  0x2d   :  { %1065 = vmatpush.bf16.msrb.mxu3 %v4454_v57  ;;  %v5758_v48 = vld [vmem:[%s8513_s2 + $0x3cc] sm:$0xf]  ;;  %v4551_v50 = vld [vmem:[%s8513_s2 + $0x3f8] sm:$0xf0]  ;;  %v4175_v53 = vld [vmem:[%s8513_s2 + $0x100] sm:$0xf0]  ;;  %v4170_v58 = vor.u32 %v5662_v45, %v4167_v47 }
  0x2e   :  { %v4173_v54 = vld [vmem:[%s8513_s2 + $0xd0] sm:$0xf]  ;;  %v5669_v55 = vld [vmem:[%s8513_s2 + $0xfc] sm:$0xf0]  ;;  %v4554_v59 = vor.u32 %v5758_v48, %v4551_v50  ;;  %v5650_v60 = vld [vmem:[%s8513_s2 + $0x6c] sm:$0xf] }
  0x2f   :  { %1073 = vmatpush.bf16.msrb.mxu0 %v4362_v1  ;;  %v225_v57 = vld [vmem:[%s8513_s2 + $0x430] sm:$0x33]  ;;  %v5746_v63 = vld [vmem:[%s8513_s2 + $0x36c] sm:$0xf]  ;;  %v4503_v0 = vld [vmem:[%s8513_s2 + $0x398] sm:$0xf0]  ;;  %v4174_v1 = vor.u32 %v5669_v55, %v4173_v54 }
  0x30   :  { %1048 = vmatpush.bf16.msrb.mxu1 %v4214_v62  ;;  %1129 = vmatpush.bf16.msrb.mxu2 %v4370_v6  ;;  %v4119_v62 = vld [vmem:[%s8513_s2 + $0x98] sm:$0xf0]  ;;  %v5651_v4 = vld [vmem:[%s8513_s2 + $0x74] sm:$0xf]  ;;  %v4127_v5 = vld [vmem:[%s8513_s2 + $0xa0] sm:$0xf0]  ;;  %v664_v6 = vunpack.c.h.b16 %v225_v57  ;;  %v663_v10 = vunpack.c.l.b16 %v225_v57 }
  0x31   :  { %1100 = vmatpush.bf16.msra.mxu3 %v4414_v61  ;;  %v4178_v61 = vor.u32 %v5663_v52, %v4175_v53  ;;  %v4125_v7 = vld [vmem:[%s8513_s2 + $0x70] sm:$0xf]  ;;  %v5657_v9 = vld [vmem:[%s8513_s2 + $0x9c] sm:$0xf0]  ;;  %v4122_v11 = vor.u32 %v5650_v60, %v4119_v62  ;;  %v4130_v14 = vor.u32 %v5651_v4, %v4127_v5  ;;  %v4071_v15 = vld [vmem:[%s8513_s2 + $0x38] sm:$0xf0] }
  0x32   :  { %4589 = vmatmul.msk.bf16.vlgmr.msrb.gmra.mxu3 %vm947_vm1, %v6363_v8  ;;  %v5734_v16 = vld [vmem:[%s8513_s2 + $0x30c] sm:$0xf]  ;;  %v4126_v18 = vor.u32 %v5657_v9, %v4125_v7  ;;  %v5639_v19 = vld [vmem:[%s8513_s2 + $0x14] sm:$0xf]  ;;  %v808_v21 = vpack.c.b16 %v664_v6, %v664_v6  ;;  %v226_v49 = vld [vmem:[%s8513_s2 + $0x438] sm:$0x33] }
  0x33   :  { %1074 = vmatpush.bf16.msrb.mxu0 %v4314_v17  ;;  %v4455_v17 = vld [vmem:[%s8513_s2 + $0x338] sm:$0xf0]  ;;  %v4077_v22 = vld [vmem:[%s8513_s2 + $0x10] sm:$0xf]  ;;  %v5645_v23 = vld [vmem:[%s8513_s2 + $0x3c] sm:$0xf0]  ;;  %v666_v26 = vunpack.c.h.b16 %v226_v49 }
  0x34   :  { %1049 = vmatpush.bf16.msrb.mxu1 %v4166_v13  ;;  %1130 = vmatpush.bf16.msrb.mxu2 %v4322_v20  ;;  %v5638_v13 = vld [vmem:[%s8513_s2 + $0xc] sm:$0xf]  ;;  %v4079_v20 = vld [vmem:[%s8513_s2 + $0x40] sm:$0xf0]  ;;  %v968_v32 = vsel %vm951_vm0, %v808_v21, 0  ;;  %s6128_s18 = smov 16  }
  0x35   :  { %1101 = vmatpush.bf16.msra.mxu3 %v4366_v12  ;;  %v4506_v12 = vor.u32 %v5746_v63, %v4503_v0  ;;  %v4074_v27 = vor.u32 %v5638_v13, %v4071_v15  ;;  %v4082_v29 = vor.u32 %v5639_v19, %v4079_v20  ;;  %v5759_v33 = vld [vmem:[%s8513_s2 + $0x3d4] sm:$0xf]  ;;  %v4559_v34 = vld [vmem:[%s8513_s2 + $0x400] sm:$0xf0]  ;;  %v4557_v36 = vld [vmem:[%s8513_s2 + $0x3d0] sm:$0xf] }
  0x36   :  { %v5765_v37 = vld [vmem:[%s8513_s2 + $0x3fc] sm:$0xf0]  ;;  %v4565_v42 = vld [vmem:[%s8513_s2 + $0x3d8] sm:$0xf]  ;;  %v5747_v45 = vld [vmem:[%s8513_s2 + $0x374] sm:$0xf] }
  0x37   :  { %1075 = vmatpush.bf16.msrb.mxu0 %v4266_v28  ;;  %v4458_v28 = vor.u32 %v5734_v16, %v4455_v17  ;;  %v4558_v47 = vor.u32 %v5765_v37, %v4557_v36  ;;  %v4567_v52 = vld [vmem:[%s8513_s2 + $0x408] sm:$0xf0]  ;;  %v4509_v53 = vld [vmem:[%s8513_s2 + $0x370] sm:$0xf]  ;;  %v5753_v54 = vld [vmem:[%s8513_s2 + $0x39c] sm:$0xf0] }
  0x38   :  { %1050 = vmatpush.bf16.msrb.mxu1 %v4118_v25  ;;  %1131 = vmatpush.bf16.msrb.mxu2 %v4274_v31  ;;  %v665_v25 = vunpack.c.l.b16 %v226_v49  ;;  %v4078_v31 = vor.u32 %v5645_v23, %v4077_v22  ;;  %v5735_v57 = vld [vmem:[%s8513_s2 + $0x314] sm:$0xf]  ;;  %v4510_v60 = vor.u32 %v5753_v54, %v4509_v53  ;;  %v4423_v62 = vld [vmem:[%s8513_s2 + $0x2e8] sm:$0xf0]  ;;  %v4461_v63 = vld [vmem:[%s8513_s2 + $0x310] sm:$0xf] }
  0x39   :  { %1102 = vmatpush.bf16.msra.mxu3 %v4318_v24  ;;  %v807_v24 = vpack.c.b16 %v663_v10, %v663_v10  ;;  %v5741_v0 = vld [vmem:[%s8513_s2 + $0x33c] sm:$0xf0]  ;;  %v4421_v4 = vld [vmem:[%s8513_s2 + $0x2b8] sm:$0xf]  ;;  %v5730_v5 = vld [vmem:[%s8513_s2 + $0x2e4] sm:$0xf0] }
  0x3a   :  { %v809_v30 = vpack.c.b16 %v665_v25, %v665_v25  ;;  %v4462_v7 = vor.u32 %v5741_v0, %v4461_v63  ;;  %v5712_v9 = vld [vmem:[%s8513_s2 + $0x25c] sm:$0xf]  ;;  %v4375_v10 = vld [vmem:[%s8513_s2 + $0x288] sm:$0xf0]  ;;  %v5718_v13 = vld [vmem:[%s8513_s2 + $0x284] sm:$0xf0] }
  0x3b   :  { %1076 = vmatpush.bf16.msrb.mxu0 %v4218_v43  ;;  %v5766_v43 = vld [vmem:[%s8513_s2 + $0x404] sm:$0xf0]  ;;  %v5700_v15 = vld [vmem:[%s8513_s2 + $0x1fc] sm:$0xf]  ;;  %v4327_v16 = vld [vmem:[%s8513_s2 + $0x228] sm:$0xf0] }
  0x3c   :  { %1051 = vmatpush.bf16.msrb.mxu1 %v4070_v38  ;;  %1132 = vmatpush.bf16.msrb.mxu2 %v4226_v46  ;;  %v810_v38 = vpack.c.b16 %v666_v26, %v666_v26  ;;  %v971_v41 = vsel %vm951_vm0, %v809_v30, 0  ;;  %v4511_v46 = vld [vmem:[%s8513_s2 + $0x3a0] sm:$0xf0]  ;;  %v4566_v50 = vor.u32 %v5766_v43, %v4565_v42  ;;  %v5706_v19 = vld [vmem:[%s8513_s2 + $0x224] sm:$0xf0]  ;;  %v4330_v20 = vor.u32 %v5700_v15, %v4327_v16 }
  0x3d   :  { %1103 = vmatpush.bf16.msra.mxu3 %v4270_v35  ;;  %v965_v35 = vsel %vm951_vm0, %v807_v24, 0  ;;  %v4514_v55 = vor.u32 %v5747_v45, %v4511_v46  ;;  %v5688_v21 = vld [vmem:[%s8513_s2 + $0x19c] sm:$0xf]  ;;  %v4279_v49 = vld [vmem:[%s8513_s2 + $0x1c8] sm:$0xf0] }
  0x3e   :  { %v974_v48 = vsel %vm951_vm0, %v810_v38, 0  ;;  %v4277_v23 = vld [vmem:[%s8513_s2 + $0x198] sm:$0xf]  ;;  %v5694_v24 = vld [vmem:[%s8513_s2 + $0x1c4] sm:$0xf0]  ;;  %v4282_v25 = vor.u32 %v5688_v21, %v4279_v49 }
  0x3f   :  { %1052 = vmatmul.bf16.vlgmr.msrb.gmra.mxu1 %v6466_v56  ;;  %1077 = vmatpush.bf16.msrb.mxu0 %v4170_v58  ;;  %v4463_v58 = vld [vmem:[%s8513_s2 + $0x340] sm:$0xf0]  ;;  %v5676_v26 = vld [vmem:[%s8513_s2 + $0x13c] sm:$0xf]  ;;  %v4229_v30 = vld [vmem:[%s8513_s2 + $0x138] sm:$0xf] }
  0x40   :  { %1090 = vmatpush.bf16.msra.mxu1 %v962_v44  ;;  %1133 = vmatpush.bf16.msrb.mxu2 %v4178_v61  ;;  %v4562_v44 = vor.u32 %v5759_v33, %v4559_v34  ;;  %v5724_v61 = vld [vmem:[%s8513_s2 + $0x2bc] sm:$0xf]  ;;  %v4517_v33 = vld [vmem:[%s8513_s2 + $0x378] sm:$0xf]  ;;  %v5754_v34 = vld [vmem:[%s8513_s2 + $0x3a4] sm:$0xf0] }
  0x41   :  { %1104 = vmatpush.bf16.msra.mxu3 %v4222_v51  ;;  %v5760_v51 = vld [vmem:[%s8513_s2 + $0x3dc] sm:$0xf]  ;;  %v4426_v6 = vor.u32 %v5724_v61, %v4423_v62  ;;  %v4518_v36 = vor.u32 %v5754_v34, %v4517_v33  ;;  %v4519_v37 = vld [vmem:[%s8513_s2 + $0x3a8] sm:$0xf0]  ;;  %v4181_v43 = vld [vmem:[%s8513_s2 + $0xd8] sm:$0xf] }
  0x42   :  { %v4183_v42 = vld [vmem:[%s8513_s2 + $0x108] sm:$0xf0]  ;;  %v5670_v45 = vld [vmem:[%s8513_s2 + $0x104] sm:$0xf0]  ;;  %v4469_v46 = vld [vmem:[%s8513_s2 + $0x318] sm:$0xf] }
  0x43   :  { %1078 = vmatpush.bf16.msrb.mxu0 %v4122_v11  ;;  %v4422_v11 = vor.u32 %v5730_v5, %v4421_v4  ;;  %v4429_v53 = vld [vmem:[%s8513_s2 + $0x2c0] sm:$0xf]  ;;  %v5652_v54 = vld [vmem:[%s8513_s2 + $0x7c] sm:$0xf]  ;;  %v5725_v61 = vld [vmem:[%s8513_s2 + $0x2c4] sm:$0xf] }
  0x44   :  { %1091 = vmatpush.bf16.msra.mxu1 %v4554_v59  ;;  %1134 = vmatpush.bf16.msrb.mxu2 %v4130_v14  ;;  %v4570_v59 = vor.u32 %v5760_v51, %v4567_v52  ;;  %v4378_v14 = vor.u32 %v5712_v9, %v4375_v10  ;;  %v5736_v51 = vld [vmem:[%s8513_s2 + $0x31c] sm:$0xf]  ;;  %v4471_v52 = vld [vmem:[%s8513_s2 + $0x348] sm:$0xf0]  ;;  %v4431_v62 = vld [vmem:[%s8513_s2 + $0x2f0] sm:$0xf0] }
  0x45   :  { %1105 = vmatpush.bf16.msra.mxu3 %v4174_v1  ;;  %v4466_v1 = vor.u32 %v5735_v57, %v4463_v58  ;;  %v4474_v57 = vor.u32 %v5736_v51, %v4471_v52  ;;  %v5731_v58 = vld [vmem:[%s8513_s2 + $0x2ec] sm:$0xf0]  ;;  %v4434_v63 = vor.u32 %v5725_v61, %v4431_v62  ;;  %v4133_v0 = vld [vmem:[%s8513_s2 + $0x78] sm:$0xf]  ;;  %v4381_v5 = vld [vmem:[%s8513_s2 + $0x260] sm:$0xf] }
  0x46   :  { %v4383_v10 = vld [vmem:[%s8513_s2 + $0x290] sm:$0xf0]  ;;  %v4085_v16 = vld [vmem:[%s8513_s2 + $0x18] sm:$0xf]  ;;  %v4333_v49 = vld [vmem:[%s8513_s2 + $0x200] sm:$0xf] }
  0x47   :  { %1079 = vmatpush.bf16.msrb.mxu0 %v4074_v27  ;;  %v4231_v27 = vld [vmem:[%s8513_s2 + $0x168] sm:$0xf0]  ;;  %v4285_v34 = vld [vmem:[%s8513_s2 + $0x1a0] sm:$0xf]  ;;  %v5755_v52 = vld [vmem:[%s8513_s2 + $0x3ac] sm:$0xf0] }
  0x48   :  { %1092 = vmatpush.bf16.msra.mxu1 %v4506_v12  ;;  %1135 = vmatpush.bf16.msrb.mxu2 %v4082_v29  ;;  %v4373_v12 = vld [vmem:[%s8513_s2 + $0x258] sm:$0xf]  ;;  %v4234_v29 = vor.u32 %v5676_v26, %v4231_v27  ;;  %v4335_v26 = vld [vmem:[%s8513_s2 + $0x230] sm:$0xf0]  ;;  %v5726_v62 = vld [vmem:[%s8513_s2 + $0x2cc] sm:$0xf] }
  0x49   :  { %1106 = vmatpush.bf16.msra.mxu3 %v4126_v18  ;;  %v4374_v17 = vor.u32 %v5718_v13, %v4373_v12  ;;  %v4325_v18 = vld [vmem:[%s8513_s2 + $0x1f8] sm:$0xf]  ;;  %v5640_v12 = vld [vmem:[%s8513_s2 + $0x1c] sm:$0xf]  ;;  %v4087_v13 = vld [vmem:[%s8513_s2 + $0x48] sm:$0xf0] }
  0x4a   :  { %1080 = vmatmul.bf16.vlgmr.msrb.gmra.mxu0 %v6466_v56  ;;  %v4326_v22 = vor.u32 %v5706_v19, %v4325_v18  ;;  %v4090_v18 = vor.u32 %v5640_v12, %v4087_v13  ;;  %v5646_v19 = vld [vmem:[%s8513_s2 + $0x44] sm:$0xf0]  ;;  %v5732_v12 = vld [vmem:[%s8513_s2 + $0x2f4] sm:$0xf0] }
  0x4b   :  { %1146 = vmatpush.bf16.msra.mxu0 %v968_v32  ;;  %1136 = vmatmul.bf16.vlgmr.msrb.gmra.mxu2 %v6466_v56  ;;  %v4086_v21 = vor.u32 %v5646_v19, %v4085_v16  ;;  %v4391_v16 = vld [vmem:[%s8513_s2 + $0x298] sm:$0xf0]  ;;  %v5659_v19 = vld [vmem:[%s8513_s2 + $0xac] sm:$0xf0] }
  0x4c   :  { %1093 = vmatpush.bf16.msra.mxu1 %v4458_v28  ;;  %1202 = vmatpush.bf16.msra.mxu2 %v974_v48  ;;  %v4278_v28 = vor.u32 %v5694_v24, %v4277_v23  ;;  %v4182_v48 = vor.u32 %v5670_v45, %v4181_v43  ;;  %v5701_v24 = vld [vmem:[%s8513_s2 + $0x204] sm:$0xf]  ;;  %v4527_v45 = vld [vmem:[%s8513_s2 + $0x3b0] sm:$0xf0] }
  0x4d   :  { %1107 = vmatpush.bf16.msra.mxu3 %v4078_v31  ;;  %v5682_v31 = vld [vmem:[%s8513_s2 + $0x164] sm:$0xf0] }
  0x4e   :  { %v4230_v32 = vor.u32 %v5682_v31, %v4229_v30  ;;  %v5761_v30 = vld [vmem:[%s8513_s2 + $0x3e4] sm:$0xf]  ;;  %v4575_v31 = vld [vmem:[%s8513_s2 + $0x410] sm:$0xf0] }
  0x4f   :  { %1147 = vmatpush.bf16.msra.mxu0 %v4562_v44  ;;  %4590 = vmatmul.msk.bf16.vlgmr.msra.gmra.mxu1 %vm947_vm1, %v6363_v8  ;;  %v4578_v33 = vor.u32 %v5761_v30, %v4575_v31  ;;  %v5647_v30 = vld [vmem:[%s8513_s2 + $0x4c] sm:$0xf0]  ;;  %v5641_v31 = vld [vmem:[%s8513_s2 + $0x24] sm:$0xf] }
  0x50   :  { %1118 = vmatpush.bf16.msrb.mxu1 %v965_v35  ;;  %1108 = vmatmul.bf16.vlgmr.msra.gmra.mxu3 %v6466_v56  ;;  %v5748_v35 = vld [vmem:[%s8513_s2 + $0x37c] sm:$0xf] }
  0x51   :  { %1174 = vmatpush.bf16.msrb.mxu3 %v971_v41  ;;  %1203 = vmatpush.bf16.msra.mxu2 %v4570_v59  ;;  %v4522_v38 = vor.u32 %v5748_v35, %v4519_v37  ;;  %v5664_v41 = vld [vmem:[%s8513_s2 + $0xdc] sm:$0xf]  ;;  %v5695_v35 = vld [vmem:[%s8513_s2 + $0x1cc] sm:$0xf0] }
  0x52   :  { %v4186_v44 = vor.u32 %v5664_v41, %v4183_v42  ;;  %v4286_v37 = vor.u32 %v5695_v35, %v4285_v34  ;;  %v5689_v41 = vld [vmem:[%s8513_s2 + $0x1a4] sm:$0xf]  ;;  %v4287_v42 = vld [vmem:[%s8513_s2 + $0x1d0] sm:$0xf0]  ;;  %v4341_v34 = vld [vmem:[%s8513_s2 + $0x208] sm:$0xf] }
  0x53   :  { %1148 = vmatpush.bf16.msra.mxu0 %v4514_v55  ;;  %v4135_v55 = vld [vmem:[%s8513_s2 + $0xa8] sm:$0xf0]  ;;  %v4290_v43 = vor.u32 %v5689_v41, %v4287_v42  ;;  %v5708_v35 = vld [vmem:[%s8513_s2 + $0x234] sm:$0xf0]  ;;  %v4295_v42 = vld [vmem:[%s8513_s2 + $0x1d8] sm:$0xf0] }
  0x54   :  { %1119 = vmatpush.bf16.msrb.mxu1 %v4558_v47  ;;  %v5742_v47 = vld [vmem:[%s8513_s2 + $0x344] sm:$0xf0]  ;;  %v4138_v59 = vor.u32 %v5652_v54, %v4135_v55  ;;  %v4239_v54 = vld [vmem:[%s8513_s2 + $0x170] sm:$0xf0]  ;;  %v5690_v41 = vld [vmem:[%s8513_s2 + $0x1ac] sm:$0xf] }
  0x55   :  { %1175 = vmatpush.bf16.msrb.mxu3 %v4566_v50  ;;  %1204 = vmatpush.bf16.msra.mxu2 %v4522_v38  ;;  %v4470_v50 = vor.u32 %v5742_v47, %v4469_v46  ;;  %v4525_v46 = vld [vmem:[%s8513_s2 + $0x380] sm:$0xf] }
  0x56   :  { %v4526_v55 = vor.u32 %v5755_v52, %v4525_v46  ;;  %v4298_v46 = vor.u32 %v5690_v41, %v4295_v42  ;;  %v7124_v42 = vld [vmem:[%s8514_s3] sm:$0xff] }
  0x57   :  { %1149 = vmatpush.bf16.msra.mxu0 %v4466_v1  ;;  %v5658_v1 = vld [vmem:[%s8513_s2 + $0xa4] sm:$0xf0] }
  0x58   :  { %1120 = vmatpush.bf16.msrb.mxu1 %v4510_v60  ;;  %v4430_v60 = vor.u32 %v5731_v58, %v4429_v53  ;;  %v4134_v4 = vor.u32 %v5658_v1, %v4133_v0  ;;  %v5677_v53 = vld [vmem:[%s8513_s2 + $0x144] sm:$0xf]  ;;  %v4189_v0 = vld [vmem:[%s8513_s2 + $0xe0] sm:$0xf] }
  0x59   :  { %1176 = vmatpush.bf16.msrb.mxu3 %v4518_v36  ;;  %1205 = vmatpush.bf16.msra.mxu2 %v4474_v57  ;;  %v5767_v36 = vld [vmem:[%s8513_s2 + $0x40c] sm:$0xf0]  ;;  %v4242_v57 = vor.u32 %v5677_v53, %v4239_v54  ;;  %v5737_v58 = vld [vmem:[%s8513_s2 + $0x324] sm:$0xf]  ;;  %v5678_v54 = vld [vmem:[%s8513_s2 + $0x14c] sm:$0xf] }
  0x5a   :  { %4592 = vmatmul.msk.bf16.vlgmr.msra.gmra.mxu0 %vm947_vm1, %v6363_v8 }
  0x5b   :  { %1184 = vmatpush.bf16.msrb.mxu0 %v4426_v6  ;;  %v5719_v6 = vld [vmem:[%s8513_s2 + $0x28c] sm:$0xf0] }
  0x5c   :  { %1121 = vmatpush.bf16.msrb.mxu1 %v4462_v7  ;;  %v5713_v7 = vld [vmem:[%s8513_s2 + $0x264] sm:$0xf]  ;;  %v4382_v9 = vor.u32 %v5719_v6, %v4381_v5  ;;  %4594 = vmatmul.msk.bf16.vlgmr.msra.gmra.mxu2 %vm947_vm1, %v6363_v8  ;;  %v5743_v5 = vld [vmem:[%s8513_s2 + $0x34c] sm:$0xf0] }
  0x5d   :  { %1177 = vmatpush.bf16.msrb.mxu3 %v4470_v50  ;;  %1240 = vmatpush.bf16.msrb.mxu2 %v4434_v63  ;;  %v5683_v50 = vld [vmem:[%s8513_s2 + $0x16c] sm:$0xf0]  ;;  %v4439_v63 = vld [vmem:[%s8513_s2 + $0x2f8] sm:$0xf0]  ;;  %v5665_v6 = vld [vmem:[%s8513_s2 + $0xe4] sm:$0xf] }
  0x5e   :  { %v4442_v1 = vor.u32 %v5726_v62, %v4439_v63  ;;  %v5684_v62 = vld [vmem:[%s8513_s2 + $0x174] sm:$0xf0]  ;;  %v5762_v63 = vld [vmem:[%s8513_s2 + $0x3ec] sm:$0xf] }
  0x5f   :  { %1185 = vmatpush.bf16.msrb.mxu0 %v4378_v14  ;;  %4591 = vmatmul.msk.bf16.vlgmr.msrb.gmra.mxu1 %vm947_vm1, %v6363_v8  ;;  %v4386_v14 = vor.u32 %v5713_v7, %v4383_v10  ;;  %v4191_v10 = vld [vmem:[%s8513_s2 + $0x110] sm:$0xf0] }
  0x60   :  { %1156 = vmatpush.bf16.msra.mxu1 %v4422_v11  ;;  %v227_v11 = vld [vmem:[%s8513_s2 + $0x440] sm:$0x33]  ;;  %4593 = vmatmul.msk.bf16.vlgmr.msrb.gmra.mxu3 %vm947_vm1, %v6363_v8  ;;  %v4194_v13 = vor.u32 %v5665_v6, %v4191_v10  ;;  %v4199_v6 = vld [vmem:[%s8513_s2 + $0x118] sm:$0xf0]  ;;  %v5756_v10 = vld [vmem:[%s8513_s2 + $0x3b4] sm:$0xf0] }
  0x61   :  { %1212 = vmatpush.bf16.msra.mxu3 %v4430_v60  ;;  %v668_v15 = vunpack.c.h.b16 %v227_v11  ;;  %1241 = vmatpush.bf16.msrb.mxu2 %v4386_v14  ;;  %v4477_v60 = vld [vmem:[%s8513_s2 + $0x320] sm:$0xf] }
  0x63   :  { %1186 = vmatpush.bf16.msrb.mxu0 %v4330_v20  ;;  %v812_v20 = vpack.c.b16 %v668_v15, %v668_v15  ;;  %v5714_v15 = vld [vmem:[%s8513_s2 + $0x26c] sm:$0xf] }
  0x64   :  { %1157 = vmatpush.bf16.msra.mxu1 %v4374_v17  ;;  %v667_v17 = vunpack.c.l.b16 %v227_v11  ;;  %v4437_v11 = vld [vmem:[%s8513_s2 + $0x2c8] sm:$0xf] }
  0x65   :  { %1213 = vmatpush.bf16.msra.mxu3 %v4382_v9  ;;  %v980_v27 = vsel %vm951_vm0, %v812_v20, 0  ;;  %v4478_v9 = vor.u32 %v5743_v5, %v4477_v60  ;;  %v4438_v14 = vor.u32 %v5732_v12, %v4437_v11  ;;  %v5653_v20 = vld [vmem:[%s8513_s2 + $0x84] sm:$0xf]  ;;  %v4245_v60 = vld [vmem:[%s8513_s2 + $0x148] sm:$0xf] }
  0x66   :  { %v811_v23 = vpack.c.b16 %v667_v17, %v667_v17  ;;  %v4141_v17 = vld [vmem:[%s8513_s2 + $0x80] sm:$0xf]  ;;  %v5666_v5 = vld [vmem:[%s8513_s2 + $0xec] sm:$0xf]  ;;  %v4197_v11 = vld [vmem:[%s8513_s2 + $0xe8] sm:$0xf] }
  0x67   :  { %1187 = vmatpush.bf16.msrb.mxu0 %v4282_v25 }
  0x68   :  { %1158 = vmatpush.bf16.msra.mxu1 %v4326_v22  ;;  %v5707_v22 = vld [vmem:[%s8513_s2 + $0x22c] sm:$0xf0] }
  0x69   :  { %v4334_v25 = vor.u32 %v5707_v22, %v4333_v49  ;;  %v4142_v49 = vor.u32 %v5659_v19, %v4141_v17 }
  0x6b   :  { %1188 = vmatpush.bf16.msrb.mxu0 %v4234_v29  ;;  %v4338_v29 = vor.u32 %v5701_v24, %v4335_v26  ;;  %1214 = vmatpush.bf16.msra.mxu3 %v4334_v25  ;;  %v5720_v24 = vld [vmem:[%s8513_s2 + $0x294] sm:$0xf0]  ;;  %v5702_v26 = vld [vmem:[%s8513_s2 + $0x20c] sm:$0xf] }
  0x6c   :  { %1159 = vmatpush.bf16.msra.mxu1 %v4278_v28  ;;  %v977_v28 = vsel %vm951_vm0, %v811_v23, 0  ;;  %v4389_v23 = vld [vmem:[%s8513_s2 + $0x268] sm:$0xf] }
  0x6d   :  { %1242 = vmatpush.bf16.msrb.mxu2 %v4338_v29  ;;  %v4390_v25 = vor.u32 %v5720_v24, %v4389_v23  ;;  %v5744_v23 = vld [vmem:[%s8513_s2 + $0x354] sm:$0xf0]  ;;  %v4149_v24 = vld [vmem:[%s8513_s2 + $0x88] sm:$0xf] }
  0x6f   :  { %1189 = vmatpush.bf16.msrb.mxu0 %v4186_v44  ;;  %v5749_v44 = vld [vmem:[%s8513_s2 + $0x384] sm:$0xf]  ;;  %1215 = vmatpush.bf16.msra.mxu3 %v4286_v37  ;;  %v4342_v37 = vor.u32 %v5708_v35, %v4341_v34  ;;  %v5648_v35 = vld [vmem:[%s8513_s2 + $0x54] sm:$0xf0] }
  0x70   :  { %1160 = vmatpush.bf16.msra.mxu1 %v4230_v32  ;;  %v4573_v32 = vld [vmem:[%s8513_s2 + $0x3e0] sm:$0xf]  ;;  %v4530_v47 = vor.u32 %v5749_v44, %v4527_v45  ;;  %v4293_v44 = vld [vmem:[%s8513_s2 + $0x1a8] sm:$0xf] }
  0x71   :  { %v4574_v38 = vor.u32 %v5767_v36, %v4573_v32  ;;  %1243 = vmatpush.bf16.msrb.mxu2 %v4290_v43 }
  0x73   :  { %1190 = vmatpush.bf16.msrb.mxu0 %v4138_v59  ;;  %v4479_v59 = vld [vmem:[%s8513_s2 + $0x350] sm:$0xf0] }
  0x74   :  { %1161 = vmatpush.bf16.msra.mxu1 %v4182_v48  ;;  %v4237_v48 = vld [vmem:[%s8513_s2 + $0x140] sm:$0xf]  ;;  %v4482_v61 = vor.u32 %v5737_v58, %v4479_v59  ;;  %v4581_v58 = vld [vmem:[%s8513_s2 + $0x3e8] sm:$0xf]  ;;  %v5768_v59 = vld [vmem:[%s8513_s2 + $0x414] sm:$0xf0] }
  0x75   :  { %v4238_v51 = vor.u32 %v5683_v50, %v4237_v48  ;;  %1244 = vmatpush.bf16.msrb.mxu2 %v4242_v57 }
  0x77   :  { %1191 = vmatpush.bf16.msrb.mxu0 %v4090_v18  ;;  %1216 = vmatpush.bf16.msra.mxu3 %v4238_v51  ;;  %v4394_v18 = vor.u32 %v5714_v15, %v4391_v16  ;;  %v5750_v15 = vld [vmem:[%s8513_s2 + $0x38c] sm:$0xf]  ;;  %v4535_v16 = vld [vmem:[%s8513_s2 + $0x3b8] sm:$0xf0] }
  0x78   :  { %1162 = vmatpush.bf16.msra.mxu1 %v4134_v4  ;;  %v5671_v4 = vld [vmem:[%s8513_s2 + $0x10c] sm:$0xf0] }
  0x79   :  { %v4190_v7 = vor.u32 %v5671_v4, %v4189_v0  ;;  %1245 = vmatpush.bf16.msrb.mxu2 %v4194_v13  ;;  %v4583_v0 = vld [vmem:[%s8513_s2 + $0x418] sm:$0xf0] }
  0x7a   :  { %1192 = vmatmul.bf16.vlgmr.msrb.gmra.mxu0 %v6466_v56  ;;  %v4586_v4 = vor.u32 %v5762_v63, %v4583_v0 }
  0x7b   :  { %1258 = vmatpush.bf16.msra.mxu0 %v980_v27  ;;  %1217 = vmatpush.bf16.msra.mxu3 %v4190_v7  ;;  %v4343_v27 = vld [vmem:[%s8513_s2 + $0x238] sm:$0xf0]  ;;  %v4533_v7 = vld [vmem:[%s8513_s2 + $0x388] sm:$0xf] }
  0x7c   :  { %1163 = vmatpush.bf16.msra.mxu1 %v4086_v21  ;;  %v4143_v21 = vld [vmem:[%s8513_s2 + $0xb0] sm:$0xf0]  ;;  %v4346_v29 = vor.u32 %v5702_v26, %v4343_v27  ;;  %v4534_v13 = vor.u32 %v5756_v10, %v4533_v7  ;;  %v233_v7 = vperm.slane %v7124_v42, 0 }
  0x7d   :  { %v4146_v22 = vor.u32 %v5653_v20, %v4143_v21  ;;  %v5654_v20 = vld [vmem:[%s8513_s2 + $0x8c] sm:$0xf]  ;;  %v4151_v21 = vld [vmem:[%s8513_s2 + $0xb8] sm:$0xf0] }
  0x7f   :  { %1164 = vmatmul.bf16.vlgmr.msra.gmra.mxu1 %v6466_v56  ;;  %1259 = vmatpush.bf16.msra.mxu0 %v4578_v33  ;;  %v4095_v33 = vld [vmem:[%s8513_s2 + $0x50] sm:$0xf0] }
  0x80   :  { %1230 = vmatpush.bf16.msrb.mxu1 %v977_v28  ;;  %1218 = vmatpush.bf16.msra.mxu3 %v4142_v49  ;;  %v4093_v28 = vld [vmem:[%s8513_s2 + $0x20] sm:$0xf]  ;;  %v4098_v36 = vor.u32 %v5641_v31, %v4095_v33  ;;  %v4485_v49 = vld [vmem:[%s8513_s2 + $0x328] sm:$0xf]  ;;  %v5642_v31 = vld [vmem:[%s8513_s2 + $0x2c] sm:$0xf] }
  0x81   :  { %1246 = vmatpush.bf16.msrb.mxu2 %v4146_v22  ;;  %v4094_v32 = vor.u32 %v5647_v30, %v4093_v28  ;;  %v4154_v22 = vor.u32 %v5654_v20, %v4151_v21  ;;  %v4486_v26 = vor.u32 %v5744_v23, %v4485_v49  ;;  %v5738_v28 = vld [vmem:[%s8513_s2 + $0x32c] sm:$0xf]  ;;  %v4101_v33 = vld [vmem:[%s8513_s2 + $0x28] sm:$0xf]  ;;  %v4677_v20 = vld [vmem:[%s8515_s4 + $0xf0] sm:$0xf] }
  0x82   :  { %v5800_v21 = vld [vmem:[%s8515_s4 + $0xf4] sm:$0xf0]  ;;  %v4669_v23 = vld [vmem:[%s8515_s4 + $0xe0] sm:$0xf] }
  0x83   :  { %1260 = vmatpush.bf16.msra.mxu0 %v4530_v47  ;;  %v5696_v47 = vld [vmem:[%s8513_s2 + $0x1d4] sm:$0xf0] }
  0x84   :  { %1231 = vmatpush.bf16.msrb.mxu1 %v4574_v38  ;;  %v228_v38 = vld [vmem:[%s8513_s2 + $0x448] sm:$0x33]  ;;  %1219 = vmatpush.bf16.msra.mxu3 %v4094_v32  ;;  %v4294_v50 = vor.u32 %v5696_v47, %v4293_v44  ;;  %v4103_v32 = vld [vmem:[%s8513_s2 + $0x58] sm:$0xf0] }
  0x85   :  { %v669_v43 = vunpack.c.l.b16 %v228_v38  ;;  %v670_v45 = vunpack.c.h.b16 %v228_v38  ;;  %1247 = vmatpush.bf16.msrb.mxu2 %v4098_v36  ;;  %v4106_v34 = vor.u32 %v5642_v31, %v4103_v32  ;;  %v4102_v36 = vor.u32 %v5648_v35, %v4101_v33  ;;  %v4661_v33 = vld [vmem:[%s8515_s4 + $0xd0] sm:$0xf] }
  0x87   :  { %1261 = vmatpush.bf16.msra.mxu0 %v4482_v61  ;;  %v813_v48 = vpack.c.b16 %v669_v43, %v669_v43  ;;  %v814_v51 = vpack.c.b16 %v670_v45, %v670_v45  ;;  %1220 = vmatmul.bf16.vlgmr.msra.gmra.mxu3 %v6466_v56  ;;  %v4582_v61 = vor.u32 %v5768_v59, %v4581_v58  ;;  %v235_v43 = vperm.slane %v7124_v42, 2 }
  0x88   :  { %1232 = vmatpush.bf16.msrb.mxu1 %v4526_v55  ;;  %1248 = vmatmul.bf16.vlgmr.msrb.gmra.mxu2 %v6466_v56  ;;  %v4247_v55 = vld [vmem:[%s8513_s2 + $0x178] sm:$0xf0] }
  0x89   :  { %v983_v52 = vsel %vm951_vm0, %v813_v48, 0  ;;  %v986_v53 = vsel %vm951_vm0, %v814_v51, 0  ;;  %v4250_v57 = vor.u32 %v5678_v54, %v4247_v55  ;;  %v236_v51 = vperm.slane %v7124_v42, 3 }
  0x8a   :  { %4596 = vmatmul.msk.bf16.vlgmr.msra.gmra.mxu0 %vm947_vm1, %v6363_v8  ;;  %1286 = vmatpush.bf16.msrb.mxu3 %v983_v52 }
  0x8b   :  { %1296 = vmatpush.bf16.msrb.mxu0 %v4442_v1  ;;  %1314 = vmatpush.bf16.msra.mxu2 %v986_v53  ;;  %v4246_v1 = vor.u32 %v5684_v62, %v4245_v60  ;;  %v238_v60 = vperm.slane %v7124_v42, 5  ;;  %v237_v62 = vperm.slane %v7124_v42, 4 }
  0x8c   :  { %1233 = vmatpush.bf16.msrb.mxu1 %v4478_v9  ;;  %v4202_v9 = vor.u32 %v5666_v5, %v4199_v6 }
  0x8e   :  { %1287 = vmatpush.bf16.msrb.mxu3 %v4582_v61 }
  0x8f   :  { %1297 = vmatpush.bf16.msrb.mxu0 %v4394_v18  ;;  %4595 = vmatmul.msk.bf16.vlgmr.msrb.gmra.mxu1 %vm947_vm1, %v6363_v8  ;;  %v4538_v18 = vor.u32 %v5750_v15, %v4535_v16 }
  0x90   :  { %1268 = vmatpush.bf16.msra.mxu1 %v4438_v14  ;;  %1315 = vmatpush.bf16.msra.mxu2 %v4586_v4  ;;  %v5672_v14 = vld [vmem:[%s8513_s2 + $0x114] sm:$0xf0]  ;;  %v234_v4 = vperm.slane %v7124_v42, 1 }
  0x91   :  { %v4198_v17 = vor.u32 %v5672_v14, %v4197_v11 }
  0x92   :  { %1288 = vmatpush.bf16.msrb.mxu3 %v4534_v13 }
  0x93   :  { %1298 = vmatpush.bf16.msrb.mxu0 %v4346_v29  ;;  %v4487_v29 = vld [vmem:[%s8513_s2 + $0x358] sm:$0xf0] }
  0x94   :  { %1269 = vmatpush.bf16.msra.mxu1 %v4390_v25  ;;  %1316 = vmatpush.bf16.msra.mxu2 %v4538_v18  ;;  %v5660_v25 = vld [vmem:[%s8513_s2 + $0xb4] sm:$0xf0]  ;;  %v4490_v30 = vor.u32 %v5738_v28, %v4487_v29 }
  0x95   :  { %v4150_v27 = vor.u32 %v5660_v25, %v4149_v24  ;;  %v5798_v25 = vld [vmem:[%s8515_s4 + $0xe4] sm:$0xf0] }
  0x96   :  { %1289 = vmatpush.bf16.msrb.mxu3 %v4486_v26 }
  0x97   :  { %1299 = vmatpush.bf16.msrb.mxu0 %v4298_v46 }
  0x98   :  { %1270 = vmatpush.bf16.msra.mxu1 %v4342_v37  ;;  %1317 = vmatpush.bf16.msra.mxu2 %v4490_v30  ;;  %v4670_v30 = vor.u32 %v5798_v25, %v4669_v23 }
  0x99   :  { %4597 = vmatmul.msk.bf16.vlgmr.msrb.gmra.mxu3 %vm947_vm1, %v6363_v8 }
  0x9b   :  { %1300 = vmatpush.bf16.msrb.mxu0 %v4250_v57  ;;  %4598 = vmatmul.msk.bf16.vlgmr.msra.gmra.mxu2 %vm947_vm1, %v6363_v8 }
  0x9c   :  { %1271 = vmatpush.bf16.msra.mxu1 %v4294_v50  ;;  %v7073_v19 = vpop.f32.mrf.mxu1 }
  0x9f   :  { %1301 = vmatpush.bf16.msrb.mxu0 %v4202_v9 }
  0xa0   :  { %1272 = vmatpush.bf16.msra.mxu1 %v4246_v1 }
  0xa3   :  { %1302 = vmatpush.bf16.msrb.mxu0 %v4154_v22  ;;  %v4678_v22 = vor.u32 %v5800_v21, %v4677_v20  ;;  %v5791_v20 = vld [vmem:[%s8515_s4 + $0xb4] sm:$0xf]  ;;  %v4647_v21 = vld [vmem:[%s8515_s4 + $0xb8] sm:$0xf0] }
  0xa4   :  { %1273 = vmatpush.bf16.msra.mxu1 %v4198_v17  ;;  %v7117_v38 = vpop.f32.mrf.mxu1 }
  0xa5   :  { %v7062_v12 = vpop.f32.mrf.mxu3 }
  0xa7   :  { %1303 = vmatpush.bf16.msrb.mxu0 %v4106_v34  ;;  %v997_v41 = vpop.f32.mrf.mxu0 }
  0xa8   :  { %1274 = vmatpush.bf16.msra.mxu1 %v4150_v27  ;;  %v998_v14 = vadd.f32 %v997_v41, %v233_v7 }
  0xaa   :  { %1304 = vmatmul.bf16.vlgmr.msrb.gmra.mxu0 %v6466_v56  ;;  %v1012_v24 = vadd.f32 %v7073_v19, %v998_v14  ;;  %v5796_v19 = vld [vmem:[%s8515_s4 + $0xd4] sm:$0xf0] }
  0xab   :  { %v5788_v14 = vld [vmem:[%s8515_s4 + $0x94] sm:$0xf0] }
  0xac   :  { %1275 = vmatpush.bf16.msra.mxu1 %v4102_v36 }
  0xad   :  { %v7111_v37 = vpop.f32.mrf.mxu3 }
  0xae   :  { %v1025_v48 = vpop.f32.mrf.mxu2 }
  0xaf   :  { %1276 = vmatmul.bf16.vlgmr.msra.gmra.mxu1 %v6466_v56  ;;  %v999_v47 = vpop.f32.mrf.mxu0  ;;  %v1026_v10 = vadd.f32 %v1025_v48, %v234_v4 }
  0xb0   :  { %v1000_v41 = vadd.f32 %v999_v47, %v233_v7  ;;  %v5799_v47 = vld [vmem:[%s8515_s4 + $0xf4] sm:$0xf] }
  0xb1   :  { %v1040_v16 = vadd.f32 %v7062_v12, %v1026_v10  ;;  %v5793_v10 = vld [vmem:[%s8515_s4 + $0xc4] sm:$0xf] }
  0xb3   :  { %v1324_v28 = vpack.c.bf16 %v1040_v16, %v1012_v24  ;;  %v5789_v24 = vld [vmem:[%s8515_s4 + $0xa4] sm:$0xf] }
  0xb5   :  { %v1067_v45 = vpop.f32.mrf.mxu3  ;;  %v1452_v36 = vrot.slane %v1324_v28, 4 }
  0xb6   :  { %v1027_v55 = vpop.f32.mrf.mxu2 }
  0xb7   :  { %v1028_v34 = vadd.f32 %v1027_v55, %v234_v4  ;;  %v5790_v4 = vld [vmem:[%s8515_s4 + $0xa4] sm:$0xf0] }
  0xb9   :  { %v1042_v48 = vadd.f32 %v7111_v37, %v1028_v34  ;;  %v5797_v37 = vld [vmem:[%s8515_s4 + $0xe4] sm:$0xf] }
  0xbc   :  { %v1053_v44 = vpop.f32.mrf.mxu1 }
  0xbd   :  { %v1054_v8 = vadd.f32 %v1053_v44, %v235_v43  ;;  %v7134_v57 = vpop.f32.mrf.mxu3  ;;  %v4662_v44 = vor.u32 %v5796_v19, %v4661_v33 }
  0xbf   :  { %v1068_v46 = vadd.f32 %v1067_v45, %v1054_v8  ;;  %v4653_v8 = vld [vmem:[%s8515_s4 + $0xc0] sm:$0xf] }
  0xc4   :  { %v7129_v50 = vpop.f32.mrf.mxu1 }
  0xc7   :  { %v1081_v56 = vpop.f32.mrf.mxu0 }
  0xc8   :  { %v1082_v52 = vadd.f32 %v1081_v56, %v236_v51  ;;  %v4679_v56 = vld [vmem:[%s8515_s4 + $0xf8] sm:$0xf0] }
  0xcc   :  { %v1095_v53 = vpop.f32.mrf.mxu1 }
  0xcd   :  { %v1096_v54 = vadd.f32 %v1095_v53, %v1082_v52  ;;  %v1014_v52 = vadd.f32 %v7117_v38, %v1000_v41  ;;  %v5792_v38 = vld [vmem:[%s8515_s4 + $0xb4] sm:$0xf0] }
  0xce   :  { %v1137_v0 = vpop.f32.mrf.mxu2 }
  0xcf   :  { %v7136_v58 = vpack.c.bf16 %v1096_v54, %v1068_v46  ;;  %v7138_v59 = vpop.f32.mrf.mxu0  ;;  %v1138_v1 = vadd.f32 %v1137_v0, %v238_v60  ;;  %v5794_v46 = vld [vmem:[%s8515_s4 + $0xc4] sm:$0xf0]  ;;  %v4682_v54 = vor.u32 %v5799_v47, %v4679_v56  ;;  %v1330_v55 = vpack.c.bf16 %v1042_v48, %v1014_v52 }
  0xd0   :  { %v4654_v53 = vor.u32 %v5794_v46, %v4653_v8 }
  0xd1   :  { %v1471_v23 = vrot.slane %v1330_v55, 4 }
  0xd3   :  { %v1109_v63 = vpop.f32.mrf.mxu3 }
  0xd4   :  { %v7141_v61 = vpop.f32.mrf.mxu1  ;;  %v1110_v5 = vadd.f32 %v1109_v63, %v237_v62 }
  0xd6   :  { %v1139_v18 = vpop.f32.mrf.mxu2 }
  0xd7   :  { %v1151_v6 = vpop.f32.mrf.mxu0  ;;  %v1140_v27 = vadd.f32 %v1139_v18, %v238_v60  ;;  %v4671_v60 = vld [vmem:[%s8515_s4 + $0xe8] sm:$0xf0]  ;;  %v5786_v18 = vld [vmem:[%s8515_s4 + $0x84] sm:$0xf0] }
  0xd8   :  { %v1152_v9 = vadd.f32 %v1151_v6, %v1138_v1  ;;  %v4674_v0 = vor.u32 %v5797_v37, %v4671_v60  ;;  %v4637_v1 = vld [vmem:[%s8515_s4 + $0xa0] sm:$0xf]  ;;  %v4663_v6 = vld [vmem:[%s8515_s4 + $0xd8] sm:$0xf0] }
  0xd9   :  { %v4638_v7 = vor.u32 %v5790_v4, %v4637_v1 }
  0xdb   :  { %v1111_v17 = vpop.f32.mrf.mxu3 }
  0xdc   :  { %v1123_v11 = vpop.f32.mrf.mxu1  ;;  %v1112_v26 = vadd.f32 %v1111_v17, %v237_v62  ;;  %v4645_v62 = vld [vmem:[%s8515_s4 + $0xb0] sm:$0xf]  ;;  %v4621_v17 = vld [vmem:[%s8515_s4 + $0x80] sm:$0xf] }
  0xdd   :  { %v1124_v13 = vadd.f32 %v1123_v11, %v1110_v5  ;;  %v4646_v63 = vor.u32 %v5792_v38, %v4645_v62  ;;  %v5795_v5 = vld [vmem:[%s8515_s4 + $0xd4] sm:$0xf]  ;;  %v4655_v11 = vld [vmem:[%s8515_s4 + $0xc8] sm:$0xf0]  ;;  %v230_v38 = vld [vmem:[%s8514_s3 + $0x8] sm:$0xf] }
  0xde   :  { %v4658_v16 = vor.u32 %v5793_v10, %v4655_v11  ;;  %v242_v1 = vperm.slane %v230_v38, 1 }
  0xdf   :  { %v1326_v15 = vpack.c.bf16 %v1152_v9, %v1124_v13  ;;  %v1153_v12 = vpop.f32.mrf.mxu0  ;;  %v4666_v9 = vor.u32 %v5795_v5, %v4663_v6  ;;  %v4629_v13 = vld [vmem:[%s8515_s4 + $0x90] sm:$0xf] }
  0xe0   :  { %v1154_v31 = vadd.f32 %v1153_v12, %v1140_v27  ;;  %v4639_v12 = vld [vmem:[%s8515_s4 + $0xa8] sm:$0xf0]  ;;  %v4631_v27 = vld [vmem:[%s8515_s4 + $0x98] sm:$0xf0] }
  0xe1   :  { %v1455_v49 = vrot.slane %v1326_v15, 4  ;;  %1343 = vmatpush.bf16.xpose.msra.mxu3 %v1326_v15  ;;  %v4630_v15 = vor.u32 %v5788_v14, %v4629_v13  ;;  %v4642_v25 = vor.u32 %v5789_v24, %v4639_v12  ;;  %v243_v12 = vperm.slane %v230_v38, 2 }
  0xe3   :  { %1464 = vmatpush.bf16.xpose.msra.mxu0 %v1455_v49  ;;  %v4622_v49 = vor.u32 %v5786_v18, %v4621_v17  ;;  %v1179_v19 = vpop.f32.mrf.mxu3 }
  0xe4   :  { %v1125_v29 = vpop.f32.mrf.mxu1 }
  0xe5   :  { %v1126_v32 = vadd.f32 %v1125_v29, %v1112_v26  ;;  %v5787_v26 = vld [vmem:[%s8515_s4 + $0x94] sm:$0xf]  ;;  %v239_v29 = vperm.slane %v7124_v42, 6 }
  0xe7   :  { %v1332_v35 = vpack.c.bf16 %v1154_v31, %v1126_v32  ;;  %v5785_v31 = vld [vmem:[%s8515_s4 + $0x84] sm:$0xf]  ;;  %v4623_v32 = vld [vmem:[%s8515_s4 + $0x88] sm:$0xf0] }
  0xe8   :  { %1344 = vmatmul.bf16.vlgmr.msra.gmra.mxu3 %v1324_v28  ;;  %v240_v28 = vperm.slane %v7124_v42, 7 }
  0xe9   :  { %v1474_v45 = vrot.slane %v1332_v35, 4  ;;  %1356 = vmatpush.bf16.xpose.msrb.mxu1 %v1332_v35 }
  0xea   :  { %1465 = vmatmul.bf16.vlgmr.msra.gmra.mxu0 %v1452_v36  ;;  %v1207_v36 = vpop.f32.mrf.mxu2 }
  0xeb   :  { %1661 = vmatpush.bf16.msrb.mxu0 %v4678_v22  ;;  %v4650_v22 = vor.u32 %v5791_v20, %v4647_v21  ;;  %v1181_v47 = vpop.f32.mrf.mxu3 }
  0xef   :  { %1662 = vmatpush.bf16.msrb.mxu0 %v4670_v30  ;;  %v4634_v30 = vor.u32 %v5787_v26, %v4631_v27 }
  0xf0   :  { %1357 = vmatmul.bf16.vlgmr.msrb.gmra.mxu1 %v1330_v55 }
  0xf1   :  { %1483 = vmatpush.bf16.xpose.msra.mxu1 %v1474_v45 }
  0xf3   :  { %1663 = vmatpush.bf16.msrb.mxu0 %v4662_v44  ;;  %v4626_v44 = vor.u32 %v5785_v31, %v4623_v32 }
  0xf7   :  { %1664 = vmatpush.bf16.msrb.mxu0 %v4654_v53  ;;  %v1193_v33 = vpop.f32.mrf.mxu0  ;;  %v1209_v53 = vpop.f32.mrf.mxu2 }
  0xf8   :  { %v1194_v34 = vadd.f32 %v1193_v33, %v240_v28 }
  0xf9   :  { %1675 = vmatpush.bf16.msrb.mxu1 %v4682_v54 }
  0xfa   :  { %v1208_v45 = vadd.f32 %v1207_v36, %v1194_v34 }
  0xfb   :  { %1665 = vmatpush.bf16.msrb.mxu0 %v4646_v63 }
  0xfc   :  { %v1165_v35 = vpop.f32.mrf.mxu1 }
  0xfd   :  { %1676 = vmatpush.bf16.msrb.mxu1 %v4674_v0  ;;  %v1166_v41 = vadd.f32 %v1165_v35, %v239_v29  ;;  %v241_v0 = vperm.slane %v230_v38, 0 }
  0xff   :  { %1666 = vmatpush.bf16.msrb.mxu0 %v4638_v7  ;;  %v1180_v8 = vadd.f32 %v1179_v19, %v1166_v41  ;;  %v1195_v48 = vpop.f32.mrf.mxu0 }
 0x100   :  { %1484 = vmatmul.bf16.vlgmr.msra.gmra.mxu1 %v1471_v23  ;;  %v1196_v56 = vadd.f32 %v1195_v48, %v240_v28  ;;  %v244_v23 = vperm.slane %v230_v38, 3 }
 0x101   :  { %1677 = vmatpush.bf16.msrb.mxu1 %v4666_v9  ;;  %v7248_v46 = vpack.c.bf16 %v1208_v45, %v1180_v8 }
 0x102   :  { %v1210_v55 = vadd.f32 %v1209_v53, %v1196_v56 }
 0x103   :  { %1667 = vmatpush.bf16.msrb.mxu0 %v4630_v15 }
 0x104   :  { %v1167_v52 = vpop.f32.mrf.mxu1 }
 0x105   :  { %1678 = vmatpush.bf16.msrb.mxu1 %v4658_v16  ;;  %v1168_v54 = vadd.f32 %v1167_v52, %v239_v29 }
 0x107   :  { %1668 = vmatpush.bf16.msrb.mxu0 %v4622_v49  ;;  %v1182_v37 = vadd.f32 %v1181_v47, %v1168_v54  ;;  %v1263_v62 = vpop.f32.mrf.mxu0 }
 0x109   :  { %1679 = vmatpush.bf16.msrb.mxu1 %v4650_v22  ;;  %v7251_v60 = vpack.c.bf16 %v1210_v55, %v1182_v37 }
 0x10a   :  { %v1221_v4 = vpop.f32.mrf.mxu3 }
 0x10b   :  { %1804 = vmatpush.bf16.xpose.msra.mxu0 %v7248_v46  ;;  %v1222_v5 = vadd.f32 %v1221_v4, %v241_v0  ;;  %v1249_v6 = vpop.f32.mrf.mxu2 }
 0x10c   :  { %v1235_v63 = vpop.f32.mrf.mxu1  ;;  %v1250_v7 = vadd.f32 %v1249_v6, %v242_v1 }
 0x10d   :  { %1680 = vmatpush.bf16.msrb.mxu1 %v4642_v25  ;;  %v1236_v9 = vadd.f32 %v1235_v63, %v1222_v5  ;;  %v6124_v5 = vmov 0.0  }
 0x10e   :  { %v1264_v10 = vadd.f32 %v1263_v62, %v1250_v7 }
 0x10f   :  { %v1265_v11 = vpop.f32.mrf.mxu0 }
 0x110   :  { %v1328_v13 = vpack.c.bf16 %v1264_v10, %v1236_v9 }
 0x111   :  { %1681 = vmatpush.bf16.msrb.mxu1 %v4634_v30 }
 0x112   :  { %v1223_v15 = vpop.f32.mrf.mxu3  ;;  %v1400_v16 = vsel %vm1398_vm2, %v1328_v13, 0  ;;  %v1522_v17 = vrot.slane %v1328_v13, 4 }
 0x113   :  { %v1224_v18 = vadd.f32 %v1223_v15, %v241_v0  ;;  %v1251_v20 = vpop.f32.mrf.mxu2  ;;  %1409 = vmatpush.bf16.msrb.mxu2 %v1400_v16  ;;  %v83_v0 = vlaneseq }
 0x114   :  { %v1237_v14 = vpop.f32.mrf.mxu1  ;;  %v1252_v21 = vadd.f32 %v1251_v20, %v242_v1  ;;  %v1527_v49 = vsel %vm1398_vm2, %v1522_v17, 0 }
 0x115   :  { %1682 = vmatpush.bf16.msrb.mxu1 %v4626_v44  ;;  %v1238_v22 = vadd.f32 %v1237_v14, %v1224_v18  ;;  %v84_v1 = vshrl.u32 %v83_v0, 7  ;;  %v86_v4 = vand.u32 127, %v83_v0 }
 0x116   :  { %v1266_v24 = vadd.f32 %v1265_v11, %v1252_v21 }
 0x117   :  { %1536 = vmatpush.bf16.msra.mxu2 %v1527_v49  ;;  %vm88_vm3 = vcmp.eq.s32.totalorder %v86_v4, %v84_v1  ;;  %vm87_vm4 = vcmp.lt.s32.totalorder %v86_v4, %v84_v1 }
 0x118   :  { %v1334_v26 = vpack.c.bf16 %v1266_v24, %v1238_v22  ;;  %v89_v6 = vsel %vm88_vm3, 1.0, %v6124_v5 }
 0x119   :  { %1817 = vmatpush.bf16.xpose.msra.mxu1 %v7251_v60  ;;  %v7273_v7 = vsel %vm87_vm4, -inf, %v89_v6 }
 0x11a   :  { %v1419_v29 = vsel %vm1398_vm2, %v1334_v26, 0  ;;  %v1543_v30 = vrot.slane %v1334_v26, 4 }
 0x11b   :  { %1428 = vmatpush.bf16.msrb.mxu3 %v1419_v29 }
 0x11c   :  { %v1291_v32 = vpop.f32.mrf.mxu3  ;;  %v1548_v19 = vsel %vm1398_vm2, %v1543_v30, 0 }
 0x11e   :  { %v1319_v33 = vpop.f32.mrf.mxu2 }
 0x11f   :  { %1557 = vmatpush.bf16.msra.mxu3 %v1548_v19 }
 0x124   :  { %v1293_v48 = vpop.f32.mrf.mxu3 }
 0x126   :  { %v1321_v47 = vpop.f32.mrf.mxu2 }
 0x127   :  { %v1305_v25 = vpop.f32.mrf.mxu0 }
 0x128   :  { %v1306_v27 = vadd.f32 %v1305_v25, %v244_v23 }
 0x12a   :  { %v1320_v35 = vadd.f32 %v1319_v33, %v1306_v27 }
 0x12c   :  { %v1277_v28 = vpop.f32.mrf.mxu1 }
 0x12d   :  { %v1278_v31 = vadd.f32 %v1277_v28, %v243_v12 }
 0x12f   :  { %v1292_v34 = vadd.f32 %v1291_v32, %v1278_v31  ;;  %v1307_v41 = vpop.f32.mrf.mxu0 }
 0x130   :  { %v1308_v44 = vadd.f32 %v1307_v41, %v244_v23 }
 0x131   :  { %v1329_v36 = vpack.c.bf16 %v1320_v35, %v1292_v34 }
 0x132   :  { %v1322_v53 = vadd.f32 %v1321_v47, %v1308_v44 }
 0x133   :  { %v2094_v56 = vrot.slane %v1329_v36, 4  ;;  %v7262_v55 = vsel %vm1398_vm2, %v1329_v36, 0 }
 0x134   :  { %v1279_v45 = vpop.f32.mrf.mxu1 }
 0x135   :  { %v1280_v8 = vadd.f32 %v1279_v45, %v243_v12  ;;  %v7268_v62 = vsel %vm1398_vm2, %v2094_v56, 0 }
 0x137   :  { %v1294_v52 = vadd.f32 %v1293_v48, %v1280_v8 }
 0x139   :  { %v1335_v54 = vpack.c.bf16 %v1322_v53, %v1294_v52 }
 0x13b   :  { %v7265_v37 = vsel %vm1398_vm2, %v1335_v54, 0  ;;  %v2115_v38 = vrot.slane %v1335_v54, 4 }
 0x13d   :  { %v7271_v63 = vsel %vm1398_vm2, %v2115_v38, 0 }
 0x167   :  { %v1466_v9 = vpop.f32.mrf.mxu0 }
 0x168   :  { %v1467_v10 = vadd.f32 %v1466_v9, %v7273_v7 }
 0x16a   :  { %v1489_v11 = vsel %vm1362_vm5, %v1467_v10, -inf }
 0x16b   :  { %1490 = vmax.xlane.f32.xlu1 %v1489_v11  ;;  %v1345_v13 = vpop.f32.mrf.mxu3 }
 0x16c   :  { %v1346_v14 = vadd.f32 %v1345_v13, %v7273_v7 }
 0x16d   :  { %v1358_v15 = vpop.f32.mrf.mxu1 }
 0x16e   :  { %v1363_v16 = vsel %vm1362_vm5, %v1346_v14, -inf  ;;  %v1359_v18 = vadd.f32 %v1358_v15, %v7273_v7 }
 0x16f   :  { %v1468_v17 = vpop.f32.mrf.mxu0  ;;  %1364 = vmax.xlane.f32.xlu0 %v1363_v16 }
 0x170   :  { %v1366_v49 = vsel %vm1362_vm5, %v1359_v18, -inf }
 0x173   :  { %v1347_v20 = vpop.f32.mrf.mxu3 }
 0x174   :  { %v5784_v20 = vld [vmem:[%s8515_s4 + $0x74] sm:$0xf0] }
 0x175   :  { %v1360_v21 = vpop.f32.mrf.mxu1 }
 0x177   :  { %1367 = vmax.xlane.f32.xlu0 %v1366_v49 }
 0x17d   :  { %v1485_v22 = vpop.f32.mrf.mxu1 }
 0x17e   :  { %v1486_v23 = vadd.f32 %v1485_v22, %v7273_v7 }
 0x180   :  { %v1492_v24 = vsel %vm1362_vm5, %v1486_v23, -inf }
 0x181   :  { %1493 = vmax.xlane.f32.xlu1 %v1492_v24 }
 0x185   :  { %v1487_v12 = vpop.f32.mrf.mxu1 }
 0x1de   :  { %v1491_v25 = vpop.xlane.xlu1 %1490 }
 0x1df   :  { %v1495_v26 = vsub.f32 %v1467_v10, %v1491_v25  ;;  %v4733_v25 = vld [vmem:[%s8515_s4 + $0x60] sm:$0xf] }
 0x1e1   :  { %v1497_v27 = vpack.c.bf16 %v1495_v26, %v1495_v26  ;;  %v5782_v26 = vld [vmem:[%s8515_s4 + $0x64] sm:$0xf0] }
 0x1e2   :  { %v1365_v28 = vpop.xlane.xlu0 %1364 }
 0x1e3   :  { %v1499_v29 = vunpack.c.l.bf16 %v1497_v27  ;;  %v1369_v30 = vsub.f32 %v1346_v14, %v1365_v28  ;;  %v4734_v27 = vor.u32 %v5782_v26, %v4733_v25  ;;  %v4725_v28 = vld [vmem:[%s8515_s4 + $0x50] sm:$0xf]  ;;  %v5773_v25 = vld [vmem:[%s8515_s4 + $0x24] sm:$0xf]  ;;  %v4703_v26 = vld [vmem:[%s8515_s4 + $0x28] sm:$0xf0] }
 0x1e5   :  { %v1501_v31 = vmul.f32 1.442695, %v1499_v29  ;;  %v1371_v32 = vpack.c.bf16 %v1369_v30, %v1369_v30  ;;  %v5780_v29 = vld [vmem:[%s8515_s4 + $0x54] sm:$0xf0]  ;;  %v5783_v30 = vld [vmem:[%s8515_s4 + $0x74] sm:$0xf] }
 0x1e7   :  { %6019 = vpow2.f32 %v1501_v31  ;;  %v1373_v33 = vunpack.c.l.bf16 %v1371_v32  ;;  %v4743_v31 = vld [vmem:[%s8515_s4 + $0x78] sm:$0xf0] }
 0x1e9   :  { %v1375_v19 = vmul.f32 1.442695, %v1373_v33 }
 0x1ea   :  { %v1368_v34 = vpop.xlane.xlu0 %1367 }
 0x1eb   :  { %6021 = vpow2.f32 %v1375_v19  ;;  %v1370_v35 = vsub.f32 %v1359_v18, %v1368_v34  ;;  %v4741_v18 = vld [vmem:[%s8515_s4 + $0x70] sm:$0xf]  ;;  %v4726_v19 = vor.u32 %v5780_v29, %v4725_v28  ;;  %v4746_v34 = vor.u32 %v5783_v30, %v4743_v31  ;;  %v5771_v29 = vld [vmem:[%s8515_s4 + $0x14] sm:$0xf]  ;;  %v4695_v30 = vld [vmem:[%s8515_s4 + $0x18] sm:$0xf0] }
 0x1ec   :  { %v4706_v28 = vor.u32 %v5773_v25, %v4703_v26  ;;  %v4698_v31 = vor.u32 %v5771_v29, %v4695_v30  ;;  %v4823_v30 = vld [vmem:[%s8515_s4 + $0x170] sm:$0xf] }
 0x1ed   :  { %v6020_v36 = vpop.eup %6019  ;;  %v1372_v41 = vpack.c.bf16 %v1370_v35, %v1370_v35  ;;  %v4717_v35 = vld [vmem:[%s8515_s4 + $0x40] sm:$0xf] }
 0x1ee   :  { %v1505_v44 = vpack.c.bf16 %v6020_v36, %v6020_v36 }
 0x1ef   :  { %v1374_v45 = vunpack.c.l.bf16 %v1372_v41 }
 0x1f0   :  { %v7283_v8 = vunpack.c.l.bf16 %v1505_v44  ;;  %v5778_v44 = vld [vmem:[%s8515_s4 + $0x44] sm:$0xf0] }
 0x1f1   :  { %v6022_v48 = vpop.eup %6021  ;;  %v1377_v47 = vmul.f32 1.442695, %v1374_v45  ;;  %v5781_v45 = vld [vmem:[%s8515_s4 + $0x64] sm:$0xf] }
 0x1f2   :  { %v1509_v56 = vsel %vm1362_vm5, %v7283_v8, 0.0  ;;  %v1379_v52 = vpack.c.bf16 %v6022_v48, %v6022_v48  ;;  %v4735_v48 = vld [vmem:[%s8515_s4 + $0x68] sm:$0xf0] }
 0x1f3   :  { %6023 = vpow2.f32 %v1377_v47  ;;  %1510 = vadd.xlane.f32.xlu0 %v1509_v56  ;;  %v4718_v56 = vor.u32 %v5778_v44, %v4717_v35  ;;  %v2027_v44 = vrot.slane %v7248_v46, 4  ;;  %v1056_v46 = vadd.f32 %v7129_v50, %v235_v43 }
 0x1f4   :  { %v1494_v53 = vpop.xlane.xlu1 %1493  ;;  %v1381_v54 = vunpack.c.l.bf16 %v1379_v52  ;;  %v4738_v52 = vor.u32 %v5781_v45, %v4735_v48 }
 0x1f5   :  { %v1496_v38 = vsub.f32 %v1486_v23, %v1494_v53  ;;  %v4742_v23 = vor.u32 %v5784_v20, %v4741_v18  ;;  %v4709_v53 = vld [vmem:[%s8515_s4 + $0x30] sm:$0xf]  ;;  %v5772_v20 = vld [vmem:[%s8515_s4 + $0x14] sm:$0xf0] }
 0x1f6   :  { %v1383_v0 = vsel %vm1362_vm5, %v1381_v54, 0.0 }
 0x1f7   :  { %v1498_v1 = vpack.c.bf16 %v1496_v38, %v1496_v38  ;;  %1384 = vadd.xlane.f32.xlu2 %v1383_v0  ;;  %v5776_v38 = vld [vmem:[%s8515_s4 + $0x34] sm:$0xf0]  ;;  %v5779_v0 = vld [vmem:[%s8515_s4 + $0x54] sm:$0xf] }
 0x1f9   :  { %v6024_v4 = vpop.eup %6023  ;;  %v1500_v5 = vunpack.c.l.bf16 %v1498_v1  ;;  %v4727_v1 = vld [vmem:[%s8515_s4 + $0x58] sm:$0xf0] }
 0x1fa   :  { %v1380_v6 = vpack.c.bf16 %v6024_v4, %v6024_v4  ;;  %v4710_v4 = vor.u32 %v5776_v38, %v4709_v53  ;;  %v1084_v53 = vadd.f32 %v7138_v59, %v236_v51 }
 0x1fb   :  { %v1503_v9 = vmul.f32 1.442695, %v1500_v5  ;;  %v4730_v5 = vor.u32 %v5779_v0, %v4727_v1 }
 0x1fc   :  { %v1382_v10 = vunpack.c.l.bf16 %v1380_v6 }
 0x1fd   :  { %6025 = vpow2.f32 %v1503_v9  ;;  %v5774_v9 = vld [vmem:[%s8515_s4 + $0x24] sm:$0xf0] }
 0x1fe   :  { %v1386_v11 = vsel %vm1362_vm5, %v1382_v10, 0.0 }
 0x1ff   :  { %1387 = vadd.xlane.f32.xlu2 %v1386_v11  ;;  %v4719_v11 = vld [vmem:[%s8515_s4 + $0x48] sm:$0xf0] }
 0x203   :  { %v6026_v13 = vpop.eup %6025 }
 0x204   :  { %v1506_v14 = vpack.c.bf16 %v6026_v13, %v6026_v13 }
 0x206   :  { %v7289_v15 = vunpack.c.l.bf16 %v1506_v14 }
 0x208   :  { %v1512_v16 = vsel %vm1362_vm5, %v7289_v15, 0.0 }
 0x209   :  { %1513 = vadd.xlane.f32.xlu1 %v1512_v16 }
 0x266   :  { %v1511_v24 = vpop.xlane.xlu0 %1510 }
 0x26a   :  { %v1385_v17 = vpop.xlane.xlu2 %1384 }
 0x26b   :  { %6027 = vrcp.f32 %v1385_v17  ;;  %v4693_v17 = vld [vmem:[%s8515_s4 + $0x10] sm:$0xf] }
 0x271   :  { %v6028_v21 = vpop.eup %6027 }
 0x272   :  { %v1391_v49 = vmul.f32 %v6028_v21, %v1381_v54  ;;  %v1388_v22 = vpop.xlane.xlu2 %1387  ;;  %v5775_v21 = vld [vmem:[%s8515_s4 + $0x34] sm:$0xf] }
 0x273   :  { %6029 = vrcp.f32 %v1388_v22  ;;  %v4694_v22 = vor.u32 %v5772_v20, %v4693_v17 }
 0x274   :  { %v1393_v12 = vpack.c.bf16 %v1391_v49, %v1391_v49  ;;  %6031 = vrcp.f32 %v1511_v24  ;;  %v4711_v49 = vld [vmem:[%s8515_s4 + $0x38] sm:$0xf0] }
 0x276   :  { %4599 = vmatmul.msk.bf16.vlgmr.msrb.gmra.mxu2 %vm1362_vm5, %v1393_v12  ;;  %v5770_v12 = vld [vmem:[%s8515_s4 + $0x4] sm:$0xf0] }
 0x277   :  { %1769 = vmatpush.bf16.msrb.mxu2 %v4742_v23  ;;  %v4714_v23 = vor.u32 %v5775_v21, %v4711_v49 }
 0x279   :  { %v6030_v32 = vpop.eup %6029 }
 0x27a   :  { %v1392_v33 = vmul.f32 %v6030_v32, %v1382_v10  ;;  %v6032_v47 = vpop.eup %6031  ;;  %v5777_v10 = vld [vmem:[%s8515_s4 + $0x44] sm:$0xf] }
 0x27b   :  { %1770 = vmatpush.bf16.msrb.mxu2 %v4734_v27  ;;  %v1517_v54 = vmul.f32 %v6032_v47, %v7283_v8  ;;  %v4701_v8 = vld [vmem:[%s8515_s4 + $0x20] sm:$0xf]  ;;  %v4722_v16 = vor.u32 %v5777_v10, %v4719_v11  ;;  %v5769_v32 = vld [vmem:[%s8515_s4 + $0x4] sm:$0xf] }
 0x27c   :  { %v1394_v36 = vpack.c.bf16 %v1392_v33, %v1392_v33  ;;  %v1514_v41 = vpop.xlane.xlu1 %1513  ;;  %v4702_v14 = vor.u32 %v5774_v9, %v4701_v8  ;;  %v4687_v33 = vld [vmem:[%s8515_s4 + $0x8] sm:$0xf0] }
 0x27d   :  { %6033 = vrcp.f32 %v1514_v41  ;;  %v1519_v6 = vpack.c.bf16 %v1517_v54, %v1517_v54  ;;  %v1070_v54 = vadd.f32 %v7134_v57, %v1056_v46 }
 0x27e   :  { %4600 = vmatmul.msk.bf16.vlgmr.msrb.gmra.mxu3 %vm1362_vm5, %v1394_v36 }
 0x27f   :  { %1771 = vmatpush.bf16.msrb.mxu2 %v4726_v19  ;;  %1783 = vmatpush.bf16.msrb.mxu3 %v4746_v34  ;;  %v4690_v19 = vor.u32 %v5769_v32, %v4687_v33  ;;  %v5815_v32 = vld [vmem:[%s8515_s4 + $0x174] sm:$0xf] }
 0x283   :  { %1772 = vmatpush.bf16.msrb.mxu2 %v4718_v56  ;;  %1784 = vmatpush.bf16.msrb.mxu3 %v4738_v52  ;;  %v6034_v13 = vpop.eup %6033 }
 0x284   :  { %v1518_v18 = vmul.f32 %v6034_v13, %v7289_v15  ;;  %v4685_v15 = vld [vmem:[%s8515_s4] sm:$0xf] }
 0x285   :  { %v4686_v27 = vor.u32 %v5770_v12, %v4685_v15 }
 0x286   :  { %4601 = vmatmul.msk.bf16.vlgmr.msra.gmra.mxu2 %vm1362_vm5, %v1519_v6  ;;  %v1520_v24 = vpack.c.bf16 %v1518_v18, %v1518_v18 }
 0x287   :  { %1773 = vmatpush.bf16.msrb.mxu2 %v4710_v4  ;;  %1785 = vmatpush.bf16.msrb.mxu3 %v4730_v5 }
 0x28b   :  { %1774 = vmatpush.bf16.msrb.mxu2 %v4702_v14  ;;  %1786 = vmatpush.bf16.msrb.mxu3 %v4722_v16 }
 0x28e   :  { %4602 = vmatmul.msk.bf16.vlgmr.msra.gmra.mxu3 %vm1362_vm5, %v1520_v24 }
 0x28f   :  { %1775 = vmatpush.bf16.msrb.mxu2 %v4694_v22  ;;  %1787 = vmatpush.bf16.msrb.mxu3 %v4714_v23 }
 0x293   :  { %1776 = vmatpush.bf16.msrb.mxu2 %v4686_v27  ;;  %1788 = vmatpush.bf16.msrb.mxu3 %v4706_v28 }
 0x297   :  { %1868 = vmatpush.bf16.msra.mxu2 %v7262_v55  ;;  %1789 = vmatpush.bf16.msrb.mxu3 %v4698_v31  ;;  %v2046_v55 = vrot.slane %v7251_v60, 4  ;;  %v1098_v60 = vadd.f32 %v7141_v61, %v1084_v53  ;;  %v5816_v31 = vld [vmem:[%s8515_s4 + $0x174] sm:$0xf0]  ;;  %v4809_v53 = vld [vmem:[%s8515_s4 + $0x158] sm:$0xf0] }
 0x298   :  { %v4824_v33 = vor.u32 %v5816_v31, %v4823_v30  ;;  %v5802_v30 = vld [vmem:[%s8515_s4 + $0x104] sm:$0xf0]  ;;  %v5801_v31 = vld [vmem:[%s8515_s4 + $0x104] sm:$0xf] }
 0x299   :  { %v7407_v38 = vpack.c.bf16 %v1098_v60, %v1070_v54  ;;  %v4799_v54 = vld [vmem:[%s8515_s4 + $0x140] sm:$0xf] }
 0x29b   :  { %1790 = vmatpush.bf16.msrb.mxu3 %v4690_v19  ;;  %v4825_v19 = vld [vmem:[%s8515_s4 + $0x178] sm:$0xf0] }
 0x29f   :  { %1887 = vmatpush.bf16.msra.mxu3 %v7265_v37 }
 0x2f9   :  { %v1411_v34 = vpop.f32.mrf.mxu2 }
 0x301   :  { %v1413_v35 = vpop.f32.mrf.mxu2  ;;  %v1430_v36 = vpop.f32.mrf.mxu3 }
 0x302   :  { %v1434_v41 = vpack.c.bf16 %v1430_v36, %v1411_v34  ;;  %v4815_v34 = vld [vmem:[%s8515_s4 + $0x160] sm:$0xf]  ;;  %v5814_v35 = vld [vmem:[%s8515_s4 + $0x164] sm:$0xf0]  ;;  %v4828_v36 = vor.u32 %v5815_v32, %v4825_v19 }
 0x304   :  { %1777 = vmatmul.bf16.vlgmr.msrb.gmra.mxu2 %v1434_v41  ;;  %1791 = vmatmul.bf16.vlgmr.msrb.gmra.mxu3 %v1434_v41  ;;  %v5813_v41 = vld [vmem:[%s8515_s4 + $0x164] sm:$0xf] }
 0x305   :  { %2036 = vmatpush.bf16.xpose.msrb.mxu2 %v2027_v44  ;;  %2055 = vmatpush.bf16.xpose.msrb.mxu3 %v2046_v55  ;;  %v4817_v44 = vld [vmem:[%s8515_s4 + $0x168] sm:$0xf0] }
 0x309   :  { %v1432_v45 = vpop.f32.mrf.mxu3  ;;  %v1538_v48 = vpop.f32.mrf.mxu2 }
 0x30a   :  { %v4816_v45 = vor.u32 %v5814_v35, %v4815_v34 }
 0x311   :  { %v1540_v47 = vpop.f32.mrf.mxu2  ;;  %v1559_v56 = vpop.f32.mrf.mxu3 }
 0x312   :  { %v1563_v52 = vpack.c.bf16 %v1559_v56, %v1538_v48  ;;  %v4820_v47 = vor.u32 %v5813_v41, %v4817_v44  ;;  %v4807_v56 = vld [vmem:[%s8515_s4 + $0x150] sm:$0xf] }
 0x314   :  { %1669 = vmatmul.bf16.vlgmr.msrb.gmra.mxu0 %v1563_v52  ;;  %1683 = vmatmul.bf16.vlgmr.msrb.gmra.mxu1 %v1563_v52  ;;  %v5812_v52 = vld [vmem:[%s8515_s4 + $0x154] sm:$0xf0] }
 0x315   :  { %1991 = vmatpush.bf16.msrb.mxu0 %v4824_v33  ;;  %2005 = vmatpush.bf16.msrb.mxu1 %v4828_v36  ;;  %v4808_v46 = vor.u32 %v5812_v52, %v4807_v56 }
 0x319   :  { %v1561_v37 = vpop.f32.mrf.mxu3  ;;  %1992 = vmatpush.bf16.msrb.mxu0 %v4816_v45  ;;  %2006 = vmatpush.bf16.msrb.mxu1 %v4820_v47 }
 0x31a   :  { %v5811_v37 = vld [vmem:[%s8515_s4 + $0x154] sm:$0xf] }
 0x31b   :  { %v4812_v60 = vor.u32 %v5811_v37, %v4809_v53 }
 0x31d   :  { %1993 = vmatpush.bf16.msrb.mxu0 %v4808_v46  ;;  %2007 = vmatpush.bf16.msrb.mxu1 %v4812_v60 }
 0x324   :  { %1805 = vmatmul.bf16.vlgmr.msra.gmra.mxu0 %v7136_v58  ;;  %1818 = vmatmul.bf16.vlgmr.msra.gmra.mxu1 %v7407_v38 }
 0x387   :  { %v1778_v0 = vpop.f32.mrf.mxu2  ;;  %v1792_v1 = vpop.f32.mrf.mxu3 }
 0x38f   :  { %v7527_v33 = vpop.f32.mrf.mxu3  ;;  %v7529_v19 = vpop.f32.mrf.mxu2 }
 0x391   :  { %v1670_v4 = vpop.f32.mrf.mxu0  ;;  %v1684_v5 = vpop.f32.mrf.mxu1 }
 0x392   :  { %v7411_v8 = vadd.f32 %v1778_v0, %v1670_v4  ;;  %v7413_v51 = vadd.f32 %v1792_v1, %v1684_v5  ;;  %v5810_v0 = vld [vmem:[%s8515_s4 + $0x144] sm:$0xf0]  ;;  %v5809_v4 = vld [vmem:[%s8515_s4 + $0x144] sm:$0xf]  ;;  %v4801_v5 = vld [vmem:[%s8515_s4 + $0x148] sm:$0xf0] }
 0x399   :  { %v7415_v42 = vpop.f32.mrf.mxu0  ;;  %v7417_v43 = vpop.f32.mrf.mxu1 }
 0x3a1   :  { %v1806_v50 = vpop.f32.mrf.mxu0  ;;  %v1819_v57 = vpop.f32.mrf.mxu1 }
 0x3a2   :  { %v1807_v59 = vadd.f32 %v1806_v50, %v7273_v7  ;;  %v1820_v61 = vadd.f32 %v1819_v57, %v7273_v7 }
 0x3a4   :  { %v1826_v6 = vsel %vm1362_vm5, %v1820_v61, -inf  ;;  %v1823_v9 = vsel %vm1362_vm5, %v1807_v59, -inf }
 0x3a5   :  { %1827 = vmax.xlane.f32.xlu0 %v1826_v6  ;;  %1824 = vmax.xlane.f32.xlu2 %v1823_v9  ;;  %v4791_v6 = vld [vmem:[%s8515_s4 + $0x130] sm:$0xf]  ;;  %v5808_v9 = vld [vmem:[%s8515_s4 + $0x134] sm:$0xf0] }
 0x3a9   :  { %v1808_v10 = vpop.f32.mrf.mxu0  ;;  %v1821_v11 = vpop.f32.mrf.mxu1 }
 0x3aa   :  { %v4804_v11 = vor.u32 %v5809_v4, %v4801_v5 }
 0x3ac   :  { %2008 = vmatpush.bf16.msrb.mxu1 %v4804_v11 }
 0x418   :  { %v1828_v13 = vpop.xlane.xlu0 %1827  ;;  %v1825_v14 = vpop.xlane.xlu2 %1824 }
 0x419   :  { %v1830_v16 = vsub.f32 %v1820_v61, %v1828_v13  ;;  %v1829_v17 = vsub.f32 %v1807_v59, %v1825_v14  ;;  %v4800_v59 = vor.u32 %v5810_v0, %v4799_v54  ;;  %v5807_v14 = vld [vmem:[%s8515_s4 + $0x134] sm:$0xf] }
 0x41b   :  { %v1832_v18 = vpack.c.bf16 %v1830_v16, %v1830_v16  ;;  %v1831_v20 = vpack.c.bf16 %v1829_v17, %v1829_v17  ;;  %v4793_v16 = vld [vmem:[%s8515_s4 + $0x138] sm:$0xf0]  ;;  %1994 = vmatpush.bf16.msrb.mxu0 %v4800_v59  ;;  %v4792_v17 = vor.u32 %v5808_v9, %v4791_v6 }
 0x41d   :  { %v1834_v21 = vunpack.c.l.bf16 %v1832_v18  ;;  %v1833_v49 = vunpack.c.l.bf16 %v1831_v20  ;;  %v4783_v18 = vld [vmem:[%s8515_s4 + $0x120] sm:$0xf]  ;;  %v5806_v20 = vld [vmem:[%s8515_s4 + $0x124] sm:$0xf0] }
 0x41f   :  { %v1837_v22 = vmul.f32 1.442695, %v1834_v21  ;;  %v1835_v23 = vmul.f32 1.442695, %v1833_v49  ;;  %v4796_v21 = vor.u32 %v5807_v14, %v4793_v16  ;;  %v5805_v49 = vld [vmem:[%s8515_s4 + $0x124] sm:$0xf]  ;;  %1995 = vmatpush.bf16.msrb.mxu0 %v4792_v17 }
 0x420   :  { %v4905_v16 = vld [vmem:[%s8515_s4 + $0x1f0] sm:$0xf]  ;;  %v5832_v17 = vld [vmem:[%s8515_s4 + $0x1f4] sm:$0xf0] }
 0x421   :  { %6035 = vpow2.f32 %v1837_v22  ;;  %v4784_v22 = vor.u32 %v5806_v20, %v4783_v18  ;;  %2009 = vmatpush.bf16.msrb.mxu1 %v4796_v21  ;;  %v5831_v18 = vld [vmem:[%s8515_s4 + $0x1f4] sm:$0xf]  ;;  %v4906_v20 = vor.u32 %v5832_v17, %v4905_v16  ;;  %v4907_v21 = vld [vmem:[%s8515_s4 + $0x1f8] sm:$0xf0]  ;;  %v4851_v16 = vld [vmem:[%s8515_s4 + $0x188] sm:$0xf0] }
 0x422   :  { %6037 = vpow2.f32 %v1835_v23  ;;  %v4775_v23 = vld [vmem:[%s8515_s4 + $0x110] sm:$0xf] }
 0x423   :  { %1996 = vmatpush.bf16.msrb.mxu0 %v4784_v22  ;;  %v4910_v22 = vor.u32 %v5831_v18, %v4907_v21 }
 0x427   :  { %v6036_v15 = vpop.eup %6035 }
 0x428   :  { %v6038_v24 = vpop.eup %6037  ;;  %v1840_v12 = vpack.c.bf16 %v6036_v15, %v6036_v15 }
 0x429   :  { %v1839_v25 = vpack.c.bf16 %v6038_v24, %v6038_v24  ;;  %v5803_v24 = vld [vmem:[%s8515_s4 + $0x114] sm:$0xf] }
 0x42a   :  { %v1842_v26 = vunpack.c.l.bf16 %v1840_v12  ;;  %v4777_v12 = vld [vmem:[%s8515_s4 + $0x118] sm:$0xf0] }
 0x42b   :  { %v1841_v27 = vunpack.c.l.bf16 %v1839_v25 }
 0x42c   :  { %v1846_v28 = vsel %vm1362_vm5, %v1842_v26, 0.0 }
 0x42d   :  { %1847 = vadd.xlane.f32.xlu2 %v1846_v28  ;;  %v1843_v29 = vsel %vm1362_vm5, %v1841_v27, 0.0  ;;  %v2024_v28 = vrot.slane %v7136_v58, 4 }
 0x42e   :  { %1844 = vadd.xlane.f32.xlu1 %v1843_v29  ;;  %v4767_v29 = vld [vmem:[%s8515_s4 + $0x100] sm:$0xf] }
 0x42f   :  { %v4768_v32 = vor.u32 %v5802_v30, %v4767_v29  ;;  %v4881_v30 = vld [vmem:[%s8515_s4 + $0x1c0] sm:$0xf] }
 0x4a0   :  { %v1848_v55 = vpop.xlane.xlu2 %1847 }
 0x4a1   :  { %v1845_v48 = vpop.xlane.xlu1 %1844  ;;  %6039 = vrcp.f32 %v1848_v55 }
 0x4a2   :  { %6041 = vrcp.f32 %v1845_v48 }
 0x4a7   :  { %v6040_v1 = vpop.eup %6039 }
 0x4a8   :  { %v6042_v50 = vpop.eup %6041  ;;  %v1852_v57 = vmul.f32 %v6040_v1, %v1842_v26  ;;  %v4780_v26 = vor.u32 %v5803_v24, %v4777_v12  ;;  %v4889_v12 = vld [vmem:[%s8515_s4 + $0x1d0] sm:$0xf] }
 0x4a9   :  { %v1851_v61 = vmul.f32 %v6042_v50, %v1841_v27  ;;  %v2043_v27 = vrot.slane %v7407_v38, 4  ;;  %v4769_v38 = vld [vmem:[%s8515_s4 + $0x108] sm:$0xf0] }
 0x4aa   :  { %v1854_v10 = vpack.c.bf16 %v1852_v57, %v1852_v57  ;;  %v4772_v58 = vor.u32 %v5801_v31, %v4769_v38  ;;  %v5826_v31 = vld [vmem:[%s8515_s4 + $0x1c4] sm:$0xf0]  ;;  %v4883_v38 = vld [vmem:[%s8515_s4 + $0x1c8] sm:$0xf0] }
 0x4ab   :  { %v1853_v13 = vpack.c.bf16 %v1851_v61, %v1851_v61 }
 0x4ac   :  { %4748 = vmatmul.msk.bf16.vlgmr.msra.gmra.mxu3 %vm1362_vm5, %v1854_v10 }
 0x4ad   :  { %4747 = vmatmul.msk.bf16.vlgmr.msra.gmra.mxu2 %vm1362_vm5, %v1853_v13  ;;  %2129 = vmatpush.bf16.msra.mxu3 %v7271_v63  ;;  %v4785_v63 = vld [vmem:[%s8515_s4 + $0x128] sm:$0xf0] }
 0x4ae   :  { %2108 = vmatpush.bf16.msra.mxu2 %v7268_v62  ;;  %v5804_v62 = vld [vmem:[%s8515_s4 + $0x114] sm:$0xf0]  ;;  %v4788_v15 = vor.u32 %v5805_v49, %v4785_v63  ;;  %v4897_v49 = vld [vmem:[%s8515_s4 + $0x1e0] sm:$0xf]  ;;  %v5830_v63 = vld [vmem:[%s8515_s4 + $0x1e4] sm:$0xf0] }
 0x4af   :  { %v4776_v25 = vor.u32 %v5804_v62, %v4775_v23  ;;  %v5829_v23 = vld [vmem:[%s8515_s4 + $0x1e4] sm:$0xf]  ;;  %v4899_v62 = vld [vmem:[%s8515_s4 + $0x1e8] sm:$0xf0] }
 0x4b0   :  { %2010 = vmatpush.bf16.msrb.mxu1 %v4788_v15  ;;  %v4898_v15 = vor.u32 %v5830_v63, %v4897_v49  ;;  %v4902_v24 = vor.u32 %v5829_v23, %v4899_v62 }
 0x4b1   :  { %1997 = vmatpush.bf16.msrb.mxu0 %v4776_v25  ;;  %v5828_v25 = vld [vmem:[%s8515_s4 + $0x1d4] sm:$0xf0] }
 0x4b4   :  { %2011 = vmatpush.bf16.msrb.mxu1 %v4780_v26  ;;  %v5827_v26 = vld [vmem:[%s8515_s4 + $0x1d4] sm:$0xf] }
 0x4b5   :  { %1998 = vmatpush.bf16.msrb.mxu0 %v4768_v32  ;;  %v5825_v32 = vld [vmem:[%s8515_s4 + $0x1c4] sm:$0xf] }
 0x4b8   :  { %2012 = vmatpush.bf16.msrb.mxu1 %v4772_v58  ;;  %v4882_v58 = vor.u32 %v5826_v31, %v4881_v30 }
 0x4b9   :  { %2233 = vmatpush.bf16.msra.mxu0 %v4906_v20 }
 0x4bc   :  { %2056 = vmatmul.bf16.vlgmr.msrb.gmra.mxu3 %v2043_v27  ;;  %2247 = vmatpush.bf16.msra.mxu1 %v4910_v22  ;;  %v4891_v27 = vld [vmem:[%s8515_s4 + $0x1d8] sm:$0xf0] }
 0x4bd   :  { %2037 = vmatmul.bf16.vlgmr.msrb.gmra.mxu2 %v2024_v28  ;;  %2234 = vmatpush.bf16.msra.mxu0 %v4898_v15  ;;  %v4890_v28 = vor.u32 %v5828_v25, %v4889_v12  ;;  %v4894_v29 = vor.u32 %v5827_v26, %v4891_v27 }
 0x4c0   :  { %2248 = vmatpush.bf16.msra.mxu1 %v4902_v24  ;;  %v2265_v24 = vld [vmem:[%s8516_s5] sm:$0x3] }
 0x4c1   :  { %2235 = vmatpush.bf16.msra.mxu0 %v4890_v28  ;;  %v2267_v26 = vperm.slane %v2265_v24, 0  ;;  %v2268_v27 = vperm.slane %v2265_v24, 1 }
 0x4c4   :  { %2249 = vmatpush.bf16.msra.mxu1 %v4894_v29 }
 0x4c5   :  { %2236 = vmatpush.bf16.msra.mxu0 %v4882_v58  ;;  %v1781_v58 = vadd.f32 %v7529_v19, %v7415_v42 }
 0x52f   :  { %v1889_v34 = vpop.f32.mrf.mxu3 }
 0x530   :  { %v1870_v35 = vpop.f32.mrf.mxu2 }
 0x531   :  { %v1893_v36 = vpack.c.bf16 %v1889_v34, %v1870_v35  ;;  %v4886_v34 = vor.u32 %v5825_v32, %v4883_v38  ;;  %v4873_v35 = vld [vmem:[%s8515_s4 + $0x1b0] sm:$0xf] }
 0x533   :  { %1999 = vmatmul.bf16.vlgmr.msrb.gmra.mxu0 %v1893_v36  ;;  %2013 = vmatmul.bf16.vlgmr.msrb.gmra.mxu1 %v1893_v36  ;;  %v5824_v36 = vld [vmem:[%s8515_s4 + $0x1b4] sm:$0xf0] }
 0x534   :  { %2250 = vmatpush.bf16.msra.mxu1 %v4886_v34  ;;  %v1795_v34 = vadd.f32 %v7527_v33, %v7417_v43 }
 0x537   :  { %v1891_v41 = vpop.f32.mrf.mxu3 }
 0x538   :  { %v1872_v44 = vpop.f32.mrf.mxu2  ;;  %v5823_v41 = vld [vmem:[%s8515_s4 + $0x1b4] sm:$0xf] }
 0x539   :  { %v4875_v44 = vld [vmem:[%s8515_s4 + $0x1b8] sm:$0xf0] }
 0x53f   :  { %v2057_v55 = vpop.f32.mrf.mxu3 }
 0x540   :  { %v2038_v45 = vpop.f32.mrf.mxu2  ;;  %v2058_v48 = vadd.f32 %v2057_v55, %v7273_v7  ;;  %v4874_v55 = vor.u32 %v5824_v36, %v4873_v35 }
 0x541   :  { %v2039_v47 = vadd.f32 %v2038_v45, %v7273_v7  ;;  %v4878_v45 = vor.u32 %v5823_v41, %v4875_v44 }
 0x542   :  { %v2064_v56 = vsel %vm1362_vm5, %v2058_v48, -inf  ;;  %2237 = vmatpush.bf16.msra.mxu0 %v4874_v55 }
 0x543   :  { %2065 = vmax.xlane.f32.xlu1 %v2064_v56  ;;  %v2061_v52 = vsel %vm1362_vm5, %v2039_v47, -inf  ;;  %v5821_v56 = vld [vmem:[%s8515_s4 + $0x1a4] sm:$0xf]  ;;  %2251 = vmatpush.bf16.msra.mxu1 %v4878_v45 }
 0x544   :  { %2062 = vmax.xlane.f32.xlu0 %v2061_v52  ;;  %v4867_v52 = vld [vmem:[%s8515_s4 + $0x1a8] sm:$0xf0] }
 0x547   :  { %v2059_v37 = vpop.f32.mrf.mxu3 }
 0x548   :  { %v2040_v53 = vpop.f32.mrf.mxu2 }
 0x5b0   :  { %v2000_v22 = vpop.f32.mrf.mxu0  ;;  %v2014_v23 = vpop.f32.mrf.mxu1 }
 0x5b1   :  { %v2019_v12 = vadd.f32 %v2000_v22, %v7411_v8  ;;  %v2020_v25 = vadd.f32 %v2014_v23, %v7413_v51  ;;  %v5896_v22 = vld [vmem:[#allocation2 + $0x1f4] sm:$0xf0] }
 0x5b6   :  { %v2066_v46 = vpop.xlane.xlu1 %2065 }
 0x5b7   :  { %v2068_v60 = vsub.f32 %v2058_v48, %v2066_v46  ;;  %v2063_v54 = vpop.xlane.xlu0 %2062  ;;  %v4865_v48 = vld [vmem:[%s8515_s4 + $0x1a0] sm:$0xf] }
 0x5b8   :  { %v2067_v0 = vsub.f32 %v2039_v47, %v2063_v54  ;;  %v5822_v47 = vld [vmem:[%s8515_s4 + $0x1a4] sm:$0xf0]  ;;  %v4857_v54 = vld [vmem:[%s8515_s4 + $0x190] sm:$0xf]  ;;  %v2002_v62 = vpop.f32.mrf.mxu0  ;;  %v2016_v15 = vpop.f32.mrf.mxu1 }
 0x5b9   :  { %v2070_v1 = vpack.c.bf16 %v2068_v60, %v2068_v60  ;;  %v4866_v53 = vor.u32 %v5822_v47, %v4865_v48  ;;  %v4870_v60 = vor.u32 %v5821_v56, %v4867_v52  ;;  %v2021_v36 = vadd.f32 %v2002_v62, %v1781_v58  ;;  %v5057_v62 = vld [vmem:[#allocation2 + $0x120] sm:$0xf] }
 0x5ba   :  { %v2069_v4 = vpack.c.bf16 %v2067_v0, %v2067_v0  ;;  %v5820_v0 = vld [vmem:[%s8515_s4 + $0x194] sm:$0xf0]  ;;  %v2022_v51 = vadd.f32 %v2016_v15, %v1795_v34  ;;  %v5105_v58 = vld [vmem:[#allocation2 + $0x180] sm:$0xf] }
 0x5bb   :  { %v2072_v5 = vunpack.c.l.bf16 %v2070_v1  ;;  %v5819_v1 = vld [vmem:[%s8515_s4 + $0x194] sm:$0xf]  ;;  %2238 = vmatpush.bf16.msra.mxu0 %v4866_v53  ;;  %2252 = vmatpush.bf16.msra.mxu1 %v4870_v60  ;;  %v5872_v15 = vld [vmem:[#allocation2 + $0x134] sm:$0xf0] }
 0x5bc   :  { %v2071_v50 = vunpack.c.l.bf16 %v2069_v4  ;;  %v4859_v4 = vld [vmem:[%s8515_s4 + $0x198] sm:$0xf0]  ;;  %v5058_v24 = vor.u32 %v5872_v15, %v5057_v62  ;;  %v5884_v34 = vld [vmem:[#allocation2 + $0x194] sm:$0xf0] }
 0x5bd   :  { %v2075_v57 = vmul.f32 1.442695, %v2072_v5  ;;  %v4858_v5 = vor.u32 %v5820_v0, %v4857_v54  ;;  %v5876_v15 = vld [vmem:[#allocation2 + $0x15c] sm:$0xf] }
 0x5be   :  { %v2073_v59 = vmul.f32 1.442695, %v2071_v50  ;;  %v4862_v50 = vor.u32 %v5819_v1, %v4859_v4 }
 0x5bf   :  { %6043 = vpow2.f32 %v2075_v57  ;;  %2239 = vmatpush.bf16.msra.mxu0 %v4858_v5 }
 0x5c0   :  { %6045 = vpow2.f32 %v2073_v59  ;;  %2253 = vmatpush.bf16.msra.mxu1 %v4862_v50 }
 0x5c5   :  { %v6044_v7 = vpop.eup %6043 }
 0x5c6   :  { %v6046_v61 = vpop.eup %6045  ;;  %v2078_v6 = vpack.c.bf16 %v6044_v7, %v6044_v7 }
 0x5c7   :  { %v2077_v9 = vpack.c.bf16 %v6046_v61, %v6046_v61 }
 0x5c8   :  { %v7535_v10 = vunpack.c.l.bf16 %v2078_v6 }
 0x5c9   :  { %v7537_v11 = vunpack.c.l.bf16 %v2077_v9 }
 0x5ca   :  { %v2084_v13 = vsel %vm1362_vm5, %v7535_v10, 0.0 }
 0x5cb   :  { %2085 = vadd.xlane.f32.xlu0 %v2084_v13  ;;  %v2081_v14 = vsel %vm1362_vm5, %v7537_v11, 0.0  ;;  %v4849_v13 = vld [vmem:[%s8515_s4 + $0x180] sm:$0xf] }
 0x5cc   :  { %2082 = vadd.xlane.f32.xlu2 %v2081_v14  ;;  %v5818_v14 = vld [vmem:[%s8515_s4 + $0x184] sm:$0xf0] }
 0x63e   :  { %v2086_v37 = vpop.xlane.xlu0 %2085 }
 0x63f   :  { %v2083_v46 = vpop.xlane.xlu2 %2082  ;;  %6047 = vrcp.f32 %v2086_v37 }
 0x640   :  { %6049 = vrcp.f32 %v2083_v46  ;;  %v2428_v46 = vld [vmem:[#allocation2 + $0x210] sm:$0x33] }
 0x641   :  { %v2646_v60 = vunpack.c.l.b16 %v2428_v46 }
 0x643   :  { %v2718_v54 = vpack.c.b16 %v2646_v60, %v2646_v60  ;;  %v4985_v60 = vld [vmem:[#allocation2 + $0x90] sm:$0xf] }
 0x645   :  { %v6048_v57 = vpop.eup %6047  ;;  %v2794_v1 = vsel %vm951_vm0, %v2718_v54, 0  ;;  %v5854_v54 = vld [vmem:[#allocation2 + $0xa4] sm:$0xf0] }
 0x646   :  { %v6050_v59 = vpop.eup %6049  ;;  %v2090_v7 = vmul.f32 %v6048_v57, %v7535_v10  ;;  %v5817_v10 = vld [vmem:[%s8515_s4 + $0x184] sm:$0xf]  ;;  %2829 = vmatpush.bf16.msrb.mxu3 %v2794_v1  ;;  %v5863_v1 = vld [vmem:[#allocation2 + $0xf4] sm:$0xf] }
 0x647   :  { %v2089_v61 = vmul.f32 %v6050_v59, %v7537_v11  ;;  %v4850_v11 = vor.u32 %v5818_v14, %v4849_v13  ;;  %v4854_v17 = vor.u32 %v5817_v10, %v4851_v16 }
 0x648   :  { %v2092_v6 = vpack.c.bf16 %v2090_v7, %v2090_v7 }
 0x649   :  { %v2091_v9 = vpack.c.bf16 %v2089_v61, %v2089_v61  ;;  %2240 = vmatpush.bf16.msra.mxu0 %v4850_v11  ;;  %2254 = vmatpush.bf16.msra.mxu1 %v4854_v17 }
 0x64a   :  { %4830 = vmatmul.msk.bf16.vlgmr.msra.gmra.mxu3 %vm1362_vm5, %v2092_v6 }
 0x64b   :  { %4829 = vmatmul.msk.bf16.vlgmr.msra.gmra.mxu2 %vm1362_vm5, %v2091_v9 }
 0x6cd   :  { %v2131_v18 = vpop.f32.mrf.mxu3 }
 0x6ce   :  { %v2110_v20 = vpop.f32.mrf.mxu2 }
 0x6cf   :  { %v2135_v21 = vpack.c.bf16 %v2131_v18, %v2110_v20  ;;  %v5081_v20 = vld [vmem:[#allocation2 + $0x150] sm:$0xf] }
 0x6d1   :  { %2241 = vmatmul.bf16.vlgmr.msra.gmra.mxu0 %v2135_v21  ;;  %2255 = vmatmul.bf16.vlgmr.msra.gmra.mxu1 %v2135_v21  ;;  %v5878_v21 = vld [vmem:[#allocation2 + $0x164] sm:$0xf0] }
 0x6d5   :  { %v2133_v49 = vpop.f32.mrf.mxu3 }
 0x6d6   :  { %v2112_v63 = vpop.f32.mrf.mxu2  ;;  %v5082_v49 = vor.u32 %v5878_v21, %v5081_v20  ;;  %v5881_v20 = vld [vmem:[#allocation2 + $0x184] sm:$0xf] }
 0x6d7   :  { %v5153_v63 = vld [vmem:[#allocation2 + $0x1e0] sm:$0xf] }
 0x6d8   :  { %v5154_v23 = vor.u32 %v5896_v22, %v5153_v63  ;;  %2811 = vmatpush.bf16.msrb.mxu2 %v5082_v49  ;;  %v5107_v49 = vld [vmem:[#allocation2 + $0x198] sm:$0xf0]  ;;  %v4993_v63 = vld [vmem:[#allocation2 + $0x98] sm:$0xf]  ;;  %v5855_v22 = vld [vmem:[#allocation2 + $0xac] sm:$0xf0] }
 0x6d9   :  { %v4994_v62 = vor.u32 %v5855_v22, %v4993_v63  ;;  %v4995_v63 = vld [vmem:[#allocation2 + $0xb0] sm:$0xf0] }
 0x6da   :  { %2830 = vmatpush.bf16.msrb.mxu3 %v5154_v23  ;;  %v5110_v23 = vor.u32 %v5881_v20, %v5107_v49  ;;  %v4915_v20 = vld [vmem:[#allocation2 + $0x18] sm:$0xf0] }
 0x6db   :  { %v5852_v49 = vld [vmem:[#allocation2 + $0x9c] sm:$0xf] }
 0x6dc   :  { %2812 = vmatpush.bf16.msrb.mxu2 %v5058_v24  ;;  %v5091_v24 = vld [vmem:[#allocation2 + $0x170] sm:$0xf0] }
 0x74e   :  { %v2242_v28 = vpop.f32.mrf.mxu0  ;;  %v2256_v29 = vpop.f32.mrf.mxu1 }
 0x74f   :  { %v2261_v30 = vadd.f32 %v2242_v28, %v2019_v12  ;;  %v2262_v31 = vadd.f32 %v2256_v29, %v2020_v25  ;;  %v5129_v12 = vld [vmem:[#allocation2 + $0x1b0] sm:$0xf]  ;;  %v5890_v25 = vld [vmem:[#allocation2 + $0x1c4] sm:$0xf0] }
 0x750   :  { %v5879_v28 = vld [vmem:[#allocation2 + $0x16c] sm:$0xf0] }
 0x751   :  { %v2271_v32 = vadd.f32 %v2267_v26, %v2261_v30  ;;  %v2272_v38 = vadd.f32 %v2268_v27, %v2262_v31  ;;  %v5033_v30 = vld [vmem:[#allocation2 + $0xf0] sm:$0xf]  ;;  %v5866_v31 = vld [vmem:[#allocation2 + $0x104] sm:$0xf0] }
 0x753   :  { %v2275_v35 = vadd.f32 %v2271_v32, %v6433_v39  ;;  %v2276_v8 = vadd.f32 %v2272_v38, %v6348_v2  ;;  %v6125_v2 = vmov 180.0   ;;  %v2647_v32 = vunpack.c.h.b16 %v2428_v46 }
 0x754   :  { %6051 = vrcp.f32 %v6125_v2  ;;  %v5034_v38 = vor.u32 %v5866_v31, %v5033_v30  ;;  %v5155_v2 = vld [vmem:[#allocation2 + $0x1f8] sm:$0xf0] }
 0x755   :  { %v2281_v41 = vsel %vm947_vm1, %v2276_v8, 0.0  ;;  %v7682_v30 = vld [vmem:[#allocation2 + $0x218] sm:$0x33] }
 0x756   :  { %v2244_v44 = vpop.f32.mrf.mxu0  ;;  %v2258_v55 = vpop.f32.mrf.mxu1  ;;  %v2282_v45 = vadd.f32 %v2281_v41, %v2275_v35  ;;  %2813 = vmatpush.bf16.msrb.mxu2 %v5034_v38  ;;  %v5849_v38 = vld [vmem:[#allocation2 + $0x7c] sm:$0xf0] }
 0x757   :  { %v2263_v48 = vadd.f32 %v2244_v44, %v2021_v36  ;;  %v2264_v47 = vadd.f32 %v2258_v55, %v2022_v51  ;;  %v5083_v36 = vld [vmem:[#allocation2 + $0x168] sm:$0xf0]  ;;  %v2719_v51 = vpack.c.b16 %v2647_v32, %v2647_v32  ;;  %v5065_v44 = vld [vmem:[#allocation2 + $0x128] sm:$0xf]  ;;  %v5873_v55 = vld [vmem:[#allocation2 + $0x13c] sm:$0xf0] }
 0x758   :  { %2283 = vadd.xlane.f32.xlu1 %v2282_v45  ;;  %v4969_v32 = vld [vmem:[#allocation2 + $0x68] sm:$0xf] }
 0x759   :  { %v2273_v56 = vadd.f32 %v2267_v26, %v2263_v48  ;;  %v2274_v52 = vadd.f32 %v2268_v27, %v2264_v47  ;;  %v5130_v26 = vor.u32 %v5890_v25, %v5129_v12  ;;  %v5089_v27 = vld [vmem:[#allocation2 + $0x158] sm:$0xf]  ;;  %v2797_v45 = vsel %vm951_vm0, %v2719_v51, 0  ;;  %v5009_v47 = vld [vmem:[#allocation2 + $0xc0] sm:$0xf] }
 0x75a   :  { %v6052_v19 = vpop.eup %6051  ;;  %v5090_v29 = vor.u32 %v5879_v28, %v5089_v27  ;;  %v5066_v48 = vor.u32 %v5873_v55, %v5065_v44  ;;  %2857 = vmatpush.bf16.msrb.mxu0 %v2797_v45  ;;  %v4937_v12 = vld [vmem:[#allocation2 + $0x30] sm:$0xf]  ;;  %v5094_v25 = vor.u32 %v5876_v15, %v5091_v24  ;;  %v5851_v28 = vld [vmem:[#allocation2 + $0x94] sm:$0xf]  ;;  %v5836_v51 = vld [vmem:[#allocation2 + $0x14] sm:$0xf0] }
 0x75b   :  { %v2277_v42 = vadd.f32 %v2273_v56, %v6435_v40  ;;  %v2278_v43 = vadd.f32 %v2274_v52, %v6350_v3  ;;  %v2290_v37 = vmul.f32 180.0, %v6052_v19  ;;  %vm2294_vm6 = vweird.f32 %v6052_v19  ;;  %2831 = vmatpush.bf16.msrb.mxu3 %v5130_v26  ;;  %v5860_v56 = vld [vmem:[#allocation2 + $0xd4] sm:$0xf0]  ;;  %v5842_v26 = vld [vmem:[#allocation2 + $0x44] sm:$0xf0] }
 0x75c   :  { %2867 = vmatpush.bf16.msrb.mxu1 %v5090_v29  ;;  %v5010_v52 = vor.u32 %v5860_v56, %v5009_v47  ;;  %v4938_v27 = vor.u32 %v5842_v26, %v4937_v12  ;;  %v4987_v29 = vld [vmem:[#allocation2 + $0xa8] sm:$0xf0]  ;;  %v5845_v45 = vld [vmem:[#allocation2 + $0x64] sm:$0xf]  ;;  %v5113_v24 = vld [vmem:[#allocation2 + $0x188] sm:$0xf] }
 0x75d   :  { %v2285_v39 = vsel %vm947_vm1, %v2278_v43, 0.0  ;;  %v2291_v53 = vsub.f32 1.0, %v2290_v37  ;;  %v5867_v37 = vld [vmem:[#allocation2 + $0x10c] sm:$0xf0]  ;;  %v4990_v31 = vor.u32 %v5851_v28, %v4987_v29  ;;  %v5885_v12 = vld [vmem:[#allocation2 + $0x19c] sm:$0xf0] }
 0x75e   :  { %v2286_v33 = vadd.f32 %v2285_v39, %v2277_v42  ;;  %v5893_v39 = vld [vmem:[#allocation2 + $0x1e4] sm:$0xf]  ;;  %2814 = vmatpush.bf16.msrb.mxu2 %v5010_v52  ;;  %v4945_v52 = vld [vmem:[#allocation2 + $0x38] sm:$0xf]  ;;  %v5114_v26 = vor.u32 %v5885_v12, %v5113_v24  ;;  %v5073_v12 = vld [vmem:[#allocation2 + $0x130] sm:$0xf] }
 0x75f   :  { %v2292_v0 = vmul.f32 %v6052_v19, %v2291_v53  ;;  %v5158_v53 = vor.u32 %v5893_v39, %v5155_v2  ;;  %v5864_v39 = vld [vmem:[#allocation2 + $0xfc] sm:$0xf]  ;;  %v4971_v28 = vld [vmem:[#allocation2 + $0x80] sm:$0xf0] }
 0x760   :  { %2287 = vadd.xlane.f32.xlu2 %v2286_v33  ;;  %2868 = vmatpush.bf16.msrb.mxu1 %v5066_v48  ;;  %v4963_v48 = vld [vmem:[#allocation2 + $0x78] sm:$0xf0] }
 0x761   :  { %v2293_v4 = vadd.f32 %v6052_v19, %v2292_v0  ;;  %v4986_v0 = vor.u32 %v5854_v54, %v4985_v60  ;;  %2858 = vmatpush.bf16.msrb.mxu0 %v5158_v53  ;;  %v4966_v56 = vor.u32 %v5845_v45, %v4963_v48  ;;  %v5897_v53 = vld [vmem:[#allocation2 + $0x1fc] sm:$0xf0]  ;;  %v5839_v54 = vld [vmem:[#allocation2 + $0x34] sm:$0xf] }
 0x763   :  { %v7659_v40 = vsel %vm2294_vm6, %v6052_v19, %v2293_v4  ;;  %v5041_v19 = vld [vmem:[#allocation2 + $0xf8] sm:$0xf]  ;;  %v5035_v4 = vld [vmem:[#allocation2 + $0x108] sm:$0xf0]  ;;  %2815 = vmatpush.bf16.msrb.mxu2 %v4986_v0 }
 0x764   :  { %v5042_v46 = vor.u32 %v5867_v37, %v5041_v19  ;;  %v5161_v37 = vld [vmem:[#allocation2 + $0x1e8] sm:$0xf]  ;;  %v4939_v0 = vld [vmem:[#allocation2 + $0x48] sm:$0xf0] }
 0x765   :  { %v5162_v60 = vor.u32 %v5897_v53, %v5161_v37 }
 0x766   :  { %2869 = vmatpush.bf16.msrb.mxu1 %v5042_v46 }
 0x7cb   :  { %v2284_v3 = vpop.xlane.xlu1 %2283 }
 0x7cc   :  { %v2296_v5 = vmul.f32 %v7659_v40, %v2284_v3  ;;  %v5887_v3 = vld [vmem:[#allocation2 + $0x1b4] sm:$0xf] }
 0x7ce   :  { %v7662_v50 = vsub.f32 %v2275_v35, %v2296_v5  ;;  %v7664_v57 = vsub.f32 %v2276_v8, %v2296_v5  ;;  %v5106_v35 = vor.u32 %v5884_v34, %v5105_v58  ;;  %v5875_v8 = vld [vmem:[#allocation2 + $0x154] sm:$0xf]  ;;  %v5038_v5 = vor.u32 %v5863_v1, %v5035_v4  ;;  %v5870_v58 = vld [vmem:[#allocation2 + $0x12c] sm:$0xf]  ;;  %v4921_v4 = vld [vmem:[#allocation2 + $0x8] sm:$0xf] }
 0x7cf   :  { %v5086_v41 = vor.u32 %v5875_v8, %v5083_v36  ;;  %v2648_v34 = vunpack.c.l.b16 %v7682_v30  ;;  %v5067_v8 = vld [vmem:[#allocation2 + $0x140] sm:$0xf0]  ;;  %v4913_v36 = vld [vmem:[#allocation2] sm:$0xf]  ;;  %v4942_v1 = vor.u32 %v5839_v54, %v4939_v0 }
 0x7d0   :  { %v2302_v59 = vmul.f32 %v7662_v50, %v7662_v50  ;;  %v2303_v7 = vmul.f32 %v7664_v57, %v7664_v57  ;;  %2832 = vmatpush.bf16.msrb.mxu3 %v5106_v35  ;;  %v4970_v35 = vor.u32 %v5849_v38, %v4969_v32  ;;  %v4914_v44 = vor.u32 %v5836_v51, %v4913_v36  ;;  %v5898_v32 = vld [vmem:[#allocation2 + $0x204] sm:$0xf0]  ;;  %v5840_v36 = vld [vmem:[#allocation2 + $0x3c] sm:$0xf]  ;;  %v4947_v51 = vld [vmem:[#allocation2 + $0x50] sm:$0xf0] }
 0x7d1   :  { %v2720_v55 = vpack.c.b16 %v2648_v34, %v2648_v34  ;;  %v2280_v0 = vld [vmem:[%s8518_s7] sm:$0x3] }
 0x7d2   :  { %v2306_v61 = vsel %vm947_vm1, %v2303_v7, 0.0  ;;  %v5017_v7 = vld [vmem:[#allocation2 + $0xc8] sm:$0xf] }
 0x7d3   :  { %v2288_v6 = vpop.xlane.xlu2 %2287  ;;  %v2307_v9 = vadd.f32 %v2306_v61, %v2302_v59  ;;  %v5131_v59 = vld [vmem:[#allocation2 + $0x1c8] sm:$0xf0]  ;;  %v5861_v61 = vld [vmem:[#allocation2 + $0xdc] sm:$0xf0]  ;;  %v2800_v47 = vsel %vm951_vm0, %v2720_v55, 0 }
 0x7d4   :  { %v2297_v13 = vmul.f32 %v7659_v40, %v2288_v6  ;;  %2839 = vmatpush.bf16.msra.mxu3 %v5086_v41  ;;  %v5134_v6 = vor.u32 %v5887_v3, %v5131_v59  ;;  %v5070_v41 = vor.u32 %v5870_v58, %v5067_v8  ;;  %v5837_v3 = vld [vmem:[#allocation2 + $0x1c] sm:$0xf0]  ;;  %v5892_v55 = vld [vmem:[#allocation2 + $0x1d4] sm:$0xf0] }
 0x7d5   :  { %2308 = vadd.xlane.f32.xlu0 %v2307_v9  ;;  %v5018_v9 = vor.u32 %v5861_v61, %v5017_v7  ;;  %v4922_v7 = vor.u32 %v5837_v3, %v4921_v4  ;;  %v5019_v61 = vld [vmem:[#allocation2 + $0xe0] sm:$0xf0] }
 0x7d6   :  { %v7672_v14 = vsub.f32 %v2277_v42, %v2297_v13  ;;  %v7674_v10 = vsub.f32 %v2278_v43, %v2297_v13  ;;  %v5869_v42 = vld [vmem:[#allocation2 + $0x124] sm:$0xf]  ;;  %v5059_v43 = vld [vmem:[#allocation2 + $0x138] sm:$0xf0]  ;;  %v4961_v13 = vld [vmem:[#allocation2 + $0x60] sm:$0xf]  ;;  %2859 = vmatpush.bf16.msrb.mxu0 %v5134_v6 }
 0x7d7   :  { %v5062_v33 = vor.u32 %v5869_v42, %v5059_v43  ;;  %2870 = vmatpush.bf16.msrb.mxu1 %v5018_v9  ;;  %v5843_v42 = vld [vmem:[#allocation2 + $0x4c] sm:$0xf0]  ;;  %v7689_v6 = vld [vmem:[#allocation2 + $0x220] sm:$0x33] }
 0x7d8   :  { %v2304_v11 = vmul.f32 %v7672_v14, %v7672_v14  ;;  %v2305_v16 = vmul.f32 %v7674_v10, %v7674_v10  ;;  %v4946_v43 = vor.u32 %v5843_v42, %v4945_v52  ;;  %v4923_v52 = vld [vmem:[#allocation2 + $0x20] sm:$0xf0] }
 0x7d9   :  { %2840 = vmatpush.bf16.msra.mxu3 %v5062_v33  ;;  %v5043_v33 = vld [vmem:[#allocation2 + $0x110] sm:$0xf0] }
 0x7da   :  { %v2310_v17 = vsel %vm947_vm1, %v2305_v16, 0.0  ;;  %2860 = vmatpush.bf16.msrb.mxu0 %v5110_v23  ;;  %v5046_v19 = vor.u32 %v5864_v39, %v5043_v33  ;;  %v4998_v23 = vor.u32 %v5852_v49, %v4995_v63  ;;  %v5121_v39 = vld [vmem:[#allocation2 + $0x190] sm:$0xf]  ;;  %v5886_v33 = vld [vmem:[#allocation2 + $0x1a4] sm:$0xf0] }
 0x7db   :  { %v2311_v18 = vadd.f32 %v2310_v17, %v2304_v11  ;;  %v5848_v11 = vld [vmem:[#allocation2 + $0x74] sm:$0xf0]  ;;  %v5857_v17 = vld [vmem:[#allocation2 + $0xc4] sm:$0xf]  ;;  %2871 = vmatpush.bf16.msrb.mxu1 %v4994_v62  ;;  %v5122_v37 = vor.u32 %v5886_v33, %v5121_v39  ;;  %v5097_v63 = vld [vmem:[#allocation2 + $0x160] sm:$0xf] }
 0x7dc   :  { %v4962_v16 = vor.u32 %v5848_v11, %v4961_v13  ;;  %v5137_v13 = vld [vmem:[#allocation2 + $0x1b8] sm:$0xf]  ;;  %v5891_v11 = vld [vmem:[#allocation2 + $0x1cc] sm:$0xf0]  ;;  %v5123_v39 = vld [vmem:[#allocation2 + $0x1a8] sm:$0xf0] }
 0x7dd   :  { %2312 = vadd.xlane.f32.xlu1 %v2311_v18  ;;  %2841 = vmatpush.bf16.msra.mxu3 %v5038_v5  ;;  %v5011_v18 = vld [vmem:[#allocation2 + $0xd8] sm:$0xf0]  ;;  %v5858_v5 = vld [vmem:[#allocation2 + $0xcc] sm:$0xf] }
 0x7de   :  { %2816 = vmatpush.bf16.msrb.mxu2 %v4962_v16  ;;  %v5014_v21 = vor.u32 %v5857_v17, %v5011_v18  ;;  %2895 = vmatpush.bf16.msra.mxu0 %v5094_v25  ;;  %v5022_v9 = vor.u32 %v5858_v5, %v5019_v61  ;;  %v2650_v16 = vunpack.c.l.b16 %v7689_v6  ;;  %v5138_v17 = vor.u32 %v5891_v11, %v5137_v13  ;;  %v5833_v18 = vld [vmem:[#allocation2 + $0x4] sm:$0xf] }
 0x7df   :  { %2872 = vmatpush.bf16.msrb.mxu1 %v4970_v35  ;;  %v2352_v61 = vperm.slane %v2280_v0, 0  ;;  %v2649_v11 = vunpack.c.h.b16 %v7682_v30 }
 0x7e0   :  { %v2722_v22 = vpack.c.b16 %v2650_v16, %v2650_v16  ;;  %v2651_v16 = vunpack.c.h.b16 %v7689_v6 }
 0x7e1   :  { %2842 = vmatpush.bf16.msra.mxu3 %v5014_v21  ;;  %v4918_v21 = vor.u32 %v5833_v18, %v4915_v20 }
 0x7e2   :  { %2817 = vmatpush.bf16.msrb.mxu2 %v4938_v27  ;;  %2896 = vmatpush.bf16.msra.mxu0 %v5070_v41  ;;  %v2806_v15 = vsel %vm951_vm0, %v2722_v22, 0  ;;  %v5846_v27 = vld [vmem:[#allocation2 + $0x6c] sm:$0xf]  ;;  %v4950_v41 = vor.u32 %v5840_v36, %v4947_v51  ;;  %v2721_v22 = vpack.c.b16 %v2649_v11, %v2649_v11  ;;  %v5139_v36 = vld [vmem:[#allocation2 + $0x1d0] sm:$0xf0] }
 0x7e3   :  { %2873 = vmatpush.bf16.msrb.mxu1 %v4946_v43  ;;  %v4974_v29 = vor.u32 %v5846_v27, %v4971_v28  ;;  %v5894_v27 = vld [vmem:[#allocation2 + $0x1ec] sm:$0xf]  ;;  %v5163_v28 = vld [vmem:[#allocation2 + $0x200] sm:$0xf0]  ;;  %v5239_v11 = vld [vmem:[%s8523_s12 + $0x70] sm:$0xf] }
 0x7e5   :  { %2843 = vmatpush.bf16.msra.mxu3 %v4990_v31  ;;  %v5169_v31 = vld [vmem:[#allocation2 + $0x1f0] sm:$0xf] }
 0x7e6   :  { %2818 = vmatpush.bf16.msrb.mxu2 %v4914_v44  ;;  %2897 = vmatpush.bf16.msra.mxu0 %v5046_v19  ;;  %v5170_v34 = vor.u32 %v5898_v32, %v5169_v31  ;;  %v5145_v44 = vld [vmem:[#allocation2 + $0x1c0] sm:$0xf]  ;;  %v5895_v31 = vld [vmem:[#allocation2 + $0x1f4] sm:$0xf]  ;;  %v5171_v32 = vld [vmem:[#allocation2 + $0x208] sm:$0xf0] }
 0x7e7   :  { %2874 = vmatpush.bf16.msrb.mxu1 %v4922_v7  ;;  %v5146_v48 = vor.u32 %v5892_v55, %v5145_v44  ;;  %v5174_v51 = vor.u32 %v5895_v31, %v5171_v32  ;;  %v5147_v44 = vld [vmem:[#allocation2 + $0x1d8] sm:$0xf0]  ;;  %v5910_v31 = vld [vmem:[%s8523_s12 + $0x54] sm:$0xf0]  ;;  %v5838_v32 = vld [vmem:[#allocation2 + $0x24] sm:$0xf0] }
 0x7e9   :  { %2844 = vmatpush.bf16.msra.mxu3 %v4966_v56 }
 0x7ea   :  { %2885 = vmatpush.bf16.msra.mxu2 %v2800_v47  ;;  %2898 = vmatpush.bf16.msra.mxu0 %v5022_v9  ;;  %v5834_v47 = vld [vmem:[#allocation2 + $0xc] sm:$0xf]  ;;  %v2353_v9 = vperm.slane %v2280_v0, 1 }
 0x7eb   :  { %2941 = vmatpush.bf16.msra.mxu1 %v2806_v15  ;;  %v4926_v43 = vor.u32 %v5834_v47, %v4923_v52  ;;  %v5862_v47 = vld [vmem:[#allocation2 + $0xe4] sm:$0xf0]  ;;  %v5115_v52 = vld [vmem:[#allocation2 + $0x1a0] sm:$0xf0] }
 0x7ed   :  { %2845 = vmatpush.bf16.msra.mxu3 %v4942_v1 }
 0x7ee   :  { %2886 = vmatpush.bf16.msra.mxu2 %v5162_v60  ;;  %2899 = vmatpush.bf16.msra.mxu0 %v4998_v23  ;;  %v2723_v23 = vpack.c.b16 %v2651_v16, %v2651_v16 }
 0x7ef   :  { %2942 = vmatpush.bf16.msra.mxu1 %v5170_v34  ;;  %v5049_v34 = vld [vmem:[#allocation2 + $0x100] sm:$0xf] }
 0x7f1   :  { %2846 = vmatpush.bf16.msra.mxu3 %v4918_v21 }
 0x7f2   :  { %2887 = vmatpush.bf16.msra.mxu2 %v5138_v17  ;;  %2900 = vmatpush.bf16.msra.mxu0 %v4974_v29  ;;  %v2809_v29 = vsel %vm951_vm0, %v2723_v23, 0 }
 0x7f3   :  { %2943 = vmatpush.bf16.msra.mxu1 %v5146_v48  ;;  %v5025_v48 = vld [vmem:[#allocation2 + $0xd0] sm:$0xf] }
 0x7f4   :  { %v5026_v33 = vor.u32 %v5862_v47, %v5025_v48  ;;  %v5908_v48 = vld [vmem:[%s8523_s12 + $0x44] sm:$0xf0] }
 0x7f6   :  { %2888 = vmatpush.bf16.msra.mxu2 %v5114_v26  ;;  %2901 = vmatpush.bf16.msra.mxu0 %v4950_v41  ;;  %v2803_v26 = vsel %vm951_vm0, %v2721_v22, 0  ;;  %v5889_v41 = vld [vmem:[#allocation2 + $0x1c4] sm:$0xf]  ;;  %v5912_v22 = vld [vmem:[%s8523_s12 + $0x64] sm:$0xf0] }
 0x7f7   :  { %2944 = vmatpush.bf16.msra.mxu1 %v5122_v37  ;;  %v5856_v37 = vld [vmem:[#allocation2 + $0xb4] sm:$0xf0] }
 0x7fa   :  { %2902 = vmatpush.bf16.msra.mxu0 %v4926_v43  ;;  %v5883_v43 = vld [vmem:[#allocation2 + $0x194] sm:$0xf] }
 0x848   :  { %v2309_v2 = vpop.xlane.xlu0 %2308 }
 0x849   :  { %v2314_v46 = vmul.f32 %v2309_v2, %v7659_v40 }
 0x84b   :  { %v7687_v59 = vadd.f32 1e-05, %v2314_v46  ;;  %v2279_v46 = vld [vmem:[%s8517_s6] sm:$0x3] }
 0x84c   :  { %v2343_v4 = vperm.slane %v2279_v46, 0  ;;  %v2344_v3 = vperm.slane %v2279_v46, 1  ;;  %v5099_v46 = vld [vmem:[#allocation2 + $0x178] sm:$0xf0] }
 0x84d   :  { %6053 = vrsqrt.f32 %v7687_v59  ;;  %vm2324_vm8 = vweird.f32 %v7687_v59 }
 0x850   :  { %v2313_v62 = vpop.xlane.xlu1 %2312 }
 0x851   :  { %v2315_v25 = vmul.f32 %v2313_v62, %v7659_v40 }
 0x853   :  { %v6054_v38 = vpop.eup %6053  ;;  %v2317_v58 = vadd.f32 1e-05, %v2315_v25  ;;  %v5874_v25 = vld [vmem:[#allocation2 + $0x144] sm:$0xf0] }
 0x854   :  { %v2319_v35 = vmul.f32 %v6054_v38, %v7687_v59  ;;  %vm2325_vm7 = vweird.f32 %v6054_v38 }
 0x855   :  { %6055 = vrsqrt.f32 %v2317_v58  ;;  %vm2326_vm9 = vmor %vm2324_vm8, %vm2325_vm7  ;;  %vm2334_vm11 = vweird.f32 %v2317_v58 }
 0x856   :  { %v2320_v8 = vmul.f32 %v6054_v38, %v2319_v35  ;;  %v5868_v35 = vld [vmem:[#allocation2 + $0x114] sm:$0xf0] }
 0x857   :  { %v5050_v55 = vor.u32 %v5868_v35, %v5049_v34 }
 0x858   :  { %v2321_v45 = vmul.f32 0.5, %v2320_v8  ;;  %v5888_v8 = vld [vmem:[#allocation2 + $0x1bc] sm:$0xf] }
 0x85a   :  { %v2322_v56 = vsub.f32 1.5, %v2321_v45  ;;  %v5142_v45 = vor.u32 %v5888_v8, %v5139_v36  ;;  %v5343_v8 = vld [vmem:[%s8523_s12 + $0x140] sm:$0xf]  ;;  %v5940_v36 = vld [vmem:[%s8523_s12 + $0x144] sm:$0xf0] }
 0x85b   :  { %v6056_v42 = vpop.eup %6055  ;;  %v5344_v47 = vor.u32 %v5940_v36, %v5343_v8  ;;  %v5960_v36 = vld [vmem:[%s8523_s12 + $0x1e4] sm:$0xf0] }
 0x85c   :  { %v2323_v2 = vmul.f32 %v6054_v38, %v2322_v56  ;;  %v2329_v19 = vmul.f32 %v6056_v42, %v2317_v58  ;;  %vm2335_vm10 = vweird.f32 %v6056_v42  ;;  %v5166_v58 = vor.u32 %v5894_v27, %v5163_v28  ;;  %v5882_v56 = vld [vmem:[#allocation2 + $0x18c] sm:$0xf]  ;;  %v4929_v28 = vld [vmem:[#allocation2 + $0x10] sm:$0xf] }
 0x85d   :  { %vm2336_vm12 = vmor %vm2334_vm11, %vm2335_vm10 }
 0x85e   :  { %v2330_v53 = vmul.f32 %v6056_v42, %v2329_v19  ;;  %v2327_v60 = vsel %vm2326_vm9, %v6054_v38, %v2323_v2  ;;  %v5074_v38 = vor.u32 %v5874_v25, %v5073_v12  ;;  %v5118_v2 = vor.u32 %v5882_v56, %v5115_v52  ;;  %v5001_v19 = vld [vmem:[#allocation2 + $0xa0] sm:$0xf]  ;;  %v5351_v12 = vld [vmem:[%s8523_s12 + $0x150] sm:$0xf]  ;;  %v5942_v25 = vld [vmem:[%s8523_s12 + $0x154] sm:$0xf0] }
 0x85f   :  { %v2338_v5 = vmul.f32 %v2327_v60, %v7662_v50  ;;  %v2339_v59 = vmul.f32 %v2327_v60, %v7664_v57  ;;  %v5880_v57 = vld [vmem:[#allocation2 + $0x174] sm:$0xf0]  ;;  %v5126_v60 = vor.u32 %v5883_v43, %v5123_v39  ;;  %v5352_v34 = vor.u32 %v5942_v25, %v5351_v12  ;;  %v5335_v56 = vld [vmem:[%s8523_s12 + $0x130] sm:$0xf]  ;;  %v5847_v43 = vld [vmem:[#allocation2 + $0x74] sm:$0xf] }
 0x860   :  { %v2331_v54 = vmul.f32 0.5, %v2330_v53  ;;  %v5877_v53 = vld [vmem:[#allocation2 + $0x164] sm:$0xf]  ;;  %v5938_v52 = vld [vmem:[%s8523_s12 + $0x134] sm:$0xf0] }
 0x861   :  { %v2347_v17 = vmul.f32 %v2343_v4, %v2338_v5  ;;  %v2348_v18 = vmul.f32 %v2344_v3, %v2339_v59  ;;  %v5102_v0 = vor.u32 %v5877_v53, %v5099_v46  ;;  %v5075_v5 = vld [vmem:[#allocation2 + $0x148] sm:$0xf0]  ;;  %v4953_v59 = vld [vmem:[#allocation2 + $0x40] sm:$0xf]  ;;  %v5913_v12 = vld [vmem:[%s8523_s12 + $0x74] sm:$0xf] }
 0x862   :  { %v2332_v1 = vsub.f32 1.5, %v2331_v54  ;;  %v5002_v54 = vor.u32 %v5856_v37, %v5001_v19  ;;  %v5906_v19 = vld [vmem:[%s8523_s12 + $0x34] sm:$0xf0]  ;;  %v5336_v37 = vor.u32 %v5938_v52, %v5335_v56  ;;  %v5241_v25 = vld [vmem:[%s8523_s12 + $0x78] sm:$0xf0] }
 0x863   :  { %v7709_v62 = vadd.f32 %v2352_v61, %v2347_v17  ;;  %v7711_v15 = vadd.f32 %v2353_v9, %v2348_v18  ;;  %v5287_v56 = vld [vmem:[%s8523_s12 + $0xd0] sm:$0xf]  ;;  %v5926_v52 = vld [vmem:[%s8523_s12 + $0xd4] sm:$0xf0] }
 0x864   :  { %v2333_v7 = vmul.f32 %v6056_v42, %v2332_v1  ;;  %v4977_v1 = vld [vmem:[#allocation2 + $0x70] sm:$0xf] }
 0x866   :  { %v2337_v13 = vsel %vm2336_vm12, %v6056_v42, %v2333_v7  ;;  %v5150_v42 = vor.u32 %v5889_v41, %v5147_v44  ;;  %v5844_v7 = vld [vmem:[#allocation2 + $0x54] sm:$0xf0]  ;;  %v5853_v44 = vld [vmem:[#allocation2 + $0xa4] sm:$0xf] }
 0x867   :  { %v2340_v20 = vmul.f32 %v2337_v13, %v7672_v14  ;;  %v2341_v21 = vmul.f32 %v2337_v13, %v7674_v10  ;;  %v5098_v10 = vor.u32 %v5880_v57, %v5097_v63  ;;  %v5946_v13 = vld [vmem:[%s8523_s12 + $0x174] sm:$0xf0]  ;;  %v5231_v57 = vld [vmem:[%s8523_s12 + $0x60] sm:$0xf] }
 0x869   :  { %v2349_v49 = vmul.f32 %v2343_v4, %v2340_v20  ;;  %v2350_v50 = vmul.f32 %v2344_v3, %v2341_v21  ;;  %v5850_v4 = vld [vmem:[#allocation2 + $0x84] sm:$0xf0]  ;;  %v5871_v3 = vld [vmem:[#allocation2 + $0x134] sm:$0xf]  ;;  %v5914_v20 = vld [vmem:[%s8523_s12 + $0x74] sm:$0xf0] }
 0x86a   :  { %v4978_v16 = vor.u32 %v5850_v4, %v4977_v1  ;;  %v5078_v17 = vor.u32 %v5871_v3, %v5075_v5  ;;  %v5359_v21 = vld [vmem:[%s8523_s12 + $0x160] sm:$0xf]  ;;  %v5240_v63 = vor.u32 %v5914_v20, %v5239_v11  ;;  %v5835_v1 = vld [vmem:[#allocation2 + $0x14] sm:$0xf]  ;;  %v4931_v4 = vld [vmem:[#allocation2 + $0x28] sm:$0xf0] }
 0x86b   :  { %v7713_v24 = vadd.f32 %v2352_v61, %v2349_v49  ;;  %v7715_v30 = vadd.f32 %v2353_v9, %v2350_v50  ;;  %v5865_v61 = vld [vmem:[#allocation2 + $0x104] sm:$0xf]  ;;  %v5367_v9 = vld [vmem:[%s8523_s12 + $0x170] sm:$0xf]  ;;  %v5944_v49 = vld [vmem:[%s8523_s12 + $0x164] sm:$0xf0]  ;;  %v4934_v3 = vor.u32 %v5835_v1, %v4931_v4 }
 0x86c   :  { %v5368_v18 = vor.u32 %v5946_v13, %v5367_v9  ;;  %v5051_v50 = vld [vmem:[#allocation2 + $0x118] sm:$0xf0]  ;;  %v5360_v23 = vor.u32 %v5944_v49, %v5359_v21  ;;  %v5936_v5 = vld [vmem:[%s8523_s12 + $0x124] sm:$0xf0]  ;;  %v5934_v13 = vld [vmem:[%s8523_s12 + $0x114] sm:$0xf0] }
 0x86d   :  { %v7719_v6 = vpack.c.bf16 %v7713_v24, %v7709_v62  ;;  %v7723_v14 = vpack.c.bf16 %v7715_v30, %v7711_v15  ;;  %v5054_v27 = vor.u32 %v5865_v61, %v5051_v50  ;;  %v5904_v61 = vld [vmem:[%s8523_s12 + $0x24] sm:$0xf0]  ;;  %v5303_v20 = vld [vmem:[%s8523_s12 + $0xf0] sm:$0xf]  ;;  %v5930_v21 = vld [vmem:[%s8523_s12 + $0xf4] sm:$0xf0] }
 0x86e   :  { %v5311_v49 = vld [vmem:[%s8523_s12 + $0x100] sm:$0xf]  ;;  %v5304_v50 = vor.u32 %v5930_v21, %v5303_v20  ;;  %v5905_v20 = vld [vmem:[%s8523_s12 + $0x34] sm:$0xf]  ;;  %v5209_v21 = vld [vmem:[%s8523_s12 + $0x38] sm:$0xf0] }
 0x86f   :  { %2819 = vmatmul.bf16.vlgmr.msrb.gmra.mxu2 %v7719_v6  ;;  %5175 = vmatmul.msk.bf16.vlgmr.msrb.gmra.mxu3 %vm947_vm1, %v7723_v14  ;;  %v5407_v1 = vld [vmem:[%s8523_s12 + $0x1c0] sm:$0xf] }
 0x870   :  { %5176 = vmatmul.msk.bf16.vlgmr.msrb.gmra.mxu0 %vm947_vm1, %v7723_v14  ;;  %2875 = vmatmul.bf16.vlgmr.msrb.gmra.mxu1 %v7719_v6 }
 0x871   :  { %2923 = vmatpush.bf16.msrb.mxu3 %v5098_v10  ;;  %2913 = vmatpush.bf16.msrb.mxu2 %v2803_v26  ;;  %v5232_v10 = vor.u32 %v5912_v22, %v5231_v57  ;;  %v4954_v26 = vor.u32 %v5844_v7, %v4953_v59  ;;  %v5199_v7 = vld [vmem:[%s8523_s12 + $0x20] sm:$0xf]  ;;  %v5431_v57 = vld [vmem:[%s8523_s12 + $0x1f0] sm:$0xf]  ;;  %v5962_v22 = vld [vmem:[%s8523_s12 + $0x1f4] sm:$0xf0] }
 0x872   :  { %2969 = vmatpush.bf16.msrb.mxu0 %v2809_v29  ;;  %3547 = vmatpush.bf16.msrb.mxu1 %v5240_v63  ;;  %v5223_v29 = vld [vmem:[%s8523_s12 + $0x50] sm:$0xf]  ;;  %v5200_v9 = vor.u32 %v5904_v61, %v5199_v7  ;;  %v5932_v63 = vld [vmem:[%s8523_s12 + $0x104] sm:$0xf0]  ;;  %v5471_v61 = vld [vmem:[%s8523_s12 + $0x240] sm:$0xf] }
 0x873   :  { %v5224_v35 = vor.u32 %v5910_v31, %v5223_v29  ;;  %v5495_v29 = vld [vmem:[%s8523_s12 + $0x270] sm:$0xf]  ;;  %v5978_v31 = vld [vmem:[%s8523_s12 + $0x274] sm:$0xf0] }
 0x875   :  { %2924 = vmatpush.bf16.msrb.mxu3 %v5074_v38  ;;  %2914 = vmatpush.bf16.msrb.mxu2 %v5166_v58  ;;  %v5859_v38 = vld [vmem:[#allocation2 + $0xd4] sm:$0xf]  ;;  %v5027_v58 = vld [vmem:[#allocation2 + $0xe8] sm:$0xf0] }
 0x876   :  { %2970 = vmatpush.bf16.msrb.mxu0 %v5174_v51  ;;  %3548 = vmatpush.bf16.msrb.mxu1 %v5232_v10  ;;  %v4930_v51 = vor.u32 %v5838_v32, %v4929_v28  ;;  %v5030_v41 = vor.u32 %v5859_v38, %v5027_v58  ;;  %v5432_v10 = vor.u32 %v5962_v22, %v5431_v57  ;;  %v5900_v28 = vld [vmem:[%s8523_s12 + $0x4] sm:$0xf0]  ;;  %v5295_v58 = vld [vmem:[%s8523_s12 + $0xe0] sm:$0xf]  ;;  %v5970_v57 = vld [vmem:[%s8523_s12 + $0x234] sm:$0xf0] }
 0x877   :  { %v5496_v38 = vor.u32 %v5978_v31, %v5495_v29 }
 0x879   :  { %2925 = vmatpush.bf16.msrb.mxu3 %v5050_v55  ;;  %2915 = vmatpush.bf16.msrb.mxu2 %v5142_v45  ;;  %v5003_v55 = vld [vmem:[#allocation2 + $0xb8] sm:$0xf0]  ;;  %v5215_v45 = vld [vmem:[%s8523_s12 + $0x40] sm:$0xf] }
 0x87a   :  { %2971 = vmatpush.bf16.msrb.mxu0 %v5150_v42  ;;  %3549 = vmatpush.bf16.msrb.mxu1 %v5224_v35  ;;  %v5006_v42 = vor.u32 %v5853_v44, %v5003_v55  ;;  %v5216_v39 = vor.u32 %v5908_v48, %v5215_v45  ;;  %v5423_v35 = vld [vmem:[%s8523_s12 + $0x1e0] sm:$0xf]  ;;  %v5976_v48 = vld [vmem:[%s8523_s12 + $0x264] sm:$0xf0] }
 0x87b   :  { %v5424_v44 = vor.u32 %v5960_v36, %v5423_v35  ;;  %v5487_v45 = vld [vmem:[%s8523_s12 + $0x260] sm:$0xf]  ;;  %v5918_v35 = vld [vmem:[%s8523_s12 + $0x94] sm:$0xf0] }
 0x87d   :  { %2926 = vmatpush.bf16.msrb.mxu3 %v5026_v33  ;;  %2916 = vmatpush.bf16.msrb.mxu2 %v5118_v2  ;;  %v4979_v33 = vld [vmem:[#allocation2 + $0x88] sm:$0xf0]  ;;  %v5207_v2 = vld [vmem:[%s8523_s12 + $0x30] sm:$0xf] }
 0x87e   :  { %2972 = vmatpush.bf16.msrb.mxu0 %v5126_v60  ;;  %v4982_v53 = vor.u32 %v5847_v43, %v4979_v33  ;;  %3550 = vmatpush.bf16.msrb.mxu1 %v5216_v39  ;;  %v5208_v46 = vor.u32 %v5906_v19, %v5207_v2  ;;  %v5841_v60 = vld [vmem:[#allocation2 + $0x44] sm:$0xf]  ;;  %v5288_v43 = vor.u32 %v5926_v52, %v5287_v56  ;;  %v5958_v39 = vld [vmem:[%s8523_s12 + $0x1d4] sm:$0xf0]  ;;  %v5909_v33 = vld [vmem:[%s8523_s12 + $0x54] sm:$0xf] }
 0x87f   :  { %2847 = vmatmul.bf16.vlgmr.msra.gmra.mxu3 %v7719_v6  ;;  %5177 = vmatmul.msk.bf16.vlgmr.msra.gmra.mxu2 %vm947_vm1, %v7723_v14  ;;  %v5225_v2 = vld [vmem:[%s8523_s12 + $0x58] sm:$0xf0]  ;;  %v5247_v52 = vld [vmem:[%s8523_s12 + $0x80] sm:$0xf] }
 0x880   :  { %2903 = vmatmul.bf16.vlgmr.msra.gmra.mxu0 %v7719_v6  ;;  %5179 = vmatmul.msk.bf16.vlgmr.msra.gmra.mxu1 %vm947_vm1, %v7723_v14 }
 0x881   :  { %2927 = vmatpush.bf16.msrb.mxu3 %v5002_v54  ;;  %2951 = vmatpush.bf16.msra.mxu2 %v5102_v0  ;;  %v4955_v54 = vld [vmem:[#allocation2 + $0x58] sm:$0xf0] }
 0x882   :  { %3575 = vmatpush.bf16.msra.mxu0 %v5368_v18  ;;  %v4958_v0 = vor.u32 %v5841_v60, %v4955_v54  ;;  %3551 = vmatpush.bf16.msrb.mxu1 %v5208_v46  ;;  %v5974_v46 = vld [vmem:[%s8523_s12 + $0x254] sm:$0xf0]  ;;  %v5279_v54 = vld [vmem:[%s8523_s12 + $0xc0] sm:$0xf] }
 0x885   :  { %2928 = vmatpush.bf16.msrb.mxu3 %v4978_v16  ;;  %2952 = vmatpush.bf16.msra.mxu2 %v5078_v17  ;;  %v5191_v16 = vld [vmem:[%s8523_s12 + $0x10] sm:$0xf]  ;;  %v5902_v17 = vld [vmem:[%s8523_s12 + $0x14] sm:$0xf0] }
 0x886   :  { %3576 = vmatpush.bf16.msra.mxu0 %v5360_v23  ;;  %3552 = vmatpush.bf16.msrb.mxu1 %v5200_v9  ;;  %v5192_v18 = vor.u32 %v5902_v17, %v5191_v16  ;;  %v5312_v23 = vor.u32 %v5932_v63, %v5311_v49  ;;  %v5972_v9 = vld [vmem:[%s8523_s12 + $0x244] sm:$0xf0]  ;;  %v5399_v16 = vld [vmem:[%s8523_s12 + $0x1b0] sm:$0xf] }
 0x887   :  { %v5463_v63 = vld [vmem:[%s8523_s12 + $0x230] sm:$0xf] }
 0x888   :  { %v5464_v22 = vor.u32 %v5970_v57, %v5463_v63  ;;  %v5519_v57 = vld [vmem:[%s8523_s12 + $0x2a0] sm:$0xf] }
 0x889   :  { %2929 = vmatpush.bf16.msrb.mxu3 %v4954_v26  ;;  %2953 = vmatpush.bf16.msra.mxu2 %v5054_v27  ;;  %v5183_v26 = vld [vmem:[%s8523_s12] sm:$0xf]  ;;  %v5244_v27 = vor.u32 %v5913_v12, %v5241_v25 }
 0x88a   :  { %3577 = vmatpush.bf16.msra.mxu0 %v5352_v34  ;;  %3553 = vmatpush.bf16.msrb.mxu1 %v5192_v18  ;;  %v5184_v32 = vor.u32 %v5900_v28, %v5183_v26  ;;  %v5928_v34 = vld [vmem:[%s8523_s12 + $0xe4] sm:$0xf0]  ;;  %v5954_v18 = vld [vmem:[%s8523_s12 + $0x1b4] sm:$0xf0]  ;;  %v5391_v12 = vld [vmem:[%s8523_s12 + $0x1a0] sm:$0xf] }
 0x88b   :  { %v5296_v8 = vor.u32 %v5928_v34, %v5295_v58  ;;  %v5400_v49 = vor.u32 %v5954_v18, %v5399_v16  ;;  %v5952_v26 = vld [vmem:[%s8523_s12 + $0x1a4] sm:$0xf0]  ;;  %v5201_v28 = vld [vmem:[%s8523_s12 + $0x28] sm:$0xf0]  ;;  %v5255_v34 = vld [vmem:[%s8523_s12 + $0x90] sm:$0xf] }
 0x88c   :  { %v5392_v29 = vor.u32 %v5952_v26, %v5391_v12  ;;  %v5256_v36 = vor.u32 %v5918_v35, %v5255_v34  ;;  %v5527_v16 = vld [vmem:[%s8523_s12 + $0x2b0] sm:$0xf]  ;;  %v5982_v35 = vld [vmem:[%s8523_s12 + $0x294] sm:$0xf0] }
 0x88d   :  { %2930 = vmatpush.bf16.msrb.mxu3 %v4930_v51  ;;  %2954 = vmatpush.bf16.msra.mxu2 %v5030_v41  ;;  %v5911_v51 = vld [vmem:[%s8523_s12 + $0x64] sm:$0xf]  ;;  %v5233_v41 = vld [vmem:[%s8523_s12 + $0x68] sm:$0xf0]  ;;  %v5511_v34 = vld [vmem:[%s8523_s12 + $0x290] sm:$0xf] }
 0x88e   :  { %3578 = vmatpush.bf16.msra.mxu0 %v5344_v47  ;;  %3554 = vmatpush.bf16.msrb.mxu1 %v5184_v32  ;;  %v5236_v55 = vor.u32 %v5911_v51, %v5233_v41  ;;  %v5488_v47 = vor.u32 %v5976_v48, %v5487_v45  ;;  %v5455_v32 = vld [vmem:[%s8523_s12 + $0x220] sm:$0xf]  ;;  %v5950_v51 = vld [vmem:[%s8523_s12 + $0x194] sm:$0xf0]  ;;  %v5901_v41 = vld [vmem:[%s8523_s12 + $0x14] sm:$0xf] }
 0x88f   :  { %5178 = vmatmul.msk.bf16.vlgmr.msrb.gmra.mxu2 %vm947_vm1, %v7723_v14  ;;  %v5447_v48 = vld [vmem:[%s8523_s12 + $0x210] sm:$0xf] }
 0x890   :  { %2931 = vmatmul.bf16.vlgmr.msrb.gmra.mxu3 %v7719_v6  ;;  %5180 = vmatmul.msk.bf16.vlgmr.msrb.gmra.mxu0 %vm947_vm1, %v7723_v14  ;;  %v5327_v14 = vld [vmem:[%s8523_s12 + $0x120] sm:$0xf] }
 0x891   :  { %2955 = vmatpush.bf16.msra.mxu2 %v5006_v42  ;;  %v5328_v59 = vor.u32 %v5936_v5, %v5327_v14  ;;  %3561 = vmatpush.bf16.msra.mxu3 %v5304_v50  ;;  %v5415_v42 = vld [vmem:[%s8523_s12 + $0x1d0] sm:$0xf]  ;;  %v5907_v14 = vld [vmem:[%s8523_s12 + $0x44] sm:$0xf]  ;;  %v5217_v5 = vld [vmem:[%s8523_s12 + $0x48] sm:$0xf0]  ;;  %v5212_v50 = vor.u32 %v5905_v20, %v5209_v21 }
 0x892   :  { %3579 = vmatpush.bf16.msra.mxu0 %v5336_v37  ;;  %3603 = vmatpush.bf16.msra.mxu1 %v5496_v38  ;;  %v5416_v19 = vor.u32 %v5958_v39, %v5415_v42  ;;  %v5228_v37 = vor.u32 %v5909_v33, %v5225_v2  ;;  %v5220_v7 = vor.u32 %v5907_v14, %v5217_v5  ;;  %v5968_v38 = vld [vmem:[%s8523_s12 + $0x224] sm:$0xf0]  ;;  %v5899_v2 = vld [vmem:[%s8523_s12 + $0x4] sm:$0xf] }
 0x893   :  { %v5456_v58 = vor.u32 %v5968_v38, %v5455_v32  ;;  %v5916_v42 = vld [vmem:[%s8523_s12 + $0x84] sm:$0xf0] }
 0x894   :  { %v5248_v39 = vor.u32 %v5916_v42, %v5247_v52  ;;  %v5948_v33 = vld [vmem:[%s8523_s12 + $0x184] sm:$0xf0]  ;;  %v5425_v52 = vld [vmem:[%s8523_s12 + $0x1e8] sm:$0xf0]  ;;  %v5503_v42 = vld [vmem:[%s8523_s12 + $0x280] sm:$0xf] }
 0x895   :  { %2956 = vmatpush.bf16.msra.mxu2 %v4982_v53  ;;  %3562 = vmatpush.bf16.msra.mxu3 %v5296_v8  ;;  %v5479_v53 = vld [vmem:[%s8523_s12 + $0x250] sm:$0xf] }
 0x896   :  { %3580 = vmatpush.bf16.msra.mxu0 %v5328_v59  ;;  %3604 = vmatpush.bf16.msra.mxu1 %v5488_v47  ;;  %v5480_v60 = vor.u32 %v5974_v46, %v5479_v53  ;;  %v5383_v8 = vld [vmem:[%s8523_s12 + $0x190] sm:$0xf]  ;;  %v5966_v47 = vld [vmem:[%s8523_s12 + $0x214] sm:$0xf0]  ;;  %v5929_v46 = vld [vmem:[%s8523_s12 + $0xf4] sm:$0xf] }
 0x897   :  { %v5448_v56 = vor.u32 %v5966_v47, %v5447_v48 }
 0x899   :  { %2957 = vmatpush.bf16.msra.mxu2 %v4958_v0  ;;  %3563 = vmatpush.bf16.msra.mxu3 %v5288_v43  ;;  %v5924_v0 = vld [vmem:[%s8523_s12 + $0xc4] sm:$0xf0]  ;;  %v5375_v43 = vld [vmem:[%s8523_s12 + $0x180] sm:$0xf] }
 0x89a   :  { %v5280_v4 = vor.u32 %v5924_v0, %v5279_v54  ;;  %3605 = vmatpush.bf16.msra.mxu1 %v5480_v60  ;;  %v5305_v60 = vld [vmem:[%s8523_s12 + $0xf8] sm:$0xf0]  ;;  %v5439_v0 = vld [vmem:[%s8523_s12 + $0x200] sm:$0xf] }
 0x89b   :  { %v5308_v54 = vor.u32 %v5929_v46, %v5305_v60  ;;  %v5265_v60 = vld [vmem:[%s8523_s12 + $0xa8] sm:$0xf0] }
 0x89d   :  { %2958 = vmatpush.bf16.msra.mxu2 %v4934_v3  ;;  %v5956_v3 = vld [vmem:[%s8523_s12 + $0x1c4] sm:$0xf0]  ;;  %3564 = vmatpush.bf16.msra.mxu3 %v5280_v4  ;;  %v8042_v4 = vld [vmem:[%s8522_s11] sm:$0x3f] }
 0x89e   :  { %v5408_v59 = vor.u32 %v5956_v3, %v5407_v1  ;;  %v5964_v1 = vld [vmem:[%s8523_s12 + $0x204] sm:$0xf0] }
 0x89f   :  { %v5440_v5 = vor.u32 %v5964_v1, %v5439_v0  ;;  %v5417_v0 = vld [vmem:[%s8523_s12 + $0x1d8] sm:$0xf0] }
 0x8a0   :  { %2959 = vmatmul.bf16.vlgmr.msra.gmra.mxu2 %v7719_v6  ;;  %v5319_v6 = vld [vmem:[%s8523_s12 + $0x110] sm:$0xf] }
 0x8a1   :  { %v5320_v11 = vor.u32 %v5934_v13, %v5319_v6  ;;  %3589 = vmatpush.bf16.msrb.mxu2 %v5432_v10  ;;  %v5472_v6 = vor.u32 %v5972_v9, %v5471_v61  ;;  %v5271_v13 = vld [vmem:[%s8523_s12 + $0xb0] sm:$0xf]  ;;  %v5920_v10 = vld [vmem:[%s8523_s12 + $0xa4] sm:$0xf0]  ;;  %v2433_v61 = vperm.slane %v8042_v4, 0 }
 0x8a3   :  { %3581 = vmatpush.bf16.msra.mxu0 %v5320_v11  ;;  %v5922_v11 = vld [vmem:[%s8523_s12 + $0xb4] sm:$0xf0]  ;;  %3606 = vmatpush.bf16.msra.mxu1 %v5472_v6  ;;  %v5927_v6 = vld [vmem:[%s8523_s12 + $0xe4] sm:$0xf] }
 0x8a4   :  { %v5272_v17 = vor.u32 %v5922_v11, %v5271_v13  ;;  %v5297_v13 = vld [vmem:[%s8523_s12 + $0xe8] sm:$0xf0] }
 0x8a5   :  { %3590 = vmatpush.bf16.msrb.mxu2 %v5424_v44  ;;  %v5193_v44 = vld [vmem:[%s8523_s12 + $0x18] sm:$0xf0]  ;;  %v5300_v11 = vor.u32 %v5927_v6, %v5297_v13  ;;  %v5955_v13 = vld [vmem:[%s8523_s12 + $0x1c4] sm:$0xf] }
 0x8a6   :  { %3565 = vmatpush.bf16.msra.mxu3 %v5272_v17  ;;  %v5196_v45 = vor.u32 %v5901_v41, %v5193_v44  ;;  %v5986_v17 = vld [vmem:[%s8523_s12 + $0x2b4] sm:$0xf0]  ;;  %v5921_v41 = vld [vmem:[%s8523_s12 + $0xb4] sm:$0xf]  ;;  %v5273_v44 = vld [vmem:[%s8523_s12 + $0xb8] sm:$0xf0] }
 0x8a7   :  { %3582 = vmatpush.bf16.msra.mxu0 %v5312_v23  ;;  %v5263_v23 = vld [vmem:[%s8523_s12 + $0xa0] sm:$0xf]  ;;  %3607 = vmatpush.bf16.msra.mxu1 %v5464_v22  ;;  %v5528_v18 = vor.u32 %v5986_v17, %v5527_v16  ;;  %v5984_v22 = vld [vmem:[%s8523_s12 + $0x2a4] sm:$0xf0]  ;;  %v5276_v48 = vor.u32 %v5921_v41, %v5273_v44  ;;  %v5943_v44 = vld [vmem:[%s8523_s12 + $0x164] sm:$0xf] }
 0x8a8   :  { %v5264_v25 = vor.u32 %v5920_v10, %v5263_v23  ;;  %v5520_v12 = vor.u32 %v5984_v22, %v5519_v57  ;;  %v5497_v57 = vld [vmem:[%s8523_s12 + $0x278] sm:$0xf0]  ;;  %v5915_v22 = vld [vmem:[%s8523_s12 + $0x84] sm:$0xf] }
 0x8a9   :  { %3591 = vmatpush.bf16.msrb.mxu2 %v5416_v19  ;;  %v5185_v19 = vld [vmem:[%s8523_s12 + $0x8] sm:$0xf0] }
 0x8aa   :  { %3566 = vmatpush.bf16.msra.mxu3 %v5264_v25  ;;  %v5188_v53 = vor.u32 %v5899_v2, %v5185_v19  ;;  %v2435_v19 = vperm.slane %v8042_v4, 2 }
 0x8ab   :  { %3631 = vmatpush.bf16.msrb.mxu0 %v5244_v27  ;;  %v5903_v27 = vld [vmem:[%s8523_s12 + $0x24] sm:$0xf]  ;;  %3608 = vmatpush.bf16.msra.mxu1 %v5456_v58  ;;  %v5433_v58 = vld [vmem:[%s8523_s12 + $0x1f8] sm:$0xf0] }
 0x8ac   :  { %v5204_v31 = vor.u32 %v5903_v27, %v5201_v28  ;;  %v5923_v27 = vld [vmem:[%s8523_s12 + $0xc4] sm:$0xf]  ;;  %v5281_v28 = vld [vmem:[%s8523_s12 + $0xc8] sm:$0xf0] }
 0x8ad   :  { %3592 = vmatpush.bf16.msrb.mxu2 %v5408_v59  ;;  %v5535_v59 = vld [vmem:[%s8523_s12 + $0x2c0] sm:$0xf]  ;;  %v5284_v32 = vor.u32 %v5923_v27, %v5281_v28 }
 0x8ae   :  { %3567 = vmatpush.bf16.msra.mxu3 %v5256_v36 }
 0x8af   :  { %3632 = vmatpush.bf16.msrb.mxu0 %v5236_v55  ;;  %v5384_v55 = vor.u32 %v5950_v51, %v5383_v8  ;;  %3609 = vmatpush.bf16.msra.mxu1 %v5448_v56  ;;  %v5512_v8 = vor.u32 %v5982_v35, %v5511_v34 }
 0x8b1   :  { %3593 = vmatpush.bf16.msrb.mxu2 %v5400_v49  ;;  %v5925_v49 = vld [vmem:[%s8523_s12 + $0xd4] sm:$0xf] }
 0x8b2   :  { %3568 = vmatpush.bf16.msra.mxu3 %v5248_v39 }
 0x8b3   :  { %3633 = vmatpush.bf16.msrb.mxu0 %v5228_v37  ;;  %v5376_v37 = vor.u32 %v5948_v33, %v5375_v43  ;;  %3610 = vmatpush.bf16.msra.mxu1 %v5440_v5  ;;  %v5980_v43 = vld [vmem:[%s8523_s12 + $0x284] sm:$0xf0] }
 0x8b4   :  { %v5504_v2 = vor.u32 %v5980_v43, %v5503_v42  ;;  %v2436_v43 = vperm.slane %v8042_v4, 3 }
 0x8b5   :  { %3594 = vmatpush.bf16.msrb.mxu2 %v5392_v29 }
 0x8b7   :  { %3634 = vmatpush.bf16.msrb.mxu0 %v5220_v7  ;;  %v5988_v7 = vld [vmem:[%s8523_s12 + $0x2c4] sm:$0xf0] }
 0x8b8   :  { %v5536_v9 = vor.u32 %v5988_v7, %v5535_v59  ;;  %v5917_v59 = vld [vmem:[%s8523_s12 + $0x94] sm:$0xf] }
 0x8b9   :  { %3595 = vmatpush.bf16.msrb.mxu2 %v5384_v55 }
 0x8ba   :  { %3620 = vmatpush.bf16.msrb.mxu3 %v5536_v9 }
 0x8bb   :  { %3635 = vmatpush.bf16.msrb.mxu0 %v5212_v50  ;;  %v5289_v50 = vld [vmem:[%s8523_s12 + $0xd8] sm:$0xf0] }
 0x8bc   :  { %v5292_v63 = vor.u32 %v5925_v49, %v5289_v50 }
 0x8bd   :  { %3596 = vmatpush.bf16.msrb.mxu2 %v5376_v37  ;;  %v2434_v37 = vperm.slane %v8042_v4, 1 }
 0x8be   :  { %3621 = vmatpush.bf16.msrb.mxu3 %v5528_v18 }
 0x8bf   :  { %3636 = vmatpush.bf16.msrb.mxu0 %v5204_v31  ;;  %v5961_v31 = vld [vmem:[%s8523_s12 + $0x1f4] sm:$0xf] }
 0x8c0   :  { %v5436_v55 = vor.u32 %v5961_v31, %v5433_v58  ;;  %v5953_v31 = vld [vmem:[%s8523_s12 + $0x1b4] sm:$0xf] }
 0x8c1   :  { %3645 = vmatpush.bf16.msra.mxu2 %v5308_v54  ;;  %v5957_v54 = vld [vmem:[%s8523_s12 + $0x1d4] sm:$0xf] }
 0x8c2   :  { %3622 = vmatpush.bf16.msrb.mxu3 %v5520_v12  ;;  %v5420_v7 = vor.u32 %v5957_v54, %v5417_v0  ;;  %v5353_v54 = vld [vmem:[%s8523_s12 + $0x158] sm:$0xf0]  ;;  %v5949_v0 = vld [vmem:[%s8523_s12 + $0x194] sm:$0xf] }
 0x8c3   :  { %3637 = vmatpush.bf16.msrb.mxu0 %v5196_v45  ;;  %v5959_v45 = vld [vmem:[%s8523_s12 + $0x1e4] sm:$0xf] }
 0x8c4   :  { %v5428_v46 = vor.u32 %v5959_v45, %v5425_v52  ;;  %v5361_v45 = vld [vmem:[%s8523_s12 + $0x168] sm:$0xf0] }
 0x8c5   :  { %3646 = vmatpush.bf16.msra.mxu2 %v5300_v11  ;;  %v5409_v11 = vld [vmem:[%s8523_s12 + $0x1c8] sm:$0xf0] }
 0x8c6   :  { %3623 = vmatpush.bf16.msrb.mxu3 %v5512_v8  ;;  %v5412_v12 = vor.u32 %v5955_v13, %v5409_v11  ;;  %v5975_v8 = vld [vmem:[%s8523_s12 + $0x264] sm:$0xf]  ;;  %v5345_v11 = vld [vmem:[%s8523_s12 + $0x148] sm:$0xf0] }
 0x8c7   :  { %3638 = vmatpush.bf16.msrb.mxu0 %v5188_v53  ;;  %v5919_v53 = vld [vmem:[%s8523_s12 + $0xa4] sm:$0xf] }
 0x8c8   :  { %v5268_v1 = vor.u32 %v5919_v53, %v5265_v60  ;;  %v5364_v53 = vor.u32 %v5943_v44, %v5361_v45  ;;  %v5941_v60 = vld [vmem:[%s8523_s12 + $0x154] sm:$0xf]  ;;  %v5939_v13 = vld [vmem:[%s8523_s12 + $0x144] sm:$0xf]  ;;  %v5529_v45 = vld [vmem:[%s8523_s12 + $0x2b8] sm:$0xf0] }
 0x8c9   :  { %3647 = vmatpush.bf16.msra.mxu2 %v5292_v63  ;;  %v5985_v44 = vld [vmem:[%s8523_s12 + $0x2b4] sm:$0xf] }
 0x8ca   :  { %3624 = vmatpush.bf16.msrb.mxu3 %v5504_v2  ;;  %v5973_v2 = vld [vmem:[%s8523_s12 + $0x254] sm:$0xf] }
 0x8cd   :  { %3648 = vmatpush.bf16.msra.mxu2 %v5284_v32  ;;  %v5401_v32 = vld [vmem:[%s8523_s12 + $0x1b8] sm:$0xf0] }
 0x8ce   :  { %v5404_v41 = vor.u32 %v5953_v31, %v5401_v32  ;;  %v5937_v32 = vld [vmem:[%s8523_s12 + $0x134] sm:$0xf] }
 0x8d1   :  { %3649 = vmatpush.bf16.msra.mxu2 %v5276_v48  ;;  %v5951_v48 = vld [vmem:[%s8523_s12 + $0x1a4] sm:$0xf] }
 0x8d5   :  { %3650 = vmatpush.bf16.msra.mxu2 %v5268_v1  ;;  %v5385_v1 = vld [vmem:[%s8523_s12 + $0x198] sm:$0xf0] }
 0x8ed   :  { %v8063_v20 = vpop.f32.mrf.mxu0  ;;  %v2876_v29 = vpop.f32.mrf.mxu1 }
 0x8f2   :  { %v2820_v3 = vpop.f32.mrf.mxu2  ;;  %v2834_v14 = vpop.f32.mrf.mxu3 }
 0x8f3   :  { %v2821_v21 = vadd.f32 %v2820_v3, %v2433_v61 }
 0x8f5   :  { %v2835_v25 = vadd.f32 %v2834_v14, %v2821_v21  ;;  %v2864_v47 = vpop.f32.mrf.mxu0  ;;  %v2878_v3 = vpop.f32.mrf.mxu1  ;;  %v2877_v14 = vadd.f32 %v2876_v29, %v2435_v19  ;;  %v5977_v21 = vld [vmem:[%s8523_s12 + $0x274] sm:$0xf] }
 0x8f6   :  { %v2879_v9 = vadd.f32 %v2878_v3, %v2435_v19  ;;  %v5481_v19 = vld [vmem:[%s8523_s12 + $0x258] sm:$0xf0] }
 0x8f7   :  { %v2979_v36 = vmax.f32 %v2835_v25, 0.0  ;;  %v5369_v25 = vld [vmem:[%s8523_s12 + $0x178] sm:$0xf0] }
 0x8fa   :  { %v2822_v23 = vpop.f32.mrf.mxu2  ;;  %v2836_v10 = vpop.f32.mrf.mxu3 }
 0x8fb   :  { %v2823_v26 = vadd.f32 %v2822_v23, %v2433_v61  ;;  %v5257_v61 = vld [vmem:[%s8523_s12 + $0x98] sm:$0xf0]  ;;  %v5249_v23 = vld [vmem:[%s8523_s12 + $0x88] sm:$0xf0] }
 0x8fc   :  { %v5260_v16 = vor.u32 %v5917_v59, %v5257_v61  ;;  %v5971_v59 = vld [vmem:[%s8523_s12 + $0x244] sm:$0xf] }
 0x8fd   :  { %v2837_v38 = vadd.f32 %v2836_v10, %v2823_v26  ;;  %v2904_v10 = vpop.f32.mrf.mxu0  ;;  %v5252_v26 = vor.u32 %v5915_v22, %v5249_v23  ;;  %v5465_v23 = vld [vmem:[%s8523_s12 + $0x238] sm:$0xf0] }
 0x8fe   :  { %3651 = vmatpush.bf16.msra.mxu2 %v5260_v16 }
 0x8ff   :  { %v2985_v51 = vmax.f32 %v2837_v38, 0.0  ;;  %v5500_v38 = vor.u32 %v5977_v21, %v5497_v57  ;;  %v5377_v21 = vld [vmem:[%s8523_s12 + $0x188] sm:$0xf0] }
 0x901   :  { %v8104_v56 = vpack.c.bf16 %v2985_v51, %v2979_v36  ;;  %v5489_v36 = vld [vmem:[%s8523_s12 + $0x268] sm:$0xf0] }
 0x902   :  { %v2848_v39 = vpop.f32.mrf.mxu3  ;;  %v2890_v33 = vpop.f32.mrf.mxu2  ;;  %3652 = vmatpush.bf16.msra.mxu2 %v5252_v26  ;;  %v5492_v42 = vor.u32 %v5975_v8, %v5489_v36  ;;  %v5967_v8 = vld [vmem:[%s8523_s12 + $0x224] sm:$0xf] }
 0x903   :  { %3555 = vmatmul.bf16.vlgmr.msrb.gmra.mxu1 %v8104_v56  ;;  %v2849_v5 = vadd.f32 %v2848_v39, %v2434_v37  ;;  %v2891_v6 = vadd.f32 %v2890_v33, %v2877_v14  ;;  %v2946_v39 = vpop.f32.mrf.mxu1  ;;  %v5484_v14 = vor.u32 %v5973_v2, %v5481_v19  ;;  %v5965_v2 = vld [vmem:[%s8523_s12 + $0x214] sm:$0xf]  ;;  %v5532_v19 = vor.u32 %v5985_v44, %v5529_v45 }
 0x904   :  { %3673 = vmatpush.bf16.msrb.mxu1 %v5436_v55 }
 0x905   :  { %v2863_v49 = vadd.f32 %v8063_v20, %v2849_v5  ;;  %v5945_v20 = vld [vmem:[%s8523_s12 + $0x174] sm:$0xf]  ;;  %v2981_v27 = vmax.f32 %v2891_v6, 0.0  ;;  %v2906_v3 = vpop.f32.mrf.mxu0  ;;  %v2905_v5 = vadd.f32 %v2904_v10, %v2436_v43  ;;  %v5388_v6 = vor.u32 %v5949_v0, %v5385_v1  ;;  %v5987_v10 = vld [vmem:[%s8523_s12 + $0x2c4] sm:$0xf] }
 0x906   :  { %v5372_v51 = vor.u32 %v5945_v20, %v5369_v25  ;;  %v2907_v16 = vadd.f32 %v2906_v3, %v2436_v43  ;;  %v5348_v20 = vor.u32 %v5939_v13, %v5345_v11  ;;  %v5329_v43 = vld [vmem:[%s8523_s12 + $0x128] sm:$0xf0]  ;;  %v5933_v1 = vld [vmem:[%s8523_s12 + $0x114] sm:$0xf]  ;;  %v5321_v3 = vld [vmem:[%s8523_s12 + $0x118] sm:$0xf0] }
 0x907   :  { %v2980_v58 = vmax.f32 %v2863_v49, 0.0  ;;  %v5931_v13 = vld [vmem:[%s8523_s12 + $0x104] sm:$0xf]  ;;  %v5313_v11 = vld [vmem:[%s8523_s12 + $0x108] sm:$0xf0] }
 0x908   :  { %3674 = vmatpush.bf16.msrb.mxu1 %v5428_v46 }
 0x90a   :  { %v2850_v17 = vpop.f32.mrf.mxu3  ;;  %v2892_v18 = vpop.f32.mrf.mxu2 }
 0x90b   :  { %v2851_v50 = vadd.f32 %v2850_v17, %v2434_v37  ;;  %v2893_v63 = vadd.f32 %v2892_v18, %v2879_v9  ;;  %v2437_v37 = vperm.slane %v8042_v4, 4  ;;  %v5356_v9 = vor.u32 %v5941_v60, %v5353_v54  ;;  %v5947_v18 = vld [vmem:[%s8523_s12 + $0x184] sm:$0xf]  ;;  %v5521_v60 = vld [vmem:[%s8523_s12 + $0x2a8] sm:$0xf0] }
 0x90c   :  { %3675 = vmatpush.bf16.msrb.mxu1 %v5420_v7  ;;  %v5473_v7 = vld [vmem:[%s8523_s12 + $0x248] sm:$0xf0]  ;;  %v2438_v54 = vperm.slane %v8042_v4, 5 }
 0x90d   :  { %v2865_v28 = vadd.f32 %v2864_v47, %v2851_v50  ;;  %v2987_v29 = vmax.f32 %v2893_v63, 0.0  ;;  %v5393_v47 = vld [vmem:[%s8523_s12 + $0x1a8] sm:$0xf0]  ;;  %v5476_v50 = vor.u32 %v5971_v59, %v5473_v7  ;;  %v5969_v63 = vld [vmem:[%s8523_s12 + $0x234] sm:$0xf] }
 0x90e   :  { %v5396_v46 = vor.u32 %v5951_v48, %v5393_v47  ;;  %v5441_v4 = vld [vmem:[%s8523_s12 + $0x208] sm:$0xf0]  ;;  %v5981_v7 = vld [vmem:[%s8523_s12 + $0x294] sm:$0xf] }
 0x90f   :  { %v2986_v34 = vmax.f32 %v2865_v28, 0.0  ;;  %v8167_v35 = vpack.c.bf16 %v2987_v29, %v2981_v27  ;;  %v5380_v27 = vor.u32 %v5947_v18, %v5377_v21  ;;  %v2948_v28 = vpop.f32.mrf.mxu1  ;;  %v5979_v21 = vld [vmem:[%s8523_s12 + $0x284] sm:$0xf] }
 0x910   :  { %3676 = vmatpush.bf16.msrb.mxu1 %v5412_v12  ;;  %v5537_v12 = vld [vmem:[%s8523_s12 + $0x2c8] sm:$0xf0] }
 0x911   :  { %v8178_v55 = vpack.c.bf16 %v2986_v34, %v2980_v58  ;;  %3583 = vmatmul.bf16.vlgmr.msra.gmra.mxu0 %v8167_v35  ;;  %v5468_v34 = vor.u32 %v5969_v63, %v5465_v23  ;;  %v5540_v36 = vor.u32 %v5987_v10, %v5537_v12 }
 0x912   :  { %v2918_v52 = vpop.f32.mrf.mxu2  ;;  %3687 = vmatpush.bf16.msra.mxu0 %v5500_v38  ;;  %v5337_v38 = vld [vmem:[%s8523_s12 + $0x138] sm:$0xf0] }
 0x913   :  { %v2932_v33 = vpop.f32.mrf.mxu3  ;;  %3569 = vmatmul.bf16.vlgmr.msra.gmra.mxu3 %v8178_v55  ;;  %v2919_v17 = vadd.f32 %v2918_v52, %v2905_v5  ;;  %v5340_v52 = vor.u32 %v5937_v32, %v5337_v38  ;;  %v5963_v5 = vld [vmem:[%s8523_s12 + $0x204] sm:$0xf] }
 0x914   :  { %3659 = vmatpush.bf16.msra.mxu3 %v5372_v51  ;;  %3677 = vmatpush.bf16.msrb.mxu1 %v5404_v41  ;;  %v2933_v61 = vadd.f32 %v2932_v33, %v2437_v37  ;;  %v5457_v41 = vld [vmem:[%s8523_s12 + $0x228] sm:$0xf0] }
 0x915   :  { %v2982_v29 = vmax.f32 %v2919_v17, 0.0  ;;  %v5460_v33 = vor.u32 %v5967_v8, %v5457_v41  ;;  %v3087_v41 = vld [vmem:[%s8524_s13] sm:$0x3] }
 0x916   :  { %3688 = vmatpush.bf16.msra.mxu0 %v5492_v42  ;;  %v2947_v25 = vadd.f32 %v2946_v39, %v2933_v61  ;;  %v5935_v42 = vld [vmem:[%s8523_s12 + $0x124] sm:$0xf]  ;;  %v5513_v61 = vld [vmem:[%s8523_s12 + $0x298] sm:$0xf0] }
 0x917   :  { %v5332_v0 = vor.u32 %v5935_v42, %v5329_v43  ;;  %v5516_v17 = vor.u32 %v5981_v7, %v5513_v61 }
 0x918   :  { %3660 = vmatpush.bf16.msra.mxu3 %v5364_v53  ;;  %3678 = vmatpush.bf16.msrb.mxu1 %v5396_v46  ;;  %v2983_v48 = vmax.f32 %v2947_v25, 0.0  ;;  %v5983_v46 = vld [vmem:[%s8523_s12 + $0x2a4] sm:$0xf] }
 0x919   :  { %v5524_v59 = vor.u32 %v5983_v46, %v5521_v60 }
 0x91a   :  { %v2920_v49 = vpop.f32.mrf.mxu2  ;;  %3689 = vmatpush.bf16.msra.mxu0 %v5484_v14 }
 0x91b   :  { %v2921_v57 = vadd.f32 %v2920_v49, %v2907_v16  ;;  %v2934_v22 = vpop.f32.mrf.mxu3  ;;  %v5444_v16 = vor.u32 %v5963_v5, %v5441_v4  ;;  %v5505_v49 = vld [vmem:[%s8523_s12 + $0x288] sm:$0xf0] }
 0x91c   :  { %v2935_v26 = vadd.f32 %v2934_v22, %v2437_v37  ;;  %3661 = vmatpush.bf16.msra.mxu3 %v5356_v9  ;;  %3679 = vmatpush.bf16.msrb.mxu1 %v5388_v6  ;;  %v2974_v37 = vpop.f32.mrf.mxu0  ;;  %v5324_v6 = vor.u32 %v5933_v1, %v5321_v3  ;;  %v5508_v10 = vor.u32 %v5979_v21, %v5505_v49 }
 0x91d   :  { %v2988_v31 = vmax.f32 %v2921_v57, 0.0  ;;  %v5316_v57 = vor.u32 %v5931_v13, %v5313_v11 }
 0x91e   :  { %v2949_v58 = vadd.f32 %v2948_v28, %v2935_v26  ;;  %3690 = vmatpush.bf16.msra.mxu0 %v5476_v50 }
 0x91f   :  { %v8250_v51 = vpack.c.bf16 %v2988_v31, %v2982_v29 }
 0x920   :  { %v2989_v47 = vmax.f32 %v2949_v58, 0.0  ;;  %3662 = vmatpush.bf16.msra.mxu3 %v5348_v20  ;;  %3680 = vmatpush.bf16.msrb.mxu1 %v5380_v27 }
 0x921   :  { %3597 = vmatmul.bf16.vlgmr.msrb.gmra.mxu2 %v8250_v51  ;;  %3639 = vmatmul.bf16.vlgmr.msrb.gmra.mxu0 %v8104_v56  ;;  %v5449_v56 = vld [vmem:[%s8523_s12 + $0x218] sm:$0xf0] }
 0x922   :  { %v2995_v39 = vpack.c.bf16 %v2989_v47, %v2983_v48  ;;  %3691 = vmatpush.bf16.msra.mxu0 %v5468_v34  ;;  %3704 = vmatpush.bf16.msrb.mxu2 %v5540_v36  ;;  %v5452_v14 = vor.u32 %v5965_v2, %v5449_v56  ;;  %v3090_v47 = vperm.slane %v3087_v41, 1 }
 0x923   :  { %v2960_v53 = vpop.f32.mrf.mxu2 }
 0x924   :  { %3611 = vmatmul.bf16.vlgmr.msra.gmra.mxu1 %v2995_v39  ;;  %3663 = vmatpush.bf16.msra.mxu3 %v5340_v52  ;;  %v2961_v9 = vadd.f32 %v2960_v53, %v2438_v54  ;;  %v2976_v22 = vpop.f32.mrf.mxu0 }
 0x926   :  { %3692 = vmatpush.bf16.msra.mxu0 %v5460_v33  ;;  %3705 = vmatpush.bf16.msrb.mxu2 %v5532_v19  ;;  %v2975_v50 = vadd.f32 %v2974_v37, %v2961_v9 }
 0x928   :  { %3664 = vmatpush.bf16.msra.mxu3 %v5332_v0  ;;  %v2984_v12 = vmax.f32 %v2975_v50, 0.0 }
 0x92a   :  { %3693 = vmatpush.bf16.msra.mxu0 %v5452_v14  ;;  %3706 = vmatpush.bf16.msrb.mxu2 %v5524_v59 }
 0x92b   :  { %v2962_v18 = vpop.f32.mrf.mxu2 }
 0x92c   :  { %v2963_v63 = vadd.f32 %v2962_v18, %v2438_v54  ;;  %3665 = vmatpush.bf16.msra.mxu3 %v5324_v6 }
 0x92e   :  { %v2977_v23 = vadd.f32 %v2976_v22, %v2963_v63  ;;  %3694 = vmatpush.bf16.msra.mxu0 %v5444_v16  ;;  %3707 = vmatpush.bf16.msrb.mxu2 %v5516_v17 }
 0x930   :  { %v2990_v20 = vmax.f32 %v2977_v23, 0.0  ;;  %3666 = vmatpush.bf16.msra.mxu3 %v5316_v57 }
 0x931   :  { %3653 = vmatmul.bf16.vlgmr.msra.gmra.mxu2 %v8178_v55  ;;  %3695 = vmatmul.bf16.vlgmr.msra.gmra.mxu0 %v2995_v39 }
 0x932   :  { %v2996_v25 = vpack.c.bf16 %v2990_v20, %v2984_v12  ;;  %3708 = vmatpush.bf16.msrb.mxu2 %v5508_v10 }
 0x934   :  { %5541 = vmatmul.msk.bf16.vlgmr.msrb.gmra.mxu3 %vm3543_vm13, %v2996_v25  ;;  %3681 = vmatmul.bf16.vlgmr.msrb.gmra.mxu1 %v8250_v51  ;;  %v3089_v51 = vperm.slane %v3087_v41, 0  ;;  %v5601_v41 = vld [vmem:[%s8525_s14 + $0x70] sm:$0xf] }
 0x941   :  { %5542 = vmatmul.msk.bf16.vlgmr.msrb.gmra.mxu2 %vm3543_vm13, %v2996_v25 }
 0x944   :  { %3667 = vmatmul.bf16.vlgmr.msra.gmra.mxu3 %v8167_v35 }
 0x980   :  { %v3556_v26 = vpop.f32.mrf.mxu1 }
 0x981   :  { %v3557_v45 = vadd.f32 %v3556_v26, %v3089_v51 }
 0x988   :  { %v3558_v31 = vpop.f32.mrf.mxu1 }
 0x989   :  { %v3559_v2 = vadd.f32 %v3558_v31, %v3089_v51  ;;  %v6004_v51 = vld [vmem:[%s8525_s14 + $0x74] sm:$0xf0] }
 0x98e   :  { %v3584_v27 = vpop.f32.mrf.mxu0 }
 0x996   :  { %v3570_v29 = vpop.f32.mrf.mxu3  ;;  %v3586_v32 = vpop.f32.mrf.mxu0 }
 0x997   :  { %v3571_v52 = vadd.f32 %v3570_v29, %v3557_v45  ;;  %v5602_v45 = vor.u32 %v6004_v51, %v5601_v41  ;;  %v5619_v41 = vld [vmem:[%s8525_s14 + $0x98] sm:$0xf0] }
 0x999   :  { %v3585_v39 = vadd.f32 %v3584_v27, %v3571_v52  ;;  %3948 = vmatpush.bf16.msrb.mxu3 %v5602_v45  ;;  %v6002_v52 = vld [vmem:[%s8525_s14 + $0x64] sm:$0xf0] }
 0x99e   :  { %v3572_v58 = vpop.f32.mrf.mxu3  ;;  %v3640_v55 = vpop.f32.mrf.mxu0 }
 0x99f   :  { %v3641_v43 = vadd.f32 %v3640_v55, %v3090_v47  ;;  %v3573_v46 = vadd.f32 %v3572_v58, %v3559_v2  ;;  %v5585_v2 = vld [vmem:[%s8525_s14 + $0x50] sm:$0xf] }
 0x9a1   :  { %v3612_v34 = vpop.f32.mrf.mxu1  ;;  %v3587_v5 = vadd.f32 %v3586_v32, %v3573_v46 }
 0x9a4   :  { %v3598_v28 = vpop.f32.mrf.mxu2 }
 0x9a5   :  { %v3599_v19 = vadd.f32 %v3598_v28, %v3585_v39  ;;  %v5595_v39 = vld [vmem:[%s8525_s14 + $0x68] sm:$0xf0] }
 0x9a6   :  { %v3642_v35 = vpop.f32.mrf.mxu0 }
 0x9a7   :  { %v3613_v0 = vadd.f32 %v3612_v34, %v3599_v19  ;;  %v3643_v3 = vadd.f32 %v3642_v35, %v3090_v47  ;;  %v5603_v35 = vld [vmem:[%s8525_s14 + $0x78] sm:$0xf0]  ;;  %v5593_v47 = vld [vmem:[%s8525_s14 + $0x60] sm:$0xf]  ;;  %v6000_v19 = vld [vmem:[%s8525_s14 + $0x54] sm:$0xf0] }
 0x9a9   :  { %v3614_v44 = vpop.f32.mrf.mxu1 }
 0x9ac   :  { %v3600_v38 = vpop.f32.mrf.mxu2 }
 0x9ad   :  { %v3601_v61 = vadd.f32 %v3600_v38, %v3587_v5 }
 0x9ae   :  { %v3696_v60 = vpop.f32.mrf.mxu0 }
 0x9af   :  { %v3615_v49 = vadd.f32 %v3614_v44, %v3601_v61  ;;  %v6003_v44 = vld [vmem:[%s8525_s14 + $0x74] sm:$0xf]  ;;  %v5996_v61 = vld [vmem:[%s8525_s14 + $0x34] sm:$0xf0] }
 0x9b1   :  { %v3682_v37 = vpop.f32.mrf.mxu1 }
 0x9b4   :  { %v3654_v8 = vpop.f32.mrf.mxu2 }
 0x9b5   :  { %v3655_v33 = vadd.f32 %v3654_v8, %v3641_v43  ;;  %v5594_v43 = vor.u32 %v6002_v52, %v5593_v47  ;;  %v5609_v47 = vld [vmem:[%s8525_s14 + $0x80] sm:$0xf] }
 0x9b6   :  { %v3698_v21 = vpop.f32.mrf.mxu0 }
 0x9b7   :  { %v3626_v36 = vpop.f32.mrf.mxu3  ;;  %3949 = vmatpush.bf16.msrb.mxu3 %v5594_v43  ;;  %v5989_v43 = vld [vmem:[%s8525_s14 + $0x4] sm:$0xf] }
 0x9b8   :  { %v3627_v59 = vadd.f32 %v3626_v36, %v3613_v0  ;;  %v5997_v0 = vld [vmem:[%s8525_s14 + $0x44] sm:$0xf] }
 0x9b9   :  { %v3684_v16 = vpop.f32.mrf.mxu1 }
 0x9ba   :  { %v3715_v11 = vadd.f32 %v3627_v59, %v7709_v62 }
 0x9bc   :  { %v3656_v42 = vpop.f32.mrf.mxu2 }
 0x9bd   :  { %v3657_v4 = vadd.f32 %v3656_v42, %v3643_v3  ;;  %v6001_v42 = vld [vmem:[%s8525_s14 + $0x64] sm:$0xf]  ;;  %v5579_v3 = vld [vmem:[%s8525_s14 + $0x48] sm:$0xf0] }
 0x9be   :  { %v5582_v5 = vor.u32 %v5997_v0, %v5579_v3 }
 0x9bf   :  { %v3628_v48 = vpop.f32.mrf.mxu3 }
 0x9c0   :  { %v3629_v57 = vadd.f32 %v3628_v48, %v3615_v49  ;;  %v5606_v48 = vor.u32 %v6003_v44, %v5603_v35  ;;  %v5561_v49 = vld [vmem:[%s8525_s14 + $0x20] sm:$0xf] }
 0x9c1   :  { %v5545_v35 = vld [vmem:[%s8525_s14] sm:$0xf] }
 0x9c2   :  { %v3717_v12 = vadd.f32 %v3629_v57, %v7713_v24  ;;  %3976 = vmatpush.bf16.msra.mxu2 %v5606_v48  ;;  %v5990_v48 = vld [vmem:[%s8525_s14 + $0x4] sm:$0xf0] }
 0x9c3   :  { %v5546_v52 = vor.u32 %v5990_v48, %v5545_v35 }
 0x9c4   :  { %v3710_v1 = vpop.f32.mrf.mxu2 }
 0x9c7   :  { %v3668_v53 = vpop.f32.mrf.mxu3 }
 0x9c8   :  { %v3669_v56 = vadd.f32 %v3668_v53, %v3655_v33  ;;  %v5598_v33 = vor.u32 %v6001_v42, %v5595_v39  ;;  %v5586_v53 = vor.u32 %v6000_v19, %v5585_v2  ;;  %v6006_v42 = vld [vmem:[%s8525_s14 + $0x84] sm:$0xf0]  ;;  %v5547_v39 = vld [vmem:[%s8525_s14 + $0x8] sm:$0xf0] }
 0x9c9   :  { %v5610_v2 = vor.u32 %v6006_v42, %v5609_v47  ;;  %v5550_v19 = vor.u32 %v5989_v43, %v5547_v39 }
 0x9ca   :  { %v3683_v54 = vadd.f32 %v3682_v37, %v3669_v56  ;;  %3977 = vmatpush.bf16.msra.mxu2 %v5598_v33  ;;  %v5999_v37 = vld [vmem:[%s8525_s14 + $0x54] sm:$0xf]  ;;  %v5587_v56 = vld [vmem:[%s8525_s14 + $0x58] sm:$0xf0]  ;;  %3950 = vmatpush.bf16.msrb.mxu3 %v5586_v53  ;;  %v5611_v53 = vld [vmem:[%s8525_s14 + $0x88] sm:$0xf0] }
 0x9cb   :  { %v5590_v46 = vor.u32 %v5999_v37, %v5587_v56  ;;  %v6005_v37 = vld [vmem:[%s8525_s14 + $0x84] sm:$0xf] }
 0x9cc   :  { %v3697_v14 = vadd.f32 %v3696_v60, %v3683_v54  ;;  %v3712_v22 = vpop.f32.mrf.mxu2  ;;  %v5577_v60 = vld [vmem:[%s8525_s14 + $0x40] sm:$0xf]  ;;  %v5998_v54 = vld [vmem:[%s8525_s14 + $0x44] sm:$0xf0]  ;;  %v5614_v56 = vor.u32 %v6005_v37, %v5611_v53 }
 0x9ce   :  { %v3711_v7 = vadd.f32 %v3710_v1, %v3697_v14  ;;  %3978 = vmatpush.bf16.msra.mxu2 %v5590_v46  ;;  %v5578_v1 = vor.u32 %v5998_v54, %v5577_v60  ;;  %v3817_v14 = vld [vmem:[%s8525_s14 + $0xb0] sm:$0x33] }
 0x9cf   :  { %v3670_v9 = vpop.f32.mrf.mxu3  ;;  %v3891_v59 = vunpack.c.l.b16 %v3817_v14 }
 0x9d0   :  { %v3671_v6 = vadd.f32 %v3670_v9, %v3657_v4  ;;  %v3716_v13 = vadd.f32 %v3711_v7, %v7711_v15  ;;  %v3892_v4 = vunpack.c.h.b16 %v3817_v14  ;;  %3951 = vmatpush.bf16.msrb.mxu3 %v5578_v1  ;;  %v5569_v7 = vld [vmem:[%s8525_s14 + $0x30] sm:$0xf] }
 0x9d1   :  { %v3915_v9 = vpack.c.b16 %v3891_v59, %v3891_v59 }
 0x9d2   :  { %v3685_v17 = vadd.f32 %v3684_v16, %v3671_v6  ;;  %v3721_v18 = vsel %vm947_vm1, %v3716_v13, 0.0  ;;  %3979 = vmatpush.bf16.msra.mxu2 %v5582_v5  ;;  %v5995_v6 = vld [vmem:[%s8525_s14 + $0x34] sm:$0xf]  ;;  %v5571_v16 = vld [vmem:[%s8525_s14 + $0x38] sm:$0xf0] }
 0x9d3   :  { %v3722_v50 = vadd.f32 %v3721_v18, %v3715_v11  ;;  %v5574_v18 = vor.u32 %v5995_v6, %v5571_v16 }
 0x9d4   :  { %v3699_v63 = vadd.f32 %v3698_v21, %v3685_v17  ;;  %v3943_v17 = vsel %vm951_vm0, %v3915_v9, 0  ;;  %v3719_v9 = vld [vmem:[%s8519_s8] sm:$0x3] }
 0x9d5   :  { %3723 = vadd.xlane.f32.xlu2 %v3722_v50  ;;  %3966 = vmatpush.bf16.msra.mxu1 %v3943_v17  ;;  %v5994_v50 = vld [vmem:[%s8525_s14 + $0x24] sm:$0xf0]  ;;  %v3776_v16 = vperm.slane %v3719_v9, 0  ;;  %v3777_v17 = vperm.slane %v3719_v9, 1 }
 0x9d6   :  { %v3713_v23 = vadd.f32 %v3712_v22, %v3699_v63  ;;  %3980 = vmatpush.bf16.msra.mxu2 %v5574_v18  ;;  %v5625_v63 = vld [vmem:[%s8525_s14 + $0xa0] sm:$0xf]  ;;  %v5562_v57 = vor.u32 %v5994_v50, %v5561_v49  ;;  %v6010_v22 = vld [vmem:[%s8525_s14 + $0xa4] sm:$0xf0] }
 0x9d8   :  { %v3718_v10 = vadd.f32 %v3713_v23, %v7715_v30  ;;  %v5993_v23 = vld [vmem:[%s8525_s14 + $0x24] sm:$0xf] }
 0x9da   :  { %v3725_v15 = vsel %vm947_vm1, %v3718_v10, 0.0 }
 0x9db   :  { %v3726_v20 = vadd.f32 %v3725_v15, %v3717_v12 }
 0x9dd   :  { %3727 = vadd.xlane.f32.xlu0 %v3726_v20  ;;  %v6009_v20 = vld [vmem:[%s8525_s14 + $0xa4] sm:$0xf] }
 0xa48   :  { %v3724_v62 = vpop.xlane.xlu2 %3723 }
 0xa49   :  { %v3729_v25 = vmul.f32 %v3724_v62, %v7659_v40  ;;  %v5627_v62 = vld [vmem:[%s8525_s14 + $0xa8] sm:$0xf0] }
 0xa4b   :  { %v8325_v26 = vsub.f32 %v3715_v11, %v3729_v25  ;;  %v8327_v27 = vsub.f32 %v3716_v13, %v3729_v25  ;;  %v3916_v13 = vpack.c.b16 %v3892_v4, %v3892_v4  ;;  %v5570_v11 = vor.u32 %v5996_v61, %v5569_v7 }
 0xa4c   :  { %v5630_v25 = vor.u32 %v6009_v20, %v5627_v62 }
 0xa4d   :  { %v3735_v28 = vmul.f32 %v8325_v26, %v8325_v26  ;;  %v3736_v29 = vmul.f32 %v8327_v27, %v8327_v27  ;;  %v3946_v21 = vsel %vm951_vm0, %v3916_v13, 0  ;;  %3952 = vmatpush.bf16.msrb.mxu3 %v5570_v11  ;;  %v3720_v11 = vld [vmem:[%s8520_s9] sm:$0x3] }
 0xa4e   :  { %3994 = vmatpush.bf16.msrb.mxu0 %v3946_v21  ;;  %v3785_v50 = vperm.slane %v3720_v11, 0 }
 0xa4f   :  { %v3739_v30 = vsel %vm947_vm1, %v3736_v29, 0.0  ;;  %v5992_v29 = vld [vmem:[%s8525_s14 + $0x14] sm:$0xf0] }
 0xa50   :  { %v3728_v24 = vpop.xlane.xlu0 %3727  ;;  %v3740_v31 = vadd.f32 %v3739_v30, %v3735_v28  ;;  %v5553_v28 = vld [vmem:[%s8525_s14 + $0x10] sm:$0xf] }
 0xa51   :  { %v3730_v32 = vmul.f32 %v3728_v24, %v7659_v40  ;;  %3953 = vmatpush.bf16.msrb.mxu3 %v5562_v57  ;;  %v5617_v30 = vld [vmem:[%s8525_s14 + $0x90] sm:$0xf]  ;;  %v5554_v24 = vor.u32 %v5992_v29, %v5553_v28 }
 0xa52   :  { %3741 = vadd.xlane.f32.xlu1 %v3740_v31  ;;  %3995 = vmatpush.bf16.msrb.mxu0 %v5630_v25  ;;  %v6008_v31 = vld [vmem:[%s8525_s14 + $0x94] sm:$0xf0] }
 0xa53   :  { %v8335_v38 = vsub.f32 %v3717_v12, %v3730_v32  ;;  %v8337_v58 = vsub.f32 %v3718_v10, %v3730_v32  ;;  %v5563_v10 = vld [vmem:[%s8525_s14 + $0x28] sm:$0xf0]  ;;  %v5626_v12 = vor.u32 %v6010_v22, %v5625_v63  ;;  %v5991_v32 = vld [vmem:[%s8525_s14 + $0x14] sm:$0xf]  ;;  %v3786_v63 = vperm.slane %v3720_v11, 1 }
 0xa54   :  { %v5566_v15 = vor.u32 %v5993_v23, %v5563_v10 }
 0xa55   :  { %v3737_v34 = vmul.f32 %v8335_v38, %v8335_v38  ;;  %v3738_v55 = vmul.f32 %v8337_v58, %v8337_v58  ;;  %3967 = vmatpush.bf16.msra.mxu1 %v5626_v12  ;;  %3954 = vmatpush.bf16.msrb.mxu3 %v5554_v24 }
 0xa56   :  { %3981 = vmatpush.bf16.msra.mxu2 %v5566_v15 }
 0xa57   :  { %v3743_v8 = vsel %vm947_vm1, %v3738_v55, 0.0  ;;  %v5618_v55 = vor.u32 %v6008_v31, %v5617_v30 }
 0xa58   :  { %v3744_v36 = vadd.f32 %v3743_v8, %v3737_v34  ;;  %v5555_v34 = vld [vmem:[%s8525_s14 + $0x18] sm:$0xf0] }
 0xa59   :  { %v5558_v8 = vor.u32 %v5991_v32, %v5555_v34  ;;  %3968 = vmatpush.bf16.msra.mxu1 %v5618_v55  ;;  %3955 = vmatpush.bf16.msrb.mxu3 %v5546_v52 }
 0xa5a   :  { %3745 = vadd.xlane.f32.xlu2 %v3744_v36  ;;  %v6007_v36 = vld [vmem:[%s8525_s14 + $0x94] sm:$0xf] }
 0xa5b   :  { %v5622_v44 = vor.u32 %v6007_v36, %v5619_v41  ;;  %3982 = vmatpush.bf16.msra.mxu2 %v5558_v8 }
 0xa5d   :  { %3996 = vmatpush.bf16.msrb.mxu0 %v5622_v44  ;;  %3969 = vmatpush.bf16.msra.mxu1 %v5610_v2 }
 0xa5f   :  { %3983 = vmatpush.bf16.msra.mxu2 %v5550_v19 }
 0xa61   :  { %3997 = vmatpush.bf16.msrb.mxu0 %v5614_v56 }
 0xac5   :  { %v3742_v51 = vpop.xlane.xlu1 %3741 }
 0xac6   :  { %v3747_v45 = vmul.f32 %v3742_v51, %v7659_v40 }
 0xac8   :  { %v3749_v33 = vadd.f32 1e-05, %v3747_v45 }
 0xaca   :  { %6057 = vrsqrt.f32 %v3749_v33  ;;  %vm3757_vm15 = vweird.f32 %v3749_v33 }
 0xacd   :  { %v3746_v46 = vpop.xlane.xlu2 %3745 }
 0xace   :  { %v3748_v60 = vmul.f32 %v3746_v46, %v7659_v40 }
 0xad0   :  { %v6058_v54 = vpop.eup %6057  ;;  %v3750_v0 = vadd.f32 1e-05, %v3748_v60 }
 0xad1   :  { %v3752_v1 = vmul.f32 %v6058_v54, %v3749_v33  ;;  %vm3758_vm14 = vweird.f32 %v6058_v54 }
 0xad2   :  { %6059 = vrsqrt.f32 %v3750_v0  ;;  %vm3759_vm0 = vmor %vm3757_vm15, %vm3758_vm14  ;;  %vm3767_vm3 = vweird.f32 %v3750_v0 }
 0xad3   :  { %v3753_v3 = vmul.f32 %v6058_v54, %v3752_v1 }
 0xad5   :  { %v3754_v14 = vmul.f32 0.5, %v3753_v3 }
 0xad7   :  { %v3755_v5 = vsub.f32 1.5, %v3754_v14 }
 0xad8   :  { %v6060_v59 = vpop.eup %6059 }
 0xad9   :  { %v3756_v4 = vmul.f32 %v6058_v54, %v3755_v5  ;;  %v3762_v7 = vmul.f32 %v6060_v59, %v3750_v0  ;;  %vm3768_vm2 = vweird.f32 %v6060_v59 }
 0xada   :  { %vm3769_vm4 = vmor %vm3767_vm3, %vm3768_vm2 }
 0xadb   :  { %v3763_v61 = vmul.f32 %v6060_v59, %v3762_v7  ;;  %v3760_v6 = vsel %vm3759_vm0, %v6058_v54, %v3756_v4 }
 0xadc   :  { %v3771_v18 = vmul.f32 %v3760_v6, %v8325_v26  ;;  %v3772_v21 = vmul.f32 %v3760_v6, %v8327_v27 }
 0xadd   :  { %v3764_v40 = vmul.f32 0.5, %v3763_v61 }
 0xade   :  { %v3780_v22 = vmul.f32 %v3776_v16, %v3771_v18  ;;  %v3781_v23 = vmul.f32 %v3777_v17, %v3772_v21 }
 0xadf   :  { %v3765_v13 = vsub.f32 1.5, %v3764_v40 }
 0xae0   :  { %v3789_v62 = vadd.f32 %v3785_v50, %v3780_v22  ;;  %v3790_v25 = vadd.f32 %v3786_v63, %v3781_v23 }
 0xae1   :  { %v3766_v49 = vmul.f32 %v6060_v59, %v3765_v13 }
 0xae3   :  { %v3770_v57 = vsel %vm3769_vm4, %v6060_v59, %v3766_v49 }
 0xae4   :  { %v3773_v10 = vmul.f32 %v3770_v57, %v8335_v38  ;;  %v3774_v12 = vmul.f32 %v3770_v57, %v8337_v58  ;;  %v3818_v38 = vld [vmem:[%s8526_s15] sm:$0x3]  ;;  %s6126_s15 = smov [#allocation5]  }
 0xae5   :  { %v3820_v58 = vperm.slane %v3818_v38, 0  ;;  %v3821_v30 = vperm.slane %v3818_v38, 1  ;;  %s4044_s7 = sshll.u32 %s6126_s15, 4  ;;  %s4045_s7 = int_to_ptr.vmem [resolvable:$true] %s4044_s7 }
 0xae6   :  { %v3782_v15 = vmul.f32 %v3776_v16, %v3773_v10  ;;  %v3783_v20 = vmul.f32 %v3777_v17, %v3774_v12 }
 0xae8   :  { %v8493_v28 = vadd.f32 %v3785_v50, %v3782_v15  ;;  %v8495_v26 = vadd.f32 %v3786_v63, %v3783_v20 }
 0xaea   :  { %v3794_v27 = vpack.c.bf16 %v8495_v26, %v3790_v25  ;;  %v3793_v29 = vpack.c.bf16 %v8493_v28, %v3789_v62 }
 0xaec   :  { %3956 = vmatmul.bf16.vlgmr.msrb.gmra.mxu3 %v3793_v29  ;;  %5631 = vmatmul.msk.bf16.vlgmr.msra.gmra.mxu1 %vm947_vm1, %v3794_v27 }
 0xaed   :  { %3984 = vmatmul.bf16.vlgmr.msra.gmra.mxu2 %v3793_v29  ;;  %5632 = vmatmul.msk.bf16.vlgmr.msrb.gmra.mxu0 %vm947_vm1, %v3794_v27 }
 0xb69   :  { %v3971_v24 = vpop.f32.mrf.mxu1 }
 0xb6a   :  { %v3999_v32 = vpop.f32.mrf.mxu0 }
 0xb6f   :  { %v3957_v31 = vpop.f32.mrf.mxu3 }
 0xb70   :  { %v3958_v34 = vadd.f32 %v3957_v31, %v3820_v58  ;;  %v3985_v55 = vpop.f32.mrf.mxu2 }
 0xb71   :  { %v3986_v8 = vadd.f32 %v3985_v55, %v3821_v30  ;;  %v3973_v47 = vpop.f32.mrf.mxu1 }
 0xb72   :  { %v3972_v36 = vadd.f32 %v3971_v24, %v3958_v34  ;;  %v4001_v42 = vpop.f32.mrf.mxu0 }
 0xb73   :  { %v4000_v41 = vadd.f32 %v3999_v32, %v3986_v8 }
 0xb74   :  { %v4008_v51 = vmul.f32 1.442695, %v3972_v36  ;;  %vm4004_vm5 = vcmp.gt.f32.partialorder %v3972_v36, 0.0 }
 0xb75   :  { %v4010_v44 = vmul.f32 1.442695, %v4000_v41  ;;  %vm4005_vm6 = vcmp.gt.f32.partialorder %v4000_v41, 0.0 }
 0xb76   :  { %6061 = vpow2.f32 %v4008_v51 }
 0xb77   :  { %6063 = vpow2.f32 %v4010_v44  ;;  %v3959_v45 = vpop.f32.mrf.mxu3 }
 0xb78   :  { %v3960_v35 = vadd.f32 %v3959_v45, %v3820_v58  ;;  %v3987_v48 = vpop.f32.mrf.mxu2 }
 0xb79   :  { %v3988_v52 = vadd.f32 %v3987_v48, %v3821_v30 }
 0xb7a   :  { %v3974_v43 = vadd.f32 %v3973_v47, %v3960_v35 }
 0xb7b   :  { %v4002_v39 = vadd.f32 %v4001_v42, %v3988_v52 }
 0xb7c   :  { %v6062_v33 = vpop.eup %6061  ;;  %v4012_v2 = vmul.f32 1.442695, %v3974_v43  ;;  %vm4006_vm7 = vcmp.gt.f32.partialorder %v3974_v43, 0.0 }
 0xb7d   :  { %v6064_v19 = vpop.eup %6063  ;;  %v5633_v37 = vadd.f32 -1.0, %v6062_v33  ;;  %v4014_v53 = vmul.f32 1.442695, %v4002_v39  ;;  %vm4007_vm8 = vcmp.gt.f32.partialorder %v4002_v39, 0.0 }
 0xb7e   :  { %v5634_v56 = vadd.f32 -1.0, %v6064_v19  ;;  %6065 = vpow2.f32 %v4012_v2 }
 0xb7f   :  { %v4020_v46 = vmul.f32 1.6732632, %v5633_v37  ;;  %6067 = vpow2.f32 %v4014_v53 }
 0xb80   :  { %v4021_v60 = vmul.f32 1.6732632, %v5634_v56 }
 0xb81   :  { %v4024_v54 = vsel %vm4004_vm5, %v3972_v36, %v4020_v46 }
 0xb82   :  { %v4028_v0 = vmul.f32 1.050701, %v4024_v54  ;;  %v4025_v1 = vsel %vm4005_vm6, %v4000_v41, %v4021_v60 }
 0xb83   :  { %v4029_v3 = vmul.f32 1.050701, %v4025_v1 }
 0xb84   :  { %v6066_v14 = vpop.eup %6065  ;;  %v4032_v5 = vadd.f32 %v4028_v0, %v3789_v62 }
 0xb85   :  { %v6068_v59 = vpop.eup %6067  ;;  %v4033_v4 = vadd.f32 %v4029_v3, %v3790_v25  ;;  %v5635_v7 = vadd.f32 -1.0, %v6066_v14 }
 0xb86   :  { %4036 = vst [vmem:[#allocation5] sm:$0xff] %v4032_v5  ;;  %v5636_v61 = vadd.f32 -1.0, %v6068_v59 }
 0xb87   :  { %4037 = vst.msk [vmem:[#allocation5 + $0x8] sm:$0xff] %vm947_vm1, %v4033_v4  ;;  %v4022_v9 = vmul.f32 1.6732632, %v5635_v7 }
 0xb88   :  { %v4023_v6 = vmul.f32 1.6732632, %v5636_v61 }
 0xb89   :  { %v4026_v40 = vsel %vm4006_vm7, %v3974_v43, %v4022_v9 }
 0xb8a   :  { %v4030_v13 = vmul.f32 1.050701, %v4026_v40  ;;  %v4027_v11 = vsel %vm4007_vm8, %v4002_v39, %v4023_v6 }
 0xb8b   :  { %v4031_v16 = vmul.f32 1.050701, %v4027_v11 }
 0xb8c   :  { %v4034_v17 = vadd.f32 %v4030_v13, %v8493_v28 }
 0xb8d   :  { %v4035_v18 = vadd.f32 %v4031_v16, %v8495_v26 }
 0xb8e   :  { %4038 = vst [vmem:[#allocation5 + $0x10] sm:$0xff] %v4034_v17 }
 0xb8f   :  { %4039 = vst.msk [vmem:[#allocation5 + $0x18] sm:$0xff] %vm947_vm1, %v4035_v18 }
 0xb90   :  { %4052 = dma.vmem_to_hbm [thread:$0]  %s4045_s7, 512, %s4047_s0, [#allocation4], %s6127_s17, %s6127_s17, %s6128_s18  }
 0xb91   :  { %6119 = dma.done.wait [#allocation4], 512  }
 0xb92   :  { %6120 = vsyncadd [#allocation4], 4294966784 }
 0xb93   :  { %4057 = vsyncpa [#allocation3], 1 }
 0xb94   :  { %4058 = vsyncpa [#allocation4], 1 }

</bundles_post_ra>
